<compile_context>
chip_gen: v7x
topology: tpu7x:2x2x1
jax: 0.10.0
libtpu: 0.0.40
codegen_flags: <defaults>
</compile_context>

<pallas_src>
import functools

import numpy as np
import jax
import jax.numpy as jnp
from jax.experimental import pallas as pl
from jax.experimental.pallas import tpu as pltpu

_EPS = 1e-5
_VMEM = pl.BlockSpec(memory_space=pltpu.MemorySpace.VMEM)


def _silu(v):
    return v * (1.0 / (1.0 + jnp.exp(-v)))


# --------------------------- kernel bodies ---------------------------------

def _gn_stats(x):
    """Per-(batch, group) mean / inv-std over the (C//G, HW) trailing axes."""
    mean = jnp.mean(jnp.mean(x, axis=-1, keepdims=True), axis=-2, keepdims=True)
    centered = x - mean
    sq = centered * centered
    var = jnp.mean(jnp.mean(sq, axis=-1, keepdims=True), axis=-2, keepdims=True)
    return centered, jax.lax.rsqrt(var + _EPS)


def _gn_silu_kernel(x_ref, g_ref, b_ref, o_ref):
    """GroupNorm + SiLU on the (B, G, C//G, HW) view."""
    centered, inv = _gn_stats(x_ref[...])
    y = centered * inv * g_ref[...] + b_ref[...]
    o_ref[...] = _silu(y)


def _gn_silu_dropout_kernel(x_ref, g_ref, b_ref, u_ref, o_ref, *, rate):
    """GroupNorm + SiLU + inverted dropout (train mode), fused in one pass.

    u_ref holds uniform [0,1) randoms generated in the wrapper with jax.random.
    TODO(synk): does not reproduce torch's RNG stream (only the distribution).
    """
    centered, inv = _gn_stats(x_ref[...])
    y = _silu(centered * inv * g_ref[...] + b_ref[...])
    keep = u_ref[...] >= np.float32(rate)
    o_ref[...] = jnp.where(keep, y * np.float32(1.0 / (1.0 - rate)), 0.0)


def _silu_matmul_bias_kernel(t_ref, w_ref, b_ref, o_ref):
    """o = silu(t) @ w + b  (timestep-embedding projection)."""
    t = _silu(t_ref[...])
    o_ref[...] = jnp.dot(t, w_ref[...], preferred_element_type=jnp.float32) + b_ref[...]


def _matmul_bias_kernel(a_ref, w_ref, b_ref, o_ref):
    """o = a @ w + b  (NIN / 1x1-conv shortcut, conv3x3 shortcut)."""
    o_ref[...] = jnp.dot(a_ref[...], w_ref[...],
                         preferred_element_type=jnp.float32) + b_ref[...]


def _matmul_bias_add_kernel(a_ref, w_ref, b_ref, add_ref, o_ref, *, scale):
    """o = (a @ w + b + add) * scale.

    conv3x3-as-im2col-matmul fused with bias, an additive term (temb broadcast
    or the residual shortcut) and the optional skip-rescale.
    """
    acc = jnp.dot(a_ref[...], w_ref[...], preferred_element_type=jnp.float32)
    acc = acc + b_ref[...] + add_ref[...]
    if scale != 1.0:
        acc = acc * np.float32(scale)
    o_ref[...] = acc


# --------------------------- wrappers ---------------------------------------

def _group_norm_silu(x_nchw, gamma, beta, num_groups, *, dropout_rate=0.0, rng_key=None):
    B, C, H, W = x_nchw.shape
    G = num_groups
    Cg = C // G
    HW = H * W
    x_r = x_nchw.reshape(B, G, Cg, HW)
    g_r = gamma.astype(jnp.float32).reshape(1, G, Cg, 1)
    b_r = beta.astype(jnp.float32).reshape(1, G, Cg, 1)
    out_shape = jax.ShapeDtypeStruct((B, G, Cg, HW), jnp.float32)

    if dropout_rate > 0.0:
        u = jax.random.uniform(rng_key, (B, G, Cg, HW), dtype=jnp.float32)
        kern = functools.partial(_gn_silu_dropout_kernel, rate=float(dropout_rate))
        y = pl.pallas_call(
            kern, out_shape=out_shape,
            in_specs=[_VMEM, _VMEM, _VMEM, _VMEM], out_specs=_VMEM,
        )(x_r, g_r, b_r, u)
    else:
        y = pl.pallas_call(
            _gn_silu_kernel, out_shape=out_shape,
            in_specs=[_VMEM, _VMEM, _VMEM], out_specs=_VMEM,
        )(x_r, g_r, b_r)
    return y.reshape(B, C, H, W)


def _im2col_3x3(x_nhwc):
    """(B,H,W,C) -> (B*H*W, 9*C) patches for a padding-1 3x3 conv (layout only)."""
    B, H, W, C = x_nhwc.shape
    xp = jnp.pad(x_nhwc, ((0, 0), (1, 1), (1, 1), (0, 0)))
    cols = [xp[:, dy:dy + H, dx:dx + W, :] for dy in range(3) for dx in range(3)]
    return jnp.concatenate(cols, axis=-1).reshape(B * H * W, 9 * C)


def resnet_block_ddpmpp_forward(params, x, temb=None, *, out_ch=None,
                                conv_shortcut=False, dropout=0.1,
                                skip_rescale=False, train=True, dropout_seed=0):
    B, C, H, W = x.shape
    out_ch = out_ch if out_ch else C
    G1 = min(C // 4, 32)
    G2 = min(out_ch // 4, 32)
    HW = H * W
    x = x.astype(jnp.float32)

    # GroupNorm(C) + SiLU (fused kernel)
    h = _group_norm_silu(x, params["gn1_gamma"], params["gn1_beta"], G1)

    # conv3x3(C, out_ch) fused with bias + temb projection add
    patches1 = _im2col_3x3(jnp.transpose(h, (0, 2, 3, 1)))          # (B*HW, 9C)
    w1 = params["conv1_w"].reshape(9 * C, out_ch)
    b1 = params["conv1_b"].reshape(1, out_ch)

    if temb is not None:
        tproj = pl.pallas_call(
            _silu_matmul_bias_kernel,
            out_shape=jax.ShapeDtypeStruct((B, out_ch), jnp.float32),
            in_specs=[_VMEM, _VMEM, _VMEM], out_specs=_VMEM,
        )(temb.astype(jnp.float32), params["temb_w"], params["temb_b"].reshape(1, out_ch))
        add1 = jnp.broadcast_to(tproj[:, None, :], (B, HW, out_ch)).reshape(B * HW, out_ch)
    else:
        add1 = jnp.zeros((B * HW, out_ch), jnp.float32)

    conv1 = pl.pallas_call(
        functools.partial(_matmul_bias_add_kernel, scale=1.0),
        out_shape=jax.ShapeDtypeStruct((B * HW, out_ch), jnp.float32),
        in_specs=[_VMEM, _VMEM, _VMEM, _VMEM], out_specs=_VMEM,
    )(patches1, w1, b1, add1)
    h = jnp.transpose(conv1.reshape(B, H, W, out_ch), (0, 3, 1, 2))  # back to NCHW

    # GroupNorm(out_ch) + SiLU + dropout (single fused kernel)
    use_dropout = bool(train) and dropout > 0.0
    rng_key = jax.random.PRNGKey(dropout_seed)
    h = _group_norm_silu(h, params["gn2_gamma"], params["gn2_beta"], G2,
                         dropout_rate=dropout if use_dropout else 0.0, rng_key=rng_key)

    # shortcut branch
    x_nhwc_flat = jnp.transpose(x, (0, 2, 3, 1)).reshape(B * HW, C)
    if C != out_ch:
        if conv_shortcut:
            xpatch = _im2col_3x3(jnp.transpose(x, (0, 2, 3, 1)))
            shortcut = pl.pallas_call(
                _matmul_bias_kernel,
                out_shape=jax.ShapeDtypeStruct((B * HW, out_ch), jnp.float32),
                in_specs=[_VMEM, _VMEM, _VMEM], out_specs=_VMEM,
            )(xpatch, params["short_w"].reshape(9 * C, out_ch),
              params["short_b"].reshape(1, out_ch))
        else:
            # NIN: 1x1 conv over channels (intended semantics of the spec's NIN).
            shortcut = pl.pallas_call(
                _matmul_bias_kernel,
                out_shape=jax.ShapeDtypeStruct((B * HW, out_ch), jnp.float32),
                in_specs=[_VMEM, _VMEM, _VMEM], out_specs=_VMEM,
            )(x_nhwc_flat, params["nin_w"], params["nin_b"].reshape(1, out_ch))
    else:
        shortcut = x_nhwc_flat

    # conv3x3(out_ch, out_ch) fused with bias + residual add + skip rescale
    patches2 = _im2col_3x3(jnp.transpose(h, (0, 2, 3, 1)))          # (B*HW, 9*out_ch)
    w2 = params["conv2_w"].reshape(9 * out_ch, out_ch)
    b2 = params["conv2_b"].reshape(1, out_ch)
    scale = (1.0 / np.sqrt(2.0)) if skip_rescale else 1.0
    out_flat = pl.pallas_call(
        functools.partial(_matmul_bias_add_kernel, scale=scale),
        out_shape=jax.ShapeDtypeStruct((B * HW, out_ch), jnp.float32),
        in_specs=[_VMEM, _VMEM, _VMEM, _VMEM], out_specs=_VMEM,
    )(patches2, w2, b2, shortcut)

    return jnp.transpose(out_flat.reshape(B, H, W, out_ch), (0, 3, 1, 2))


# --------------------------- pure-JAX reference ------------------------------

def reference_forward(params, x, temb, *, out_ch, conv_shortcut=False, skip_rescale=False):
    B, C, H, W = x.shape
    G1, G2 = min(C // 4, 32), min(out_ch // 4, 32)
    HI = jax.lax.Precision.HIGHEST

    def gn(v, gamma, beta, G):
        b, c, h, w = v.shape
        vr = v.reshape(b, G, -1)
        mean = vr.mean(axis=-1, keepdims=True)
        var = ((vr - mean) ** 2).mean(axis=-1, keepdims=True)
        vn = ((vr - mean) / jnp.sqrt(var + _EPS)).reshape(b, c, h, w)
        return vn * gamma[None, :, None, None] + beta[None, :, None, None]

    def silu(v):
        return v * jax.nn.sigmoid(v)

    def conv3x3(v, w_hwio, bias):
        v_nhwc = jnp.transpose(v, (0, 2, 3, 1))
        y = jax.lax.conv_general_dilated(
            v_nhwc, w_hwio, (1, 1), ((1, 1), (1, 1)),
            dimension_numbers=("NHWC", "HWIO", "NHWC"), precision=HI)
        return jnp.transpose(y + bias[None, None, None, :], (0, 3, 1, 2))

    h = silu(gn(x, params["gn1_gamma"], params["gn1_beta"], G1))
    h = conv3x3(h, params["conv1_w"], params["conv1_b"])
    if temb is not None:
        tproj = jnp.matmul(silu(temb), params["temb_w"], precision=HI) + params["temb_b"]
        h = h + tproj[:, :, None, None]
    h = silu(gn(h, params["gn2_gamma"], params["gn2_beta"], G2))
    h = conv3x3(h, params["conv2_w"], params["conv2_b"])
    if C != out_ch:
        if conv_shortcut:
            xs = conv3x3(x, params["short_w"], params["short_b"])
        else:
            x_nhwc = jnp.transpose(x, (0, 2, 3, 1))
            xs = jnp.matmul(x_nhwc, params["nin_w"], precision=HI) + params["nin_b"]
            xs = jnp.transpose(xs, (0, 3, 1, 2))
    else:
        xs = x
    out = xs + h
    return out / np.sqrt(2.0) if skip_rescale else out


def init_params(key, C, out_ch, temb_dim):
    ks = jax.random.split(key, 14)

    def normal(k, shape, scale):
        return scale * jax.random.normal(k, shape, dtype=jnp.float32)

    return {
        "gn1_gamma": 1.0 + 0.1 * jax.random.normal(ks[0], (C,), jnp.float32),
        "gn1_beta": 0.1 * jax.random.normal(ks[1], (C,), jnp.float32),
        "conv1_w": normal(ks[2], (3, 3, C, out_ch), 1.0 / np.sqrt(9 * C)),
        "conv1_b": normal(ks[3], (out_ch,), 0.1),
        "temb_w": normal(ks[4], (temb_dim, out_ch), 1.0 / np.sqrt(temb_dim)),
        "temb_b": normal(ks[5], (out_ch,), 0.1),
        "gn2_gamma": 1.0 + 0.1 * jax.random.normal(ks[6], (out_ch,), jnp.float32),
        "gn2_beta": 0.1 * jax.random.normal(ks[7], (out_ch,), jnp.float32),
        "conv2_w": normal(ks[8], (3, 3, out_ch, out_ch), 1.0 / np.sqrt(9 * out_ch)),
        "conv2_b": normal(ks[9], (out_ch,), 0.1),
        "nin_w": normal(ks[10], (C, out_ch), 1.0 / np.sqrt(C)),
        "nin_b": normal(ks[11], (out_ch,), 0.1),
        "short_w": normal(ks[12], (3, 3, C, out_ch), 1.0 / np.sqrt(9 * C)),
        "short_b": normal(ks[13], (out_ch,), 0.1),
    }


if __name__ == "__main__":
    B, C, H, W = 2, 8, 16, 16
    out_ch = 16
    temb_dim = 32

    key = jax.random.PRNGKey(0)
    kp, kx, kt = jax.random.split(key, 3)
    params = init_params(kp, C, out_ch, temb_dim)
    x = jax.random.normal(kx, (B, C, H, W), jnp.float32)
    temb = jax.random.normal(kt, (B, temb_dim), jnp.float32)

    fwd_eval = jax.jit(lambda p, xx, tt: resnet_block_ddpmpp_forward(
        p, xx, tt, out_ch=out_ch, dropout=0.1, skip_rescale=False, train=False))
    fwd_train = jax.jit(lambda p, xx, tt: resnet_block_ddpmpp_forward(
        p, xx, tt, out_ch=out_ch, dropout=0.1, skip_rescale=False,
        train=True, dropout_seed=42))

    # Deterministic (eval-mode) pass checked against the pure-JAX reference.
    out = jax.block_until_ready(fwd_eval(params, x, temb))
    ref = reference_forward(params, x, temb, out_ch=out_ch, skip_rescale=False)
    np.testing.assert_allclose(np.asarray(out), np.asarray(ref), rtol=2e-2, atol=2e-2)
    assert out.shape == (B, out_ch, H, W)

    # Train-mode pass exercising the fused GroupNorm+SiLU+dropout kernel.
    out_tr = jax.block_until_ready(fwd_train(params, x, temb))
    assert out_tr.shape == (B, out_ch, H, W)
    assert bool(jnp.all(jnp.isfinite(out_tr)))

    print("KERNEL_OK")
</pallas_src>

<mosaic_0001>
module attributes {stable_mosaic.version = 11 : i64} {
  func.func @_gn_silu_kernel(%arg0: memref<2x2x4x256xf32, #tpu.memory_space<vmem>>, %arg1: memref<1x2x4x1xf32, #tpu.memory_space<vmem>>, %arg2: memref<1x2x4x1xf32, #tpu.memory_space<vmem>>, %arg3: memref<2x2x4x256xf32, #tpu.memory_space<vmem>>) attributes {dimension_semantics = [], scalar_prefetch = 0 : i64, scratch_operands = 0 : i64, tpu.core_type = #tpu.core_type<tc>} {
    %c0 = arith.constant 0 : index
    %c0_0 = arith.constant 0 : index
    %c0_1 = arith.constant 0 : index
    %c0_2 = arith.constant 0 : index
    %0 = vector.load %arg0[%c0, %c0_0, %c0_1, %c0_2] : memref<2x2x4x256xf32, #tpu.memory_space<vmem>>, vector<2x2x4x256xf32>
    %cst = arith.constant dense<0.000000e+00> : vector<2x2x4xf32>
    %1 = vector.multi_reduction <add>, %0, %cst [3] : vector<2x2x4x256xf32> to vector<2x2x4xf32>
    %2 = vector.shape_cast %1 : vector<2x2x4xf32> to vector<2x2x4x1xf32>
    %cst_3 = arith.constant 2.560000e+02 : f32
    %3 = vector.broadcast %cst_3 : f32 to vector<2x2x4x1xf32>
    %4 = arith.divf %2, %3 : vector<2x2x4x1xf32>
    %cst_4 = arith.constant dense<0.000000e+00> : vector<2x2x1xf32>
    %5 = vector.multi_reduction <add>, %4, %cst_4 [2] : vector<2x2x4x1xf32> to vector<2x2x1xf32>
    %6 = vector.shape_cast %5 : vector<2x2x1xf32> to vector<2x2x1x1xf32>
    %cst_5 = arith.constant 4.000000e+00 : f32
    %7 = vector.broadcast %cst_5 : f32 to vector<2x2x1x1xf32>
    %8 = arith.divf %6, %7 : vector<2x2x1x1xf32>
    %9 = vector.broadcast %8 : vector<2x2x1x1xf32> to vector<2x2x4x256xf32>
    %10 = arith.subf %0, %9 : vector<2x2x4x256xf32>
    %11 = arith.mulf %10, %10 : vector<2x2x4x256xf32>
    %cst_6 = arith.constant dense<0.000000e+00> : vector<2x2x4xf32>
    %12 = vector.multi_reduction <add>, %11, %cst_6 [3] : vector<2x2x4x256xf32> to vector<2x2x4xf32>
    %13 = vector.shape_cast %12 : vector<2x2x4xf32> to vector<2x2x4x1xf32>
    %cst_7 = arith.constant 2.560000e+02 : f32
    %14 = vector.broadcast %cst_7 : f32 to vector<2x2x4x1xf32>
    %15 = arith.divf %13, %14 : vector<2x2x4x1xf32>
    %cst_8 = arith.constant dense<0.000000e+00> : vector<2x2x1xf32>
    %16 = vector.multi_reduction <add>, %15, %cst_8 [2] : vector<2x2x4x1xf32> to vector<2x2x1xf32>
    %17 = vector.shape_cast %16 : vector<2x2x1xf32> to vector<2x2x1x1xf32>
    %cst_9 = arith.constant 4.000000e+00 : f32
    %18 = vector.broadcast %cst_9 : f32 to vector<2x2x1x1xf32>
    %19 = arith.divf %17, %18 : vector<2x2x1x1xf32>
    %cst_10 = arith.constant 9.99999974E-6 : f32
    %20 = vector.broadcast %cst_10 : f32 to vector<2x2x1x1xf32>
    %21 = arith.addf %19, %20 : vector<2x2x1x1xf32>
    %22 = math.rsqrt %21 : vector<2x2x1x1xf32>
    %23 = vector.broadcast %22 : vector<2x2x1x1xf32> to vector<2x2x4x256xf32>
    %24 = arith.mulf %10, %23 : vector<2x2x4x256xf32>
    %c0_11 = arith.constant 0 : index
    %c0_12 = arith.constant 0 : index
    %c0_13 = arith.constant 0 : index
    %c0_14 = arith.constant 0 : index
    %25 = vector.load %arg1[%c0_11, %c0_12, %c0_13, %c0_14] : memref<1x2x4x1xf32, #tpu.memory_space<vmem>>, vector<1x2x4x1xf32>
    %26 = vector.broadcast %25 : vector<1x2x4x1xf32> to vector<2x2x4x256xf32>
    %27 = arith.mulf %24, %26 : vector<2x2x4x256xf32>
    %c0_15 = arith.constant 0 : index
    %c0_16 = arith.constant 0 : index
    %c0_17 = arith.constant 0 : index
    %c0_18 = arith.constant 0 : index
    %28 = vector.load %arg2[%c0_15, %c0_16, %c0_17, %c0_18] : memref<1x2x4x1xf32, #tpu.memory_space<vmem>>, vector<1x2x4x1xf32>
    %29 = vector.broadcast %28 : vector<1x2x4x1xf32> to vector<2x2x4x256xf32>
    %30 = arith.addf %27, %29 : vector<2x2x4x256xf32>
    %cst_19 = arith.constant 0.000000e+00 : f32
    %31 = vector.broadcast %cst_19 : f32 to vector<2x2x4x256xf32>
    %32 = arith.subf %31, %30 : vector<2x2x4x256xf32>
    %33 = math.exp %32 : vector<2x2x4x256xf32>
    %cst_20 = arith.constant 1.000000e+00 : f32
    %34 = vector.broadcast %cst_20 : f32 to vector<2x2x4x256xf32>
    %35 = arith.addf %34, %33 : vector<2x2x4x256xf32>
    %cst_21 = arith.constant 1.000000e+00 : f32
    %36 = vector.broadcast %cst_21 : f32 to vector<2x2x4x256xf32>
    %37 = arith.divf %36, %35 : vector<2x2x4x256xf32>
    %38 = arith.mulf %30, %37 : vector<2x2x4x256xf32>
    %c0_22 = arith.constant 0 : index
    %c0_23 = arith.constant 0 : index
    %c0_24 = arith.constant 0 : index
    %c0_25 = arith.constant 0 : index
    %39 = vector.load %arg3[%c0_22, %c0_23, %c0_24, %c0_25] : memref<2x2x4x256xf32, #tpu.memory_space<vmem>>, vector<2x2x4x256xf32>
    tpu.vector_store %arg3[%c0_22, %c0_23, %c0_24, %c0_25], %38 {strides = array<i32>} : memref<2x2x4x256xf32, #tpu.memory_space<vmem>>, vector<2x2x4x256xf32>,
    return
  }
}

module attributes {stable_mosaic.version = 11 : i64} {
  func.func @_silu_matmul_bias_kernel(%arg0: memref<2x32xf32, #tpu.memory_space<vmem>>, %arg1: memref<32x16xf32, #tpu.memory_space<vmem>>, %arg2: memref<1x16xf32, #tpu.memory_space<vmem>>, %arg3: memref<2x16xf32, #tpu.memory_space<vmem>>) attributes {dimension_semantics = [], scalar_prefetch = 0 : i64, scratch_operands = 0 : i64, tpu.core_type = #tpu.core_type<tc>} {
    %c0 = arith.constant 0 : index
    %c0_0 = arith.constant 0 : index
    %0 = vector.load %arg0[%c0, %c0_0] : memref<2x32xf32, #tpu.memory_space<vmem>>, vector<2x32xf32>
    %cst = arith.constant 0.000000e+00 : f32
    %1 = vector.broadcast %cst : f32 to vector<2x32xf32>
    %2 = arith.subf %1, %0 : vector<2x32xf32>
    %3 = math.exp %2 : vector<2x32xf32>
    %cst_1 = arith.constant 1.000000e+00 : f32
    %4 = vector.broadcast %cst_1 : f32 to vector<2x32xf32>
    %5 = arith.addf %4, %3 : vector<2x32xf32>
    %cst_2 = arith.constant 1.000000e+00 : f32
    %6 = vector.broadcast %cst_2 : f32 to vector<2x32xf32>
    %7 = arith.divf %6, %5 : vector<2x32xf32>
    %8 = arith.mulf %0, %7 : vector<2x32xf32>
    %c0_3 = arith.constant 0 : index
    %c0_4 = arith.constant 0 : index
    %9 = vector.load %arg1[%c0_3, %c0_4] : memref<32x16xf32, #tpu.memory_space<vmem>>, vector<32x16xf32>
    %cst_5 = arith.constant dense<0.000000e+00> : vector<2x16xf32>
    %10 = tpu.matmul %8, %9, %cst_5 {dimension_numbers = #tpu.dot_dimension_numbers<[1], [0], [0], [1], [0, 0, 1, 1], [], []>} : vector<2x32xf32>, vector<32x16xf32>, vector<2x16xf32> -> vector<2x16xf32>
    %c0_6 = arith.constant 0 : index
    %c0_7 = arith.constant 0 : index
    %11 = vector.load %arg2[%c0_6, %c0_7] : memref<1x16xf32, #tpu.memory_space<vmem>>, vector<1x16xf32>
    %12 = vector.broadcast %11 : vector<1x16xf32> to vector<2x16xf32>
    %13 = arith.addf %10, %12 : vector<2x16xf32>
    %c0_8 = arith.constant 0 : index
    %c0_9 = arith.constant 0 : index
    %14 = vector.load %arg3[%c0_8, %c0_9] : memref<2x16xf32, #tpu.memory_space<vmem>>, vector<2x16xf32>
    tpu.vector_store %arg3[%c0_8, %c0_9], %13 {strides = array<i32>} : memref<2x16xf32, #tpu.memory_space<vmem>>, vector<2x16xf32>,
    return
  }
}

module attributes {stable_mosaic.version = 11 : i64} {
  func.func @_matmul_bias_add_kernel(%arg0: memref<512x72xf32, #tpu.memory_space<vmem>>, %arg1: memref<72x16xf32, #tpu.memory_space<vmem>>, %arg2: memref<1x16xf32, #tpu.memory_space<vmem>>, %arg3: memref<512x16xf32, #tpu.memory_space<vmem>>, %arg4: memref<512x16xf32, #tpu.memory_space<vmem>>) attributes {dimension_semantics = [], scalar_prefetch = 0 : i64, scratch_operands = 0 : i64, tpu.core_type = #tpu.core_type<tc>} {
    %c0 = arith.constant 0 : index
    %c0_0 = arith.constant 0 : index
    %0 = vector.load %arg0[%c0, %c0_0] : memref<512x72xf32, #tpu.memory_space<vmem>>, vector<512x72xf32>
    %c0_1 = arith.constant 0 : index
    %c0_2 = arith.constant 0 : index
    %1 = vector.load %arg1[%c0_1, %c0_2] : memref<72x16xf32, #tpu.memory_space<vmem>>, vector<72x16xf32>
    %cst = arith.constant dense<0.000000e+00> : vector<512x16xf32>
    %2 = tpu.matmul %0, %1, %cst {dimension_numbers = #tpu.dot_dimension_numbers<[1], [0], [0], [1], [0, 0, 1, 1], [], []>} : vector<512x72xf32>, vector<72x16xf32>, vector<512x16xf32> -> vector<512x16xf32>
    %c0_3 = arith.constant 0 : index
    %c0_4 = arith.constant 0 : index
    %3 = vector.load %arg2[%c0_3, %c0_4] : memref<1x16xf32, #tpu.memory_space<vmem>>, vector<1x16xf32>
    %4 = vector.broadcast %3 : vector<1x16xf32> to vector<512x16xf32>
    %5 = arith.addf %2, %4 : vector<512x16xf32>
    %c0_5 = arith.constant 0 : index
    %c0_6 = arith.constant 0 : index
    %6 = vector.load %arg3[%c0_5, %c0_6] : memref<512x16xf32, #tpu.memory_space<vmem>>, vector<512x16xf32>
    %7 = arith.addf %5, %6 : vector<512x16xf32>
    %c0_7 = arith.constant 0 : index
    %c0_8 = arith.constant 0 : index
    %8 = vector.load %arg4[%c0_7, %c0_8] : memref<512x16xf32, #tpu.memory_space<vmem>>, vector<512x16xf32>
    tpu.vector_store %arg4[%c0_7, %c0_8], %7 {strides = array<i32>} : memref<512x16xf32, #tpu.memory_space<vmem>>, vector<512x16xf32>,
    return
  }
}

module attributes {stable_mosaic.version = 11 : i64} {
  func.func @_gn_silu_kernel(%arg0: memref<2x4x4x256xf32, #tpu.memory_space<vmem>>, %arg1: memref<1x4x4x1xf32, #tpu.memory_space<vmem>>, %arg2: memref<1x4x4x1xf32, #tpu.memory_space<vmem>>, %arg3: memref<2x4x4x256xf32, #tpu.memory_space<vmem>>) attributes {dimension_semantics = [], scalar_prefetch = 0 : i64, scratch_operands = 0 : i64, tpu.core_type = #tpu.core_type<tc>} {
    %c0 = arith.constant 0 : index
    %c0_0 = arith.constant 0 : index
    %c0_1 = arith.constant 0 : index
    %c0_2 = arith.constant 0 : index
    %0 = vector.load %arg0[%c0, %c0_0, %c0_1, %c0_2] : memref<2x4x4x256xf32, #tpu.memory_space<vmem>>, vector<2x4x4x256xf32>
    %cst = arith.constant dense<0.000000e+00> : vector<2x4x4xf32>
    %1 = vector.multi_reduction <add>, %0, %cst [3] : vector<2x4x4x256xf32> to vector<2x4x4xf32>
    %2 = vector.shape_cast %1 : vector<2x4x4xf32> to vector<2x4x4x1xf32>
    %cst_3 = arith.constant 2.560000e+02 : f32
    %3 = vector.broadcast %cst_3 : f32 to vector<2x4x4x1xf32>
    %4 = arith.divf %2, %3 : vector<2x4x4x1xf32>
    %cst_4 = arith.constant dense<0.000000e+00> : vector<2x4x1xf32>
    %5 = vector.multi_reduction <add>, %4, %cst_4 [2] : vector<2x4x4x1xf32> to vector<2x4x1xf32>
    %6 = vector.shape_cast %5 : vector<2x4x1xf32> to vector<2x4x1x1xf32>
    %cst_5 = arith.constant 4.000000e+00 : f32
    %7 = vector.broadcast %cst_5 : f32 to vector<2x4x1x1xf32>
    %8 = arith.divf %6, %7 : vector<2x4x1x1xf32>
    %9 = vector.broadcast %8 : vector<2x4x1x1xf32> to vector<2x4x4x256xf32>
    %10 = arith.subf %0, %9 : vector<2x4x4x256xf32>
    %11 = arith.mulf %10, %10 : vector<2x4x4x256xf32>
    %cst_6 = arith.constant dense<0.000000e+00> : vector<2x4x4xf32>
    %12 = vector.multi_reduction <add>, %11, %cst_6 [3] : vector<2x4x4x256xf32> to vector<2x4x4xf32>
    %13 = vector.shape_cast %12 : vector<2x4x4xf32> to vector<2x4x4x1xf32>
    %cst_7 = arith.constant 2.560000e+02 : f32
    %14 = vector.broadcast %cst_7 : f32 to vector<2x4x4x1xf32>
    %15 = arith.divf %13, %14 : vector<2x4x4x1xf32>
    %cst_8 = arith.constant dense<0.000000e+00> : vector<2x4x1xf32>
    %16 = vector.multi_reduction <add>, %15, %cst_8 [2] : vector<2x4x4x1xf32> to vector<2x4x1xf32>
    %17 = vector.shape_cast %16 : vector<2x4x1xf32> to vector<2x4x1x1xf32>
    %cst_9 = arith.constant 4.000000e+00 : f32
    %18 = vector.broadcast %cst_9 : f32 to vector<2x4x1x1xf32>
    %19 = arith.divf %17, %18 : vector<2x4x1x1xf32>
    %cst_10 = arith.constant 9.99999974E-6 : f32
    %20 = vector.broadcast %cst_10 : f32 to vector<2x4x1x1xf32>
    %21 = arith.addf %19, %20 : vector<2x4x1x1xf32>
    %22 = math.rsqrt %21 : vector<2x4x1x1xf32>
    %23 = vector.broadcast %22 : vector<2x4x1x1xf32> to vector<2x4x4x256xf32>
    %24 = arith.mulf %10, %23 : vector<2x4x4x256xf32>
    %c0_11 = arith.constant 0 : index
    %c0_12 = arith.constant 0 : index
    %c0_13 = arith.constant 0 : index
    %c0_14 = arith.constant 0 : index
    %25 = vector.load %arg1[%c0_11, %c0_12, %c0_13, %c0_14] : memref<1x4x4x1xf32, #tpu.memory_space<vmem>>, vector<1x4x4x1xf32>
    %26 = vector.broadcast %25 : vector<1x4x4x1xf32> to vector<2x4x4x256xf32>
    %27 = arith.mulf %24, %26 : vector<2x4x4x256xf32>
    %c0_15 = arith.constant 0 : index
    %c0_16 = arith.constant 0 : index
    %c0_17 = arith.constant 0 : index
    %c0_18 = arith.constant 0 : index
    %28 = vector.load %arg2[%c0_15, %c0_16, %c0_17, %c0_18] : memref<1x4x4x1xf32, #tpu.memory_space<vmem>>, vector<1x4x4x1xf32>
    %29 = vector.broadcast %28 : vector<1x4x4x1xf32> to vector<2x4x4x256xf32>
    %30 = arith.addf %27, %29 : vector<2x4x4x256xf32>
    %cst_19 = arith.constant 0.000000e+00 : f32
    %31 = vector.broadcast %cst_19 : f32 to vector<2x4x4x256xf32>
    %32 = arith.subf %31, %30 : vector<2x4x4x256xf32>
    %33 = math.exp %32 : vector<2x4x4x256xf32>
    %cst_20 = arith.constant 1.000000e+00 : f32
    %34 = vector.broadcast %cst_20 : f32 to vector<2x4x4x256xf32>
    %35 = arith.addf %34, %33 : vector<2x4x4x256xf32>
    %cst_21 = arith.constant 1.000000e+00 : f32
    %36 = vector.broadcast %cst_21 : f32 to vector<2x4x4x256xf32>
    %37 = arith.divf %36, %35 : vector<2x4x4x256xf32>
    %38 = arith.mulf %30, %37 : vector<2x4x4x256xf32>
    %c0_22 = arith.constant 0 : index
    %c0_23 = arith.constant 0 : index
    %c0_24 = arith.constant 0 : index
    %c0_25 = arith.constant 0 : index
    %39 = vector.load %arg3[%c0_22, %c0_23, %c0_24, %c0_25] : memref<2x4x4x256xf32, #tpu.memory_space<vmem>>, vector<2x4x4x256xf32>
    tpu.vector_store %arg3[%c0_22, %c0_23, %c0_24, %c0_25], %38 {strides = array<i32>} : memref<2x4x4x256xf32, #tpu.memory_space<vmem>>, vector<2x4x4x256xf32>,
    return
  }
}

module attributes {stable_mosaic.version = 11 : i64} {
  func.func @_matmul_bias_kernel(%arg0: memref<512x8xf32, #tpu.memory_space<vmem>>, %arg1: memref<8x16xf32, #tpu.memory_space<vmem>>, %arg2: memref<1x16xf32, #tpu.memory_space<vmem>>, %arg3: memref<512x16xf32, #tpu.memory_space<vmem>>) attributes {dimension_semantics = [], scalar_prefetch = 0 : i64, scratch_operands = 0 : i64, tpu.core_type = #tpu.core_type<tc>} {
    %c0 = arith.constant 0 : index
    %c0_0 = arith.constant 0 : index
    %0 = vector.load %arg0[%c0, %c0_0] : memref<512x8xf32, #tpu.memory_space<vmem>>, vector<512x8xf32>
    %c0_1 = arith.constant 0 : index
    %c0_2 = arith.constant 0 : index
    %1 = vector.load %arg1[%c0_1, %c0_2] : memref<8x16xf32, #tpu.memory_space<vmem>>, vector<8x16xf32>
    %cst = arith.constant dense<0.000000e+00> : vector<512x16xf32>
    %2 = tpu.matmul %0, %1, %cst {dimension_numbers = #tpu.dot_dimension_numbers<[1], [0], [0], [1], [0, 0, 1, 1], [], []>} : vector<512x8xf32>, vector<8x16xf32>, vector<512x16xf32> -> vector<512x16xf32>
    %c0_3 = arith.constant 0 : index
    %c0_4 = arith.constant 0 : index
    %3 = vector.load %arg2[%c0_3, %c0_4] : memref<1x16xf32, #tpu.memory_space<vmem>>, vector<1x16xf32>
    %4 = vector.broadcast %3 : vector<1x16xf32> to vector<512x16xf32>
    %5 = arith.addf %2, %4 : vector<512x16xf32>
    %c0_5 = arith.constant 0 : index
    %c0_6 = arith.constant 0 : index
    %6 = vector.load %arg3[%c0_5, %c0_6] : memref<512x16xf32, #tpu.memory_space<vmem>>, vector<512x16xf32>
    tpu.vector_store %arg3[%c0_5, %c0_6], %5 {strides = array<i32>} : memref<512x16xf32, #tpu.memory_space<vmem>>, vector<512x16xf32>,
    return
  }
}

module attributes {stable_mosaic.version = 11 : i64} {
  func.func @_matmul_bias_add_kernel(%arg0: memref<512x144xf32, #tpu.memory_space<vmem>>, %arg1: memref<144x16xf32, #tpu.memory_space<vmem>>, %arg2: memref<1x16xf32, #tpu.memory_space<vmem>>, %arg3: memref<512x16xf32, #tpu.memory_space<vmem>>, %arg4: memref<512x16xf32, #tpu.memory_space<vmem>>) attributes {dimension_semantics = [], scalar_prefetch = 0 : i64, scratch_operands = 0 : i64, tpu.core_type = #tpu.core_type<tc>} {
    %c0 = arith.constant 0 : index
    %c0_0 = arith.constant 0 : index
    %0 = vector.load %arg0[%c0, %c0_0] : memref<512x144xf32, #tpu.memory_space<vmem>>, vector<512x144xf32>
    %c0_1 = arith.constant 0 : index
    %c0_2 = arith.constant 0 : index
    %1 = vector.load %arg1[%c0_1, %c0_2] : memref<144x16xf32, #tpu.memory_space<vmem>>, vector<144x16xf32>
    %cst = arith.constant dense<0.000000e+00> : vector<512x16xf32>
    %2 = tpu.matmul %0, %1, %cst {dimension_numbers = #tpu.dot_dimension_numbers<[1], [0], [0], [1], [0, 0, 1, 1], [], []>} : vector<512x144xf32>, vector<144x16xf32>, vector<512x16xf32> -> vector<512x16xf32>
    %c0_3 = arith.constant 0 : index
    %c0_4 = arith.constant 0 : index
    %3 = vector.load %arg2[%c0_3, %c0_4] : memref<1x16xf32, #tpu.memory_space<vmem>>, vector<1x16xf32>
    %4 = vector.broadcast %3 : vector<1x16xf32> to vector<512x16xf32>
    %5 = arith.addf %2, %4 : vector<512x16xf32>
    %c0_5 = arith.constant 0 : index
    %c0_6 = arith.constant 0 : index
    %6 = vector.load %arg3[%c0_5, %c0_6] : memref<512x16xf32, #tpu.memory_space<vmem>>, vector<512x16xf32>
    %7 = arith.addf %5, %6 : vector<512x16xf32>
    %c0_7 = arith.constant 0 : index
    %c0_8 = arith.constant 0 : index
    %8 = vector.load %arg4[%c0_7, %c0_8] : memref<512x16xf32, #tpu.memory_space<vmem>>, vector<512x16xf32>
    tpu.vector_store %arg4[%c0_7, %c0_8], %7 {strides = array<i32>} : memref<512x16xf32, #tpu.memory_space<vmem>>, vector<512x16xf32>,
    return
  }
}

</mosaic_0001>

<bundles_post_ra>
// kernel: _lambda_.6
= control target key start
LH: loop header
LB: loop body
LE: loop exit
PB: predicated region body
PF: predicated region fallthrough
CT: control target
= control target key end

     0   :  { %vm30_vm0 = vcmask 1043456   ;;  %v305_v20 = vmov 0   ;;  %s413_s0 = inlined_call_operand.vmem [shape: f32[2,2,4,256], index: 0, kind: input, shape index: {}]   ;;  %s414_s1 = inlined_call_operand.vmem [shape: f32[1,2,4,1], index: 1, kind: input, shape index: {}]   ;;  %s415_s2 = inlined_call_operand.vmem [shape: f32[1,2,4,1], index: 2, kind: input, shape index: {}]   ;;  %s416_s3 = inlined_call_operand.vmem [shape: f32[2,2,4,256], index: 3, kind: output, shape index: {}]  }
   0x1   :  { %v14_v0 = vld [vmem:[%s413_s0] sm:$0xff]  ;;  %v16_v1 = vld [vmem:[%s413_s0 + $0x10] sm:$0xff]  ;;  %v15_v2 = vld [vmem:[%s413_s0 + $0x8] sm:$0xff]  ;;  %276 = vset.pattern.permute.xlu1 %v305_v20  ;;  %275 = vset.pattern.permute.xlu0 %v305_v20 }
   0x2   :  { %v22_v3 = vcombine.high %v14_v0, %v14_v0  ;;  %v31_v4 = vsel %vm30_vm0, %v14_v0, 0.0  ;;  %v24_v5 = vcombine.high %v16_v1, %v16_v1  ;;  %v41_v6 = vsel %vm30_vm0, %v16_v1, 0.0  ;;  %v341_v7 = vld [vmem:[%s413_s0 + $0x18] sm:$0xff] }
   0x3   :  { %v23_v8 = vcombine.high %v15_v2, %v15_v2  ;;  %v25_v9 = vcombine.high %v341_v7, %v341_v7  ;;  %v36_v12 = vsel %vm30_vm0, %v15_v2, 0.0  ;;  %v46_v13 = vsel %vm30_vm0, %v341_v7, 0.0 }
   0x4   :  { %v32_v10 = vsel %vm30_vm0, %v22_v3, 0.0  ;;  %v42_v11 = vsel %vm30_vm0, %v24_v5, 0.0 }
   0x5   :  { %v33_v14 = vadd.f32 %v32_v10, %v31_v4  ;;  %v43_v15 = vadd.f32 %v42_v11, %v41_v6  ;;  %v37_v16 = vsel %vm30_vm0, %v23_v8, 0.0  ;;  %v47_v17 = vsel %vm30_vm0, %v25_v9, 0.0  ;;  %v178_v11 = vld [vmem:[%s414_s1 + $0x4] sm:$0xf] }
   0x6   :  { %v38_v18 = vadd.f32 %v37_v16, %v36_v12  ;;  %v48_v19 = vadd.f32 %v47_v17, %v46_v13  ;;  %v177_v13 = vld [vmem:[%s414_s1] sm:$0xf] }
   0x7   :  { %34 = vadd.xlane.f32.xlu0 %v33_v14  ;;  %44 = vadd.xlane.f32.xlu1 %v43_v15 }
   0xb   :  { %39 = vadd.xlane.f32.xlu0 %v38_v18  ;;  %49 = vadd.xlane.f32.xlu1 %v48_v19 }
  0x94   :  { %v35_v21 = vpop.xlane.xlu0 %34  ;;  %v45_v22 = vpop.xlane.xlu1 %44 }
  0x95   :  { %v52_v23 = vmul.f32 0.00390625, %v35_v21  ;;  %v54_v24 = vmul.f32 0.00390625, %v45_v22 }
  0x97   :  { %v56_v25 = vsel %vm30_vm0, %v52_v23, 0.0  ;;  %v70_v26 = vsel %vm30_vm0, %v54_v24, 0.0  ;;  %v207_v24 = vld [vmem:[%s415_s2] sm:$0xf] }
  0x98   :  { %v57_v27 = vrot.slane %v56_v25, 4  ;;  %v71_v28 = vrot.slane %v70_v26, 4  ;;  %v40_v29 = vpop.xlane.xlu0 %39  ;;  %v50_v5 = vpop.xlane.xlu1 %49 }
  0x99   :  { %v53_v30 = vmul.f32 0.00390625, %v40_v29  ;;  %v55_v6 = vmul.f32 0.00390625, %v50_v5 }
  0x9a   :  { %v58_v31 = vadd.f32 %v57_v27, %v56_v25  ;;  %v72_v32 = vadd.f32 %v71_v28, %v70_v26 }
  0x9b   :  { %v63_v33 = vsel %vm30_vm0, %v53_v30, 0.0  ;;  %v77_v8 = vsel %vm30_vm0, %v55_v6, 0.0 }
  0x9c   :  { %v59_v34 = vrot.slane %v58_v31, 2  ;;  %v73_v35 = vrot.slane %v72_v32, 2  ;;  %v64_v36 = vrot.slane %v63_v33, 4  ;;  %v78_v9 = vrot.slane %v77_v8, 4 }
  0x9e   :  { %v60_v37 = vadd.f32 %v59_v34, %v58_v31  ;;  %v74_v38 = vadd.f32 %v73_v35, %v72_v32  ;;  %v65_v39 = vadd.f32 %v64_v36, %v63_v33  ;;  %v79_v10 = vadd.f32 %v78_v9, %v77_v8 }
  0xa0   :  { %v61_v40 = vrot.slane %v60_v37, 1  ;;  %v75_v41 = vrot.slane %v74_v38, 1  ;;  %v66_v42 = vrot.slane %v65_v39, 2  ;;  %v80_v12 = vrot.slane %v79_v10, 2 }
  0xa2   :  { %v62_v43 = vadd.f32 %v61_v40, %v60_v37  ;;  %v76_v44 = vadd.f32 %v75_v41, %v74_v38  ;;  %v67_v45 = vadd.f32 %v66_v42, %v65_v39  ;;  %v81_v14 = vadd.f32 %v80_v12, %v79_v10 }
  0xa4   :  { %v85_v46 = vmul.f32 0.25, %v62_v43  ;;  %v87_v47 = vmul.f32 0.25, %v76_v44  ;;  %v68_v48 = vrot.slane %v67_v45, 1  ;;  %v82_v15 = vrot.slane %v81_v14, 1 }
  0xa6   :  { %v69_v49 = vadd.f32 %v68_v48, %v67_v45  ;;  %v355_v50 = vsub.f32 %v14_v0, %v85_v46  ;;  %v357_v51 = vsub.f32 %v16_v1, %v87_v47  ;;  %v83_v16 = vadd.f32 %v82_v15, %v81_v14 }
  0xa8   :  { %v86_v52 = vmul.f32 0.25, %v69_v49  ;;  %v93_v53 = vmul.f32 %v355_v50, %v355_v50  ;;  %v95_v54 = vmul.f32 %v357_v51, %v357_v51  ;;  %v88_v17 = vmul.f32 0.25, %v83_v16 }
  0xaa   :  { %v101_v55 = vcombine.high %v93_v53, %v93_v53  ;;  %v103_v56 = vcombine.high %v95_v54, %v95_v54  ;;  %v363_v57 = vsub.f32 %v15_v2, %v86_v52  ;;  %v109_v58 = vsel %vm30_vm0, %v93_v53, 0.0 }
  0xab   :  { %v119_v60 = vsel %vm30_vm0, %v95_v54, 0.0  ;;  %v381_v18 = vsub.f32 %v341_v7, %v88_v17  ;;  %v208_v7 = vld [vmem:[%s415_s2 + $0x4] sm:$0xf] }
  0xac   :  { %v110_v59 = vsel %vm30_vm0, %v101_v55, 0.0  ;;  %v120_v61 = vsel %vm30_vm0, %v103_v56, 0.0  ;;  %v94_v63 = vmul.f32 %v363_v57, %v363_v57 }
  0xad   :  { %v111_v62 = vadd.f32 %v110_v59, %v109_v58  ;;  %v121_v0 = vadd.f32 %v120_v61, %v119_v60  ;;  %v96_v19 = vmul.f32 %v381_v18, %v381_v18  ;;  %v306_v61 = vmov 839922192  }
  0xae   :  { %v102_v1 = vcombine.high %v94_v63, %v94_v63  ;;  %v114_v3 = vsel %vm30_vm0, %v94_v63, 0.0  ;;  %v190_v63 = vlaneseq }
  0xaf   :  { %112 = vadd.xlane.f32.xlu0 %v111_v62  ;;  %v104_v20 = vcombine.high %v96_v19, %v96_v19  ;;  %v124_v21 = vsel %vm30_vm0, %v96_v19, 0.0  ;;  %v188_v62 = vunpack.c.l.s4 %v306_v61 }
  0xb0   :  { %v115_v2 = vsel %vm30_vm0, %v102_v1, 0.0  ;;  %v191_v1 = vshrl.u32 %v190_v63, 7 }
  0xb1   :  { %v116_v4 = vadd.f32 %v115_v2, %v114_v3  ;;  %v125_v22 = vsel %vm30_vm0, %v104_v20, 0.0 }
  0xb2   :  { %v126_v23 = vadd.f32 %v125_v22, %v124_v21 }
  0xb3   :  { %122 = vadd.xlane.f32.xlu0 %v121_v0  ;;  %117 = vadd.xlane.f32.xlu1 %v116_v4  ;;  %v189_v0 = vunpack.c.0.s8 %v188_v62 }
  0xb5   :  { %v192_v6 = vsub.s32 %v189_v0, %v191_v1 }
  0xc4   :  { %185 = vperm.xlu1 %276, %v178_v11  }
  0xc9   :  { %181 = vperm.xlu0 %275, %v177_v13  }
  0xe8   :  { %127 = vadd.xlane.f32.xlu1 %v126_v23 }
  0xf9   :  { %211 = vperm.xlu1 %276, %v207_v24  }
  0xfd   :  { %215 = vperm.xlu1 %276, %v208_v7  }
 0x13c   :  { %v113_v25 = vpop.xlane.xlu0 %112 }
 0x13d   :  { %v129_v27 = vmul.f32 0.00390625, %v113_v25 }
 0x13f   :  { %v133_v30 = vsel %vm30_vm0, %v129_v27, 0.0 }
 0x140   :  { %v123_v26 = vpop.xlane.xlu0 %122  ;;  %v118_v29 = vpop.xlane.xlu1 %117  ;;  %v134_v33 = vrot.slane %v133_v30, 4 }
 0x141   :  { %v131_v28 = vmul.f32 0.00390625, %v123_v26  ;;  %v130_v31 = vmul.f32 0.00390625, %v118_v29 }
 0x142   :  { %v135_v36 = vadd.f32 %v134_v33, %v133_v30 }
 0x143   :  { %v147_v32 = vsel %vm30_vm0, %v131_v28, 0.0  ;;  %v140_v35 = vsel %vm30_vm0, %v130_v31, 0.0 }
 0x144   :  { %v148_v34 = vrot.slane %v147_v32, 4  ;;  %v141_v37 = vrot.slane %v140_v35, 4  ;;  %v136_v39 = vrot.slane %v135_v36, 2  ;;  %v186_v3 = vpop.permute.xlu1 %185 }
 0x145   :  { %v200_v23 = vrot.slane %v186_v3, %v192_v6 }
 0x146   :  { %v149_v38 = vadd.f32 %v148_v34, %v147_v32  ;;  %v142_v40 = vadd.f32 %v141_v37, %v140_v35  ;;  %v137_v42 = vadd.f32 %v136_v39, %v135_v36 }
 0x148   :  { %v150_v41 = vrot.slane %v149_v38, 2  ;;  %v143_v43 = vrot.slane %v142_v40, 2  ;;  %v138_v45 = vrot.slane %v137_v42, 1  ;;  %v182_v5 = vpop.permute.xlu0 %181 }
 0x149   :  { %v193_v11 = vrot.slane %v182_v5, %v192_v6 }
 0x14a   :  { %v151_v44 = vadd.f32 %v150_v41, %v149_v38  ;;  %v144_v46 = vadd.f32 %v143_v43, %v142_v40  ;;  %v139_v48 = vadd.f32 %v138_v45, %v137_v42 }
 0x14c   :  { %v152_v47 = vrot.slane %v151_v44, 1  ;;  %v145_v49 = vrot.slane %v144_v46, 1  ;;  %v161_v53 = vmul.f32 0.25, %v139_v48 }
 0x14e   :  { %v153_v52 = vadd.f32 %v152_v47, %v151_v44  ;;  %v146_v54 = vadd.f32 %v145_v49, %v144_v46  ;;  %v165_v56 = vadd.f32 1e-05, %v161_v53 }
 0x150   :  { %v163_v55 = vmul.f32 0.25, %v153_v52  ;;  %v162_v58 = vmul.f32 0.25, %v146_v54  ;;  %281 = vrsqrt.f32 %v165_v56 }
 0x152   :  { %v167_v59 = vadd.f32 1e-05, %v163_v55  ;;  %v166_v60 = vadd.f32 1e-05, %v162_v58 }
 0x154   :  { %283 = vrsqrt.f32 %v167_v59 }
 0x155   :  { %285 = vrsqrt.f32 %v166_v60 }
 0x15a   :  { %v282_v2 = vpop.eup %281 }
 0x15b   :  { %v173_v9 = vmul.f32 %v282_v2, %v355_v50 }
 0x15d   :  { %v203_v19 = vmul.f32 %v193_v11, %v173_v9 }
 0x15e   :  { %v284_v4 = vpop.eup %283 }
 0x15f   :  { %v175_v10 = vmul.f32 %v284_v4, %v357_v51  ;;  %v286_v13 = vpop.eup %285 }
 0x160   :  { %v174_v17 = vmul.f32 %v286_v13, %v363_v57 }
 0x161   :  { %v205_v20 = vmul.f32 %v193_v11, %v175_v10 }
 0x162   :  { %v204_v26 = vmul.f32 %v200_v23, %v174_v17 }
 0x175   :  { %v128_v8 = vpop.xlane.xlu1 %127 }
 0x176   :  { %v132_v12 = vmul.f32 0.00390625, %v128_v8 }
 0x178   :  { %v154_v14 = vsel %vm30_vm0, %v132_v12, 0.0 }
 0x179   :  { %v155_v15 = vrot.slane %v154_v14, 4  ;;  %v212_v16 = vpop.permute.xlu1 %211 }
 0x17a   :  { %v223_v21 = vrot.slane %v212_v16, %v192_v6 }
 0x17b   :  { %v156_v22 = vadd.f32 %v155_v15, %v154_v14 }
 0x17c   :  { %v233_v24 = vadd.f32 %v223_v21, %v203_v19  ;;  %v235_v7 = vadd.f32 %v223_v21, %v205_v20 }
 0x17d   :  { %v157_v25 = vrot.slane %v156_v22, 2  ;;  %v216_v50 = vpop.permute.xlu1 %215 }
 0x17e   :  { %v237_v51 = vsub.f32 0.0, %v233_v24  ;;  %v239_v27 = vsub.f32 0.0, %v235_v7  ;;  %v230_v28 = vrot.slane %v216_v50, %v192_v6 }
 0x17f   :  { %v158_v29 = vadd.f32 %v157_v25, %v156_v22 }
 0x180   :  { %v241_v30 = vmul.f32 1.442695, %v237_v51  ;;  %v245_v31 = vmul.f32 1.442695, %v239_v27  ;;  %v234_v32 = vadd.f32 %v230_v28, %v204_v26 }
 0x181   :  { %v159_v33 = vrot.slane %v158_v29, 1 }
 0x182   :  { %287 = vpow2.f32 %v241_v30  ;;  %v238_v57 = vsub.f32 0.0, %v234_v32 }
 0x183   :  { %v160_v34 = vadd.f32 %v159_v33, %v158_v29  ;;  %289 = vpow2.f32 %v245_v31 }
 0x184   :  { %v243_v35 = vmul.f32 1.442695, %v238_v57 }
 0x185   :  { %v164_v36 = vmul.f32 0.25, %v160_v34 }
 0x186   :  { %291 = vpow2.f32 %v243_v35 }
 0x187   :  { %v168_v37 = vadd.f32 1e-05, %v164_v36 }
 0x189   :  { %293 = vrsqrt.f32 %v168_v37 }
 0x18c   :  { %v288_v38 = vpop.eup %287 }
 0x18d   :  { %v290_v39 = vpop.eup %289  ;;  %v249_v40 = vadd.f32 1.0, %v288_v38 }
 0x18e   :  { %v251_v41 = vadd.f32 1.0, %v290_v39 }
 0x18f   :  { %295 = vrcp.f32 %v249_v40 }
 0x190   :  { %v292_v42 = vpop.eup %291  ;;  %297 = vrcp.f32 %v251_v41 }
 0x191   :  { %v250_v43 = vadd.f32 1.0, %v292_v42 }
 0x193   :  { %v294_v44 = vpop.eup %293  ;;  %299 = vrcp.f32 %v250_v43 }
 0x194   :  { %v176_v45 = vmul.f32 %v294_v44, %v381_v18 }
 0x196   :  { %v206_v46 = vmul.f32 %v200_v23, %v176_v45 }
 0x198   :  { %v236_v47 = vadd.f32 %v230_v28, %v206_v46 }
 0x199   :  { %v296_v48 = vpop.eup %295 }
 0x19a   :  { %v298_v49 = vpop.eup %297  ;;  %v261_v52 = vmul.f32 %v296_v48, %v233_v24  ;;  %v240_v53 = vsub.f32 0.0, %v236_v47 }
 0x19b   :  { %v263_v54 = vmul.f32 %v298_v49, %v235_v7 }
 0x19c   :  { %265 = vst [vmem:[%s416_s3] sm:$0xff] %v261_v52  ;;  %v247_v55 = vmul.f32 1.442695, %v240_v53 }
 0x19d   :  { %v300_v56 = vpop.eup %299  ;;  %267 = vst [vmem:[%s416_s3 + $0x10] sm:$0xff] %v263_v54 }
 0x19e   :  { %301 = vpow2.f32 %v247_v55  ;;  %v262_v58 = vmul.f32 %v300_v56, %v234_v32 }
 0x1a0   :  { %266 = vst [vmem:[%s416_s3 + $0x8] sm:$0xff] %v262_v58 }
 0x1a8   :  { %v302_v18 = vpop.eup %301 }
 0x1a9   :  { %v252_v59 = vadd.f32 1.0, %v302_v18 }
 0x1ab   :  { %303 = vrcp.f32 %v252_v59 }
 0x1b5   :  { %v304_v60 = vpop.eup %303 }
 0x1b6   :  { %v264_v61 = vmul.f32 %v304_v60, %v236_v47 }
 0x1b8   :  { %268 = vst [vmem:[%s416_s3 + $0x18] sm:$0xff] %v264_v61 }

// kernel: _lambda_.7
= control target key start
LH: loop header
LB: loop body
LE: loop exit
PB: predicated region body
PF: predicated region fallthrough
CT: control target
= control target key end

     0   :  { %v144_v0 = vmov 0.0|0.0   ;;  %vm145_vm0 = vmmov 0   ;;  %v146_v4 = vmov 0.0   ;;  %vm33_vm1 = vcmask 261120   ;;  %s188_s1 = inlined_call_operand.vmem [shape: f32[32,16], index: 1, kind: input, shape index: {}]   ;;  %s189_s0 = inlined_call_operand.vmem [shape: f32[2,32], index: 0, kind: input, shape index: {}]   ;;  %s190_s2 = inlined_call_operand.vmem [shape: f32[1,16], index: 2, kind: input, shape index: {}]   ;;  %s191_s3 = inlined_call_operand.vmem [shape: f32[2,16], index: 3, kind: output, shape index: {}]  }
   0x1   :  { %131 = vmatprep.subr.bf16.mxu0 %v144_v0  ;;  %v22_v1 = vld [vmem:[%s188_s1] sm:$0xff]  ;;  %v23_v2 = vld [vmem:[%s188_s1 + $0x8] sm:$0xff]  ;;  %v24_v3 = vld [vmem:[%s188_s1 + $0x10] sm:$0xff]  ;;  %128 = vmatprep.mubr.msk.f32.mxu0 %vm145_vm0, %v146_v4  ;;  %vm107_vm2 = vcmask 123904  }
   0x2   :  { %v132_v5 = vpack.c.bf16 %v23_v2, %v22_v1  ;;  %v25_v6 = vld [vmem:[%s188_s1 + $0x18] sm:$0xff]  ;;  %v14_v7 = vld [vmem:[%s189_s0] sm:$0x3] }
   0x3   :  { %v15_v8 = vsub.f32 0.0, %v14_v7  ;;  %v135_v9 = vpack.c.bf16 %v25_v6, %v24_v3  ;;  %v113_v15 = vld [vmem:[%s190_s2] ss:$0 sm:$0xff] }
   0x4   :  { %133 = vmatpush3.bf16.msra.mxu0 %v132_v5 }
   0x5   :  { %134 = vmatprep.subr.bf16.mxu0 %v144_v0  ;;  %v16_v10 = vmul.f32 1.442695, %v15_v8 }
   0x7   :  { %140 = vpow2.f32 %v16_v10 }
   0x8   :  { %136 = vmatpush3.bf16.msra.mxu0 %v135_v9 }
  0x11   :  { %v141_v11 = vpop.eup %140 }
  0x12   :  { %v18_v12 = vadd.f32 1.0, %v141_v11 }
  0x14   :  { %142 = vrcp.f32 %v18_v12 }
  0x1e   :  { %v143_v13 = vpop.eup %142 }
  0x1f   :  { %v21_v14 = vmul.f32 %v143_v13, %v14_v7 }
  0x21   :  { %129 = vmatmul.mubr.msk.f32.vlgmr.msra.gmra.mrb[0].mxu0 %vm33_vm1, %v21_v14 }
  0xf4   :  { %v103_v16 = vpop.f32.mrb[0].mxu0 }
  0xf5   :  { %v104_v17 = vadd.f32 %v113_v15, %v103_v16  ;;  %v130_v18 = vpop.f32.mrb[1].mxu0 }
  0xf7   :  { %108 = vst.msk [vmem:[%s191_s3] sm:$0x3] %vm107_vm2, %v104_v17 }

// kernel: _lambda_.8
= control target key start
LH: loop header
LB: loop body
LE: loop exit
PB: predicated region body
PF: predicated region fallthrough
CT: control target
= control target key end

     0   :  { %vm97_vm0 = vcmask 588800   ;;  %vm803_vm1 = vcmask 130048   ;;  %s1975_s1 = inlined_call_operand.vmem [shape: f32[72,16], index: 1, kind: input, shape index: {}]   ;;  %s1976_s0 = inlined_call_operand.vmem [shape: f32[512,72], index: 0, kind: input, shape index: {}]   ;;  %s1977_s2 = inlined_call_operand.vmem [shape: f32[1,16], index: 2, kind: input, shape index: {}]   ;;  %s1978_s3 = inlined_call_operand.vmem [shape: f32[512,16], index: 3, kind: input, shape index: {}]   ;;  %s1979_s4 = inlined_call_operand.vmem [shape: f32[512,16], index: 4, kind: output, shape index: {}]  }
   0x1   :  { %v81_v0 = vld [vmem:[%s1975_s1] sm:$0xff]  ;;  %v82_v1 = vld [vmem:[%s1975_s1 + $0x8] sm:$0xff]  ;;  %v83_v2 = vld [vmem:[%s1975_s1 + $0x10] sm:$0xff] }
   0x2   :  { %v1124_v3 = vpack.c.bf16 %v82_v1, %v81_v0  ;;  %v84_v4 = vld [vmem:[%s1975_s1 + $0x18] sm:$0xff]  ;;  %v85_v6 = vld [vmem:[%s1975_s1 + $0x20] sm:$0xff]  ;;  %v86_v7 = vld [vmem:[%s1975_s1 + $0x28] sm:$0xff] }
   0x3   :  { %v1128_v5 = vpack.c.bf16 %v84_v4, %v83_v2  ;;  %v17_v8 = vld [vmem:[%s1976_s0] sm:$0xff]  ;;  %v1132_v10 = vpack.c.bf16 %v86_v7, %v85_v6  ;;  %v87_v11 = vld [vmem:[%s1975_s1 + $0x30] sm:$0xff]  ;;  %v88_v12 = vld [vmem:[%s1975_s1 + $0x38] sm:$0xff] }
   0x4   :  { %1125 = vmatprep.subr.bf16.mxu0 %v1124_v3  ;;  %1140 = vmatprep.subr.bf16.mxu1 %v1124_v3  ;;  %v49_v9 = vld [vmem:[%s1976_s0 + $0x100] sm:$0xff]  ;;  %v1136_v13 = vpack.c.bf16 %v88_v12, %v87_v11  ;;  %v18_v15 = vld [vmem:[%s1976_s0 + $0x8] sm:$0xff]  ;;  %v19_v17 = vld [vmem:[%s1976_s0 + $0x10] sm:$0xff] }
   0x5   :  { %1127 = vmatpush3.bf16.msra.mxu0 %v1124_v3  ;;  %1145 = vmatpush3.bf16.msra.mxu1 %v1124_v3  ;;  %v89_v14 = vld [vmem:[%s1975_s1 + $0x40] sm:$0xff]  ;;  %v50_v16 = vld [vmem:[%s1976_s0 + $0x108] sm:$0xff]  ;;  %v51_v18 = vld [vmem:[%s1976_s0 + $0x110] sm:$0xff] }
   0x6   :  { %1129 = vmatprep.subr.bf16.mxu0 %v1128_v5  ;;  %1141 = vmatprep.subr.bf16.mxu1 %v1128_v5  ;;  %v20_v19 = vld [vmem:[%s1976_s0 + $0x18] sm:$0xff]  ;;  %v21_v21 = vld [vmem:[%s1976_s0 + $0x20] sm:$0xff]  ;;  %v22_v23 = vld [vmem:[%s1976_s0 + $0x28] sm:$0xff] }
   0x7   :  { %1028 = vmatprep.mubr.msk.f32.mxu0 %vm97_vm0, %v17_v8  ;;  %1076 = vmatprep.mubr.msk.f32.mxu1 %vm97_vm0, %v49_v9  ;;  %v52_v20 = vld [vmem:[%s1976_s0 + $0x118] sm:$0xff]  ;;  %v53_v22 = vld [vmem:[%s1976_s0 + $0x120] sm:$0xff]  ;;  %v54_v24 = vld [vmem:[%s1976_s0 + $0x128] sm:$0xff] }
   0x8   :  { %v23_v25 = vld [vmem:[%s1976_s0 + $0x30] sm:$0xff]  ;;  %v24_v27 = vld [vmem:[%s1976_s0 + $0x38] sm:$0xff]  ;;  %v25_v29 = vld [vmem:[%s1976_s0 + $0x40] sm:$0xff] }
   0x9   :  { %1131 = vmatpush3.bf16.msra.mxu0 %v1128_v5  ;;  %1146 = vmatpush3.bf16.msra.mxu1 %v1128_v5  ;;  %v55_v26 = vld [vmem:[%s1976_s0 + $0x130] sm:$0xff]  ;;  %v56_v28 = vld [vmem:[%s1976_s0 + $0x138] sm:$0xff]  ;;  %v57_v30 = vld [vmem:[%s1976_s0 + $0x140] sm:$0xff] }
   0xa   :  { %1133 = vmatprep.subr.bf16.mxu0 %v1132_v10  ;;  %1142 = vmatprep.subr.bf16.mxu1 %v1132_v10  ;;  %v26_v31 = vld [vmem:[%s1976_s0 + $0x48] sm:$0xff]  ;;  %v27_v33 = vld [vmem:[%s1976_s0 + $0x50] sm:$0xff]  ;;  %v28_v35 = vld [vmem:[%s1976_s0 + $0x58] sm:$0xff] }
   0xb   :  { %v58_v32 = vld [vmem:[%s1976_s0 + $0x148] sm:$0xff]  ;;  %v59_v34 = vld [vmem:[%s1976_s0 + $0x150] sm:$0xff]  ;;  %v60_v36 = vld [vmem:[%s1976_s0 + $0x158] sm:$0xff] }
   0xc   :  { %v29_v37 = vld [vmem:[%s1976_s0 + $0x60] sm:$0xff]  ;;  %v30_v39 = vld [vmem:[%s1976_s0 + $0x68] sm:$0xff]  ;;  %v31_v41 = vld [vmem:[%s1976_s0 + $0x70] sm:$0xff] }
   0xd   :  { %1135 = vmatpush3.bf16.msra.mxu0 %v1132_v10  ;;  %1147 = vmatpush3.bf16.msra.mxu1 %v1132_v10  ;;  %v61_v38 = vld [vmem:[%s1976_s0 + $0x160] sm:$0xff]  ;;  %v62_v40 = vld [vmem:[%s1976_s0 + $0x168] sm:$0xff]  ;;  %v63_v42 = vld [vmem:[%s1976_s0 + $0x170] sm:$0xff] }
   0xe   :  { %1137 = vmatprep.subr.bf16.mxu0 %v1136_v13  ;;  %1143 = vmatprep.subr.bf16.mxu1 %v1136_v13  ;;  %v32_v43 = vld [vmem:[%s1976_s0 + $0x78] sm:$0xff]  ;;  %v33_v45 = vld [vmem:[%s1976_s0 + $0x80] sm:$0xff]  ;;  %v34_v47 = vld [vmem:[%s1976_s0 + $0x88] sm:$0xff] }
   0xf   :  { %v64_v44 = vld [vmem:[%s1976_s0 + $0x178] sm:$0xff]  ;;  %v65_v46 = vld [vmem:[%s1976_s0 + $0x180] sm:$0xff]  ;;  %v66_v48 = vld [vmem:[%s1976_s0 + $0x188] sm:$0xff] }
  0x10   :  { %v35_v49 = vld [vmem:[%s1976_s0 + $0x90] sm:$0xff]  ;;  %v36_v51 = vld [vmem:[%s1976_s0 + $0x98] sm:$0xff]  ;;  %v37_v53 = vld [vmem:[%s1976_s0 + $0xa0] sm:$0xff] }
  0x11   :  { %1139 = vmatpush3.bf16.msra.mxu0 %v1136_v13  ;;  %1148 = vmatpush3.bf16.msra.mxu1 %v1136_v13  ;;  %v67_v50 = vld [vmem:[%s1976_s0 + $0x190] sm:$0xff]  ;;  %v68_v52 = vld [vmem:[%s1976_s0 + $0x198] sm:$0xff]  ;;  %v69_v54 = vld [vmem:[%s1976_s0 + $0x1a0] sm:$0xff] }
  0x12   :  { %1026 = vmatprep.subr.mxu0 %v89_v14  ;;  %1144 = vmatprep.subr.mxu1 %v89_v14  ;;  %v38_v55 = vld [vmem:[%s1976_s0 + $0xa8] sm:$0xff]  ;;  %v39_v57 = vld [vmem:[%s1976_s0 + $0xb0] sm:$0xff]  ;;  %v40_v59 = vld [vmem:[%s1976_s0 + $0xb8] sm:$0xff] }
  0x13   :  { %v70_v56 = vld [vmem:[%s1976_s0 + $0x1a8] sm:$0xff]  ;;  %v71_v58 = vld [vmem:[%s1976_s0 + $0x1b0] sm:$0xff]  ;;  %v72_v60 = vld [vmem:[%s1976_s0 + $0x1b8] sm:$0xff] }
  0x14   :  { %v41_v61 = vld [vmem:[%s1976_s0 + $0xc0] sm:$0xff]  ;;  %v42_v63 = vld [vmem:[%s1976_s0 + $0xc8] sm:$0xff]  ;;  %v43_v1 = vld [vmem:[%s1976_s0 + $0xd0] sm:$0xff] }
  0x15   :  { %1027 = vmatpush3.msra.mxu0 %v89_v14  ;;  %1149 = vmatpush3.msra.mxu1 %v89_v14  ;;  %v73_v62 = vld [vmem:[%s1976_s0 + $0x1c0] sm:$0xff]  ;;  %v74_v0 = vld [vmem:[%s1976_s0 + $0x1c8] sm:$0xff]  ;;  %v75_v2 = vld [vmem:[%s1976_s0 + $0x1d0] sm:$0xff] }
  0x16   :  { %1029 = vmatmul.mubr.msk.f32.vlgmr.msra.gmra.mrb[0].mxu0 %vm97_vm0, %v18_v15  ;;  %1077 = vmatmul.mubr.msk.f32.vlgmr.msra.gmra.mrb[0].mxu1 %vm97_vm0, %v50_v16  ;;  %v44_v3 = vld [vmem:[%s1976_s0 + $0xd8] sm:$0xff]  ;;  %v45_v5 = vld [vmem:[%s1976_s0 + $0xe0] sm:$0xff]  ;;  %v46_v7 = vld [vmem:[%s1976_s0 + $0xe8] sm:$0xff] }
  0x17   :  { %1031 = vmatprep.mubr.msk.f32.mxu0 %vm97_vm0, %v19_v17  ;;  %1079 = vmatprep.mubr.msk.f32.mxu1 %vm97_vm0, %v51_v18  ;;  %v76_v4 = vld [vmem:[%s1976_s0 + $0x1d8] sm:$0xff]  ;;  %v77_v6 = vld [vmem:[%s1976_s0 + $0x1e0] sm:$0xff]  ;;  %v78_v8 = vld [vmem:[%s1976_s0 + $0x1e8] sm:$0xff] }
  0x18   :  { %v47_v9 = vld [vmem:[%s1976_s0 + $0xf0] sm:$0xff]  ;;  %v48_v11 = vld [vmem:[%s1976_s0 + $0xf8] sm:$0xff]  ;;  %v1461_v13 = vld [vmem:[%s1977_s2] ss:$0 sm:$0xff] }
  0x19   :  { %v79_v10 = vld [vmem:[%s1976_s0 + $0x1f0] sm:$0xff]  ;;  %v80_v12 = vld [vmem:[%s1976_s0 + $0x1f8] sm:$0xff]  ;;  %v676_v15 = vld [vmem:[%s1978_s3 + $0x8] sm:$0xff] }
  0x1a   :  { %1032 = vmatmul.mubr.msk.f32.gmra.mrb[2].mxu0 %vm97_vm0, %v20_v19  ;;  %1080 = vmatmul.mubr.msk.f32.gmra.mrb[2].mxu1 %vm97_vm0, %v52_v20  ;;  %v708_v17 = vld [vmem:[%s1978_s3 + $0x108] sm:$0xff] }
  0x1b   :  { %1034 = vmatprep.mubr.msk.f32.mxu0 %vm97_vm0, %v21_v21  ;;  %1082 = vmatprep.mubr.msk.f32.mxu1 %vm97_vm0, %v53_v22  ;;  %v675_v21 = vld [vmem:[%s1978_s3] sm:$0xff] }
  0x1e   :  { %1035 = vmatmul.mubr.msk.f32.gmra.mrb[4].mxu0 %vm97_vm0, %v22_v23  ;;  %1083 = vmatmul.mubr.msk.f32.gmra.mrb[4].mxu1 %vm97_vm0, %v54_v24  ;;  %v707_v23 = vld [vmem:[%s1978_s3 + $0x100] sm:$0xff] }
  0x1f   :  { %1037 = vmatprep.mubr.msk.f32.mxu0 %vm97_vm0, %v23_v25  ;;  %1085 = vmatprep.mubr.msk.f32.mxu1 %vm97_vm0, %v55_v26 }
  0x22   :  { %1038 = vmatmul.mubr.msk.f32.gmra.mrb[6].mxu0 %vm97_vm0, %v24_v27  ;;  %1086 = vmatmul.mubr.msk.f32.gmra.mrb[6].mxu1 %vm97_vm0, %v56_v28 }
  0x23   :  { %1040 = vmatprep.mubr.msk.f32.mxu0 %vm97_vm0, %v25_v29  ;;  %1088 = vmatprep.mubr.msk.f32.mxu1 %vm97_vm0, %v57_v30 }
  0x26   :  { %1041 = vmatmul.mubr.msk.f32.gmra.mrb[8].mxu0 %vm97_vm0, %v26_v31  ;;  %1089 = vmatmul.mubr.msk.f32.gmra.mrb[8].mxu1 %vm97_vm0, %v58_v32  ;;  %v678_v31 = vld [vmem:[%s1978_s3 + $0x18] sm:$0xff] }
  0x27   :  { %1043 = vmatprep.mubr.msk.f32.mxu0 %vm97_vm0, %v27_v33  ;;  %1091 = vmatprep.mubr.msk.f32.mxu1 %vm97_vm0, %v59_v34  ;;  %v710_v33 = vld [vmem:[%s1978_s3 + $0x118] sm:$0xff] }
  0x2a   :  { %1044 = vmatmul.mubr.msk.f32.gmra.mrb[10].mxu0 %vm97_vm0, %v28_v35  ;;  %1092 = vmatmul.mubr.msk.f32.gmra.mrb[10].mxu1 %vm97_vm0, %v60_v36 }
  0x2b   :  { %1046 = vmatprep.mubr.msk.f32.mxu0 %vm97_vm0, %v29_v37  ;;  %1094 = vmatprep.mubr.msk.f32.mxu1 %vm97_vm0, %v61_v38  ;;  %v677_v37 = vld [vmem:[%s1978_s3 + $0x10] sm:$0xff] }
  0x2e   :  { %1047 = vmatmul.mubr.msk.f32.gmra.mrb[12].mxu0 %vm97_vm0, %v30_v39  ;;  %1095 = vmatmul.mubr.msk.f32.gmra.mrb[12].mxu1 %vm97_vm0, %v62_v40  ;;  %v709_v39 = vld [vmem:[%s1978_s3 + $0x110] sm:$0xff] }
  0x2f   :  { %1049 = vmatprep.mubr.msk.f32.mxu0 %vm97_vm0, %v31_v41  ;;  %1097 = vmatprep.mubr.msk.f32.mxu1 %vm97_vm0, %v63_v42 }
  0x32   :  { %1050 = vmatmul.mubr.msk.f32.gmra.mrb[14].mxu0 %vm97_vm0, %v32_v43  ;;  %1098 = vmatmul.mubr.msk.f32.gmra.mrb[14].mxu1 %vm97_vm0, %v64_v44 }
  0x33   :  { %1052 = vmatprep.mubr.msk.f32.mxu0 %vm97_vm0, %v33_v45  ;;  %1100 = vmatprep.mubr.msk.f32.mxu1 %vm97_vm0, %v65_v46 }
  0x36   :  { %1053 = vmatmul.mubr.msk.f32.gmra.mrb[16].mxu0 %vm97_vm0, %v34_v47  ;;  %1101 = vmatmul.mubr.msk.f32.gmra.mrb[16].mxu1 %vm97_vm0, %v66_v48  ;;  %v680_v47 = vld [vmem:[%s1978_s3 + $0x28] sm:$0xff] }
  0x37   :  { %1055 = vmatprep.mubr.msk.f32.mxu0 %vm97_vm0, %v35_v49  ;;  %1103 = vmatprep.mubr.msk.f32.mxu1 %vm97_vm0, %v67_v50  ;;  %v712_v49 = vld [vmem:[%s1978_s3 + $0x128] sm:$0xff] }
  0x3a   :  { %1056 = vmatmul.mubr.msk.f32.gmra.mrb[18].mxu0 %vm97_vm0, %v36_v51  ;;  %1104 = vmatmul.mubr.msk.f32.gmra.mrb[18].mxu1 %vm97_vm0, %v68_v52 }
  0x3b   :  { %1058 = vmatprep.mubr.msk.f32.mxu0 %vm97_vm0, %v37_v53  ;;  %1106 = vmatprep.mubr.msk.f32.mxu1 %vm97_vm0, %v69_v54  ;;  %v679_v53 = vld [vmem:[%s1978_s3 + $0x20] sm:$0xff] }
  0x3e   :  { %1059 = vmatmul.mubr.msk.f32.gmra.mrb[20].mxu0 %vm97_vm0, %v38_v55  ;;  %1107 = vmatmul.mubr.msk.f32.gmra.mrb[20].mxu1 %vm97_vm0, %v70_v56  ;;  %v711_v55 = vld [vmem:[%s1978_s3 + $0x120] sm:$0xff] }
  0x3f   :  { %1061 = vmatprep.mubr.msk.f32.mxu0 %vm97_vm0, %v39_v57  ;;  %1109 = vmatprep.mubr.msk.f32.mxu1 %vm97_vm0, %v71_v58 }
  0x42   :  { %1062 = vmatmul.mubr.msk.f32.gmra.mrb[22].mxu0 %vm97_vm0, %v40_v59  ;;  %1110 = vmatmul.mubr.msk.f32.gmra.mrb[22].mxu1 %vm97_vm0, %v72_v60 }
  0x43   :  { %1064 = vmatprep.mubr.msk.f32.mxu0 %vm97_vm0, %v41_v61  ;;  %1112 = vmatprep.mubr.msk.f32.mxu1 %vm97_vm0, %v73_v62 }
  0x46   :  { %1065 = vmatmul.mubr.msk.f32.gmra.mrb[24].mxu0 %vm97_vm0, %v42_v63  ;;  %1113 = vmatmul.mubr.msk.f32.gmra.mrb[24].mxu1 %vm97_vm0, %v74_v0  ;;  %v682_v63 = vld [vmem:[%s1978_s3 + $0x38] sm:$0xff] }
  0x47   :  { %1067 = vmatprep.mubr.msk.f32.mxu0 %vm97_vm0, %v43_v1  ;;  %1115 = vmatprep.mubr.msk.f32.mxu1 %vm97_vm0, %v75_v2  ;;  %v714_v1 = vld [vmem:[%s1978_s3 + $0x138] sm:$0xff] }
  0x4a   :  { %1068 = vmatmul.mubr.msk.f32.gmra.mrb[26].mxu0 %vm97_vm0, %v44_v3  ;;  %1116 = vmatmul.mubr.msk.f32.gmra.mrb[26].mxu1 %vm97_vm0, %v76_v4 }
  0x4b   :  { %1070 = vmatprep.mubr.msk.f32.mxu0 %vm97_vm0, %v45_v5  ;;  %1118 = vmatprep.mubr.msk.f32.mxu1 %vm97_vm0, %v77_v6  ;;  %v681_v5 = vld [vmem:[%s1978_s3 + $0x30] sm:$0xff] }
  0x4e   :  { %1071 = vmatmul.mubr.msk.f32.gmra.mrb[28].mxu0 %vm97_vm0, %v46_v7  ;;  %1119 = vmatmul.mubr.msk.f32.gmra.mrb[28].mxu1 %vm97_vm0, %v78_v8  ;;  %v713_v7 = vld [vmem:[%s1978_s3 + $0x130] sm:$0xff] }
  0x4f   :  { %1073 = vmatprep.mubr.msk.f32.mxu0 %vm97_vm0, %v47_v9  ;;  %1121 = vmatprep.mubr.msk.f32.mxu1 %vm97_vm0, %v79_v10 }
  0x52   :  { %1074 = vmatmul.mubr.msk.f32.gmra.mrb[30].mxu0 %vm97_vm0, %v48_v11  ;;  %1122 = vmatmul.mubr.msk.f32.gmra.mrb[30].mxu1 %vm97_vm0, %v80_v12 }
  0xe9   :  { %v1030_v14 = vpop.f32.mrb[0].mxu0  ;;  %v1078_v16 = vpop.f32.mrb[0].mxu1 }
  0xea   :  { %v362_v18 = vadd.f32 %v1030_v14, %v1461_v13  ;;  %v522_v19 = vadd.f32 %v1078_v16, %v1461_v13  ;;  %v356_v20 = vpop.f32.mrb[1].mxu0  ;;  %v516_v22 = vpop.f32.mrb[1].mxu1  ;;  %v684_v16 = vld [vmem:[%s1978_s3 + $0x48] sm:$0xff] }
  0xeb   :  { %v357_v24 = vadd.f32 %v1461_v13, %v356_v20  ;;  %v517_v25 = vadd.f32 %v1461_v13, %v516_v22  ;;  %v683_v22 = vld [vmem:[%s1978_s3 + $0x40] sm:$0xff] }
  0xec   :  { %v740_v26 = vadd.f32 %v676_v15, %v362_v18  ;;  %v772_v27 = vadd.f32 %v708_v17, %v522_v19  ;;  %v716_v18 = vld [vmem:[%s1978_s3 + $0x148] sm:$0xff] }
  0xed   :  { %v739_v28 = vadd.f32 %v675_v21, %v357_v24  ;;  %v771_v29 = vadd.f32 %v707_v23, %v517_v25  ;;  %v1033_v30 = vpop.f32.mrb[2].mxu0  ;;  %v1081_v32 = vpop.f32.mrb[2].mxu1  ;;  %v715_v24 = vld [vmem:[%s1978_s3 + $0x140] sm:$0xff] }
  0xee   :  { %805 = vst.msk [vmem:[%s1979_s4 + $0x8] sm:$0xff] %vm803_vm1, %v740_v26  ;;  %837 = vst.msk [vmem:[%s1979_s4 + $0x108] sm:$0xff] %vm803_vm1, %v772_v27  ;;  %v372_v34 = vadd.f32 %v1033_v30, %v1461_v13  ;;  %v532_v35 = vadd.f32 %v1081_v32, %v1461_v13  ;;  %v366_v36 = vpop.f32.mrb[3].mxu0  ;;  %v526_v38 = vpop.f32.mrb[3].mxu1  ;;  %v686_v32 = vld [vmem:[%s1978_s3 + $0x58] sm:$0xff] }
  0xef   :  { %804 = vst.msk [vmem:[%s1979_s4] sm:$0xff] %vm803_vm1, %v739_v28  ;;  %836 = vst.msk [vmem:[%s1979_s4 + $0x100] sm:$0xff] %vm803_vm1, %v771_v29  ;;  %v367_v40 = vadd.f32 %v1461_v13, %v366_v36  ;;  %v527_v41 = vadd.f32 %v1461_v13, %v526_v38  ;;  %v685_v38 = vld [vmem:[%s1978_s3 + $0x50] sm:$0xff] }
  0xf0   :  { %v742_v42 = vadd.f32 %v678_v31, %v372_v34  ;;  %v774_v43 = vadd.f32 %v710_v33, %v532_v35  ;;  %v718_v34 = vld [vmem:[%s1978_s3 + $0x158] sm:$0xff] }
  0xf1   :  { %v741_v44 = vadd.f32 %v677_v37, %v367_v40  ;;  %v773_v45 = vadd.f32 %v709_v39, %v527_v41  ;;  %v1036_v46 = vpop.f32.mrb[4].mxu0  ;;  %v1084_v48 = vpop.f32.mrb[4].mxu1  ;;  %v717_v40 = vld [vmem:[%s1978_s3 + $0x150] sm:$0xff] }
  0xf2   :  { %807 = vst.msk [vmem:[%s1979_s4 + $0x18] sm:$0xff] %vm803_vm1, %v742_v42  ;;  %839 = vst.msk [vmem:[%s1979_s4 + $0x118] sm:$0xff] %vm803_vm1, %v774_v43  ;;  %v382_v50 = vadd.f32 %v1036_v46, %v1461_v13  ;;  %v542_v51 = vadd.f32 %v1084_v48, %v1461_v13  ;;  %v376_v52 = vpop.f32.mrb[5].mxu0  ;;  %v536_v54 = vpop.f32.mrb[5].mxu1  ;;  %v688_v48 = vld [vmem:[%s1978_s3 + $0x68] sm:$0xff] }
  0xf3   :  { %806 = vst.msk [vmem:[%s1979_s4 + $0x10] sm:$0xff] %vm803_vm1, %v741_v44  ;;  %838 = vst.msk [vmem:[%s1979_s4 + $0x110] sm:$0xff] %vm803_vm1, %v773_v45  ;;  %v377_v56 = vadd.f32 %v1461_v13, %v376_v52  ;;  %v537_v57 = vadd.f32 %v1461_v13, %v536_v54  ;;  %v687_v54 = vld [vmem:[%s1978_s3 + $0x60] sm:$0xff] }
  0xf4   :  { %v744_v58 = vadd.f32 %v680_v47, %v382_v50  ;;  %v776_v59 = vadd.f32 %v712_v49, %v542_v51  ;;  %v720_v50 = vld [vmem:[%s1978_s3 + $0x168] sm:$0xff] }
  0xf5   :  { %v743_v60 = vadd.f32 %v679_v53, %v377_v56  ;;  %v775_v61 = vadd.f32 %v711_v55, %v537_v57  ;;  %v1039_v62 = vpop.f32.mrb[6].mxu0  ;;  %v1087_v0 = vpop.f32.mrb[6].mxu1  ;;  %v719_v56 = vld [vmem:[%s1978_s3 + $0x160] sm:$0xff] }
  0xf6   :  { %809 = vst.msk [vmem:[%s1979_s4 + $0x28] sm:$0xff] %vm803_vm1, %v744_v58  ;;  %841 = vst.msk [vmem:[%s1979_s4 + $0x128] sm:$0xff] %vm803_vm1, %v776_v59  ;;  %v392_v2 = vadd.f32 %v1039_v62, %v1461_v13  ;;  %v552_v3 = vadd.f32 %v1087_v0, %v1461_v13  ;;  %v386_v4 = vpop.f32.mrb[7].mxu0  ;;  %v546_v6 = vpop.f32.mrb[7].mxu1  ;;  %v690_v0 = vld [vmem:[%s1978_s3 + $0x78] sm:$0xff] }
  0xf7   :  { %808 = vst.msk [vmem:[%s1979_s4 + $0x20] sm:$0xff] %vm803_vm1, %v743_v60  ;;  %840 = vst.msk [vmem:[%s1979_s4 + $0x120] sm:$0xff] %vm803_vm1, %v775_v61  ;;  %v387_v8 = vadd.f32 %v1461_v13, %v386_v4  ;;  %v547_v9 = vadd.f32 %v1461_v13, %v546_v6  ;;  %v689_v6 = vld [vmem:[%s1978_s3 + $0x70] sm:$0xff] }
  0xf8   :  { %v746_v10 = vadd.f32 %v682_v63, %v392_v2  ;;  %v778_v11 = vadd.f32 %v714_v1, %v552_v3  ;;  %v722_v2 = vld [vmem:[%s1978_s3 + $0x178] sm:$0xff] }
  0xf9   :  { %v745_v12 = vadd.f32 %v681_v5, %v387_v8  ;;  %v777_v14 = vadd.f32 %v713_v7, %v547_v9  ;;  %v1042_v15 = vpop.f32.mrb[8].mxu0  ;;  %v1090_v17 = vpop.f32.mrb[8].mxu1  ;;  %v721_v8 = vld [vmem:[%s1978_s3 + $0x170] sm:$0xff] }
  0xfa   :  { %811 = vst.msk [vmem:[%s1979_s4 + $0x38] sm:$0xff] %vm803_vm1, %v746_v10  ;;  %843 = vst.msk [vmem:[%s1979_s4 + $0x138] sm:$0xff] %vm803_vm1, %v778_v11  ;;  %v402_v19 = vadd.f32 %v1042_v15, %v1461_v13  ;;  %v562_v20 = vadd.f32 %v1090_v17, %v1461_v13  ;;  %v396_v21 = vpop.f32.mrb[9].mxu0  ;;  %v556_v23 = vpop.f32.mrb[9].mxu1  ;;  %v692_v17 = vld [vmem:[%s1978_s3 + $0x88] sm:$0xff] }
  0xfb   :  { %810 = vst.msk [vmem:[%s1979_s4 + $0x30] sm:$0xff] %vm803_vm1, %v745_v12  ;;  %842 = vst.msk [vmem:[%s1979_s4 + $0x130] sm:$0xff] %vm803_vm1, %v777_v14  ;;  %v397_v25 = vadd.f32 %v1461_v13, %v396_v21  ;;  %v557_v26 = vadd.f32 %v1461_v13, %v556_v23  ;;  %v691_v23 = vld [vmem:[%s1978_s3 + $0x80] sm:$0xff] }
  0xfc   :  { %v748_v27 = vadd.f32 %v684_v16, %v402_v19  ;;  %v780_v28 = vadd.f32 %v716_v18, %v562_v20  ;;  %v724_v19 = vld [vmem:[%s1978_s3 + $0x188] sm:$0xff] }
  0xfd   :  { %v747_v29 = vadd.f32 %v683_v22, %v397_v25  ;;  %v779_v30 = vadd.f32 %v715_v24, %v557_v26  ;;  %v1045_v31 = vpop.f32.mrb[10].mxu0  ;;  %v1093_v33 = vpop.f32.mrb[10].mxu1  ;;  %v723_v25 = vld [vmem:[%s1978_s3 + $0x180] sm:$0xff] }
  0xfe   :  { %813 = vst.msk [vmem:[%s1979_s4 + $0x48] sm:$0xff] %vm803_vm1, %v748_v27  ;;  %845 = vst.msk [vmem:[%s1979_s4 + $0x148] sm:$0xff] %vm803_vm1, %v780_v28  ;;  %v412_v35 = vadd.f32 %v1045_v31, %v1461_v13  ;;  %v572_v36 = vadd.f32 %v1093_v33, %v1461_v13  ;;  %v406_v37 = vpop.f32.mrb[11].mxu0  ;;  %v566_v39 = vpop.f32.mrb[11].mxu1  ;;  %v694_v33 = vld [vmem:[%s1978_s3 + $0x98] sm:$0xff] }
  0xff   :  { %812 = vst.msk [vmem:[%s1979_s4 + $0x40] sm:$0xff] %vm803_vm1, %v747_v29  ;;  %844 = vst.msk [vmem:[%s1979_s4 + $0x140] sm:$0xff] %vm803_vm1, %v779_v30  ;;  %v407_v41 = vadd.f32 %v1461_v13, %v406_v37  ;;  %v567_v42 = vadd.f32 %v1461_v13, %v566_v39  ;;  %v693_v39 = vld [vmem:[%s1978_s3 + $0x90] sm:$0xff] }
 0x100   :  { %v750_v43 = vadd.f32 %v686_v32, %v412_v35  ;;  %v782_v44 = vadd.f32 %v718_v34, %v572_v36  ;;  %v726_v35 = vld [vmem:[%s1978_s3 + $0x198] sm:$0xff] }
 0x101   :  { %v749_v45 = vadd.f32 %v685_v38, %v407_v41  ;;  %v781_v46 = vadd.f32 %v717_v40, %v567_v42  ;;  %v1048_v47 = vpop.f32.mrb[12].mxu0  ;;  %v1096_v49 = vpop.f32.mrb[12].mxu1  ;;  %v725_v41 = vld [vmem:[%s1978_s3 + $0x190] sm:$0xff] }
 0x102   :  { %815 = vst.msk [vmem:[%s1979_s4 + $0x58] sm:$0xff] %vm803_vm1, %v750_v43  ;;  %847 = vst.msk [vmem:[%s1979_s4 + $0x158] sm:$0xff] %vm803_vm1, %v782_v44  ;;  %v422_v51 = vadd.f32 %v1048_v47, %v1461_v13  ;;  %v582_v52 = vadd.f32 %v1096_v49, %v1461_v13  ;;  %v416_v53 = vpop.f32.mrb[13].mxu0  ;;  %v576_v55 = vpop.f32.mrb[13].mxu1  ;;  %v696_v49 = vld [vmem:[%s1978_s3 + $0xa8] sm:$0xff] }
 0x103   :  { %814 = vst.msk [vmem:[%s1979_s4 + $0x50] sm:$0xff] %vm803_vm1, %v749_v45  ;;  %846 = vst.msk [vmem:[%s1979_s4 + $0x150] sm:$0xff] %vm803_vm1, %v781_v46  ;;  %v417_v57 = vadd.f32 %v1461_v13, %v416_v53  ;;  %v577_v58 = vadd.f32 %v1461_v13, %v576_v55  ;;  %v695_v55 = vld [vmem:[%s1978_s3 + $0xa0] sm:$0xff] }
 0x104   :  { %v752_v59 = vadd.f32 %v688_v48, %v422_v51  ;;  %v784_v60 = vadd.f32 %v720_v50, %v582_v52  ;;  %v728_v51 = vld [vmem:[%s1978_s3 + $0x1a8] sm:$0xff] }
 0x105   :  { %v751_v61 = vadd.f32 %v687_v54, %v417_v57  ;;  %v783_v62 = vadd.f32 %v719_v56, %v577_v58  ;;  %v1051_v63 = vpop.f32.mrb[14].mxu0  ;;  %v1099_v1 = vpop.f32.mrb[14].mxu1  ;;  %v727_v57 = vld [vmem:[%s1978_s3 + $0x1a0] sm:$0xff] }
 0x106   :  { %817 = vst.msk [vmem:[%s1979_s4 + $0x68] sm:$0xff] %vm803_vm1, %v752_v59  ;;  %849 = vst.msk [vmem:[%s1979_s4 + $0x168] sm:$0xff] %vm803_vm1, %v784_v60  ;;  %v432_v3 = vadd.f32 %v1051_v63, %v1461_v13  ;;  %v592_v4 = vadd.f32 %v1099_v1, %v1461_v13  ;;  %v426_v5 = vpop.f32.mrb[15].mxu0  ;;  %v586_v7 = vpop.f32.mrb[15].mxu1  ;;  %v698_v1 = vld [vmem:[%s1978_s3 + $0xb8] sm:$0xff] }
 0x107   :  { %816 = vst.msk [vmem:[%s1979_s4 + $0x60] sm:$0xff] %vm803_vm1, %v751_v61  ;;  %848 = vst.msk [vmem:[%s1979_s4 + $0x160] sm:$0xff] %vm803_vm1, %v783_v62  ;;  %v427_v9 = vadd.f32 %v1461_v13, %v426_v5  ;;  %v587_v10 = vadd.f32 %v1461_v13, %v586_v7  ;;  %v697_v7 = vld [vmem:[%s1978_s3 + $0xb0] sm:$0xff] }
 0x108   :  { %v754_v11 = vadd.f32 %v690_v0, %v432_v3  ;;  %v786_v12 = vadd.f32 %v722_v2, %v592_v4  ;;  %v730_v3 = vld [vmem:[%s1978_s3 + $0x1b8] sm:$0xff] }
 0x109   :  { %v753_v14 = vadd.f32 %v689_v6, %v427_v9  ;;  %v785_v15 = vadd.f32 %v721_v8, %v587_v10  ;;  %v1054_v16 = vpop.f32.mrb[16].mxu0  ;;  %v1102_v18 = vpop.f32.mrb[16].mxu1  ;;  %v729_v9 = vld [vmem:[%s1978_s3 + $0x1b0] sm:$0xff] }
 0x10a   :  { %819 = vst.msk [vmem:[%s1979_s4 + $0x78] sm:$0xff] %vm803_vm1, %v754_v11  ;;  %851 = vst.msk [vmem:[%s1979_s4 + $0x178] sm:$0xff] %vm803_vm1, %v786_v12  ;;  %v442_v20 = vadd.f32 %v1054_v16, %v1461_v13  ;;  %v602_v21 = vadd.f32 %v1102_v18, %v1461_v13  ;;  %v436_v22 = vpop.f32.mrb[17].mxu0  ;;  %v596_v24 = vpop.f32.mrb[17].mxu1  ;;  %v700_v18 = vld [vmem:[%s1978_s3 + $0xc8] sm:$0xff] }
 0x10b   :  { %818 = vst.msk [vmem:[%s1979_s4 + $0x70] sm:$0xff] %vm803_vm1, %v753_v14  ;;  %850 = vst.msk [vmem:[%s1979_s4 + $0x170] sm:$0xff] %vm803_vm1, %v785_v15  ;;  %v437_v26 = vadd.f32 %v1461_v13, %v436_v22  ;;  %v597_v27 = vadd.f32 %v1461_v13, %v596_v24  ;;  %v699_v24 = vld [vmem:[%s1978_s3 + $0xc0] sm:$0xff] }
 0x10c   :  { %v756_v28 = vadd.f32 %v692_v17, %v442_v20  ;;  %v788_v29 = vadd.f32 %v724_v19, %v602_v21  ;;  %v732_v20 = vld [vmem:[%s1978_s3 + $0x1c8] sm:$0xff] }
 0x10d   :  { %v755_v30 = vadd.f32 %v691_v23, %v437_v26  ;;  %v787_v31 = vadd.f32 %v723_v25, %v597_v27  ;;  %v1057_v32 = vpop.f32.mrb[18].mxu0  ;;  %v1105_v34 = vpop.f32.mrb[18].mxu1  ;;  %v731_v26 = vld [vmem:[%s1978_s3 + $0x1c0] sm:$0xff] }
 0x10e   :  { %821 = vst.msk [vmem:[%s1979_s4 + $0x88] sm:$0xff] %vm803_vm1, %v756_v28  ;;  %853 = vst.msk [vmem:[%s1979_s4 + $0x188] sm:$0xff] %vm803_vm1, %v788_v29  ;;  %v452_v36 = vadd.f32 %v1057_v32, %v1461_v13  ;;  %v612_v37 = vadd.f32 %v1105_v34, %v1461_v13  ;;  %v446_v38 = vpop.f32.mrb[19].mxu0  ;;  %v606_v40 = vpop.f32.mrb[19].mxu1  ;;  %v702_v34 = vld [vmem:[%s1978_s3 + $0xd8] sm:$0xff] }
 0x10f   :  { %820 = vst.msk [vmem:[%s1979_s4 + $0x80] sm:$0xff] %vm803_vm1, %v755_v30  ;;  %852 = vst.msk [vmem:[%s1979_s4 + $0x180] sm:$0xff] %vm803_vm1, %v787_v31  ;;  %v447_v42 = vadd.f32 %v1461_v13, %v446_v38  ;;  %v607_v43 = vadd.f32 %v1461_v13, %v606_v40  ;;  %v701_v40 = vld [vmem:[%s1978_s3 + $0xd0] sm:$0xff] }
 0x110   :  { %v758_v44 = vadd.f32 %v694_v33, %v452_v36  ;;  %v790_v45 = vadd.f32 %v726_v35, %v612_v37  ;;  %v734_v36 = vld [vmem:[%s1978_s3 + $0x1d8] sm:$0xff] }
 0x111   :  { %v757_v46 = vadd.f32 %v693_v39, %v447_v42  ;;  %v789_v47 = vadd.f32 %v725_v41, %v607_v43  ;;  %v1060_v48 = vpop.f32.mrb[20].mxu0  ;;  %v1108_v50 = vpop.f32.mrb[20].mxu1  ;;  %v733_v42 = vld [vmem:[%s1978_s3 + $0x1d0] sm:$0xff] }
 0x112   :  { %823 = vst.msk [vmem:[%s1979_s4 + $0x98] sm:$0xff] %vm803_vm1, %v758_v44  ;;  %855 = vst.msk [vmem:[%s1979_s4 + $0x198] sm:$0xff] %vm803_vm1, %v790_v45  ;;  %v462_v52 = vadd.f32 %v1060_v48, %v1461_v13  ;;  %v622_v53 = vadd.f32 %v1108_v50, %v1461_v13  ;;  %v456_v54 = vpop.f32.mrb[21].mxu0  ;;  %v616_v56 = vpop.f32.mrb[21].mxu1  ;;  %v704_v50 = vld [vmem:[%s1978_s3 + $0xe8] sm:$0xff] }
 0x113   :  { %822 = vst.msk [vmem:[%s1979_s4 + $0x90] sm:$0xff] %vm803_vm1, %v757_v46  ;;  %854 = vst.msk [vmem:[%s1979_s4 + $0x190] sm:$0xff] %vm803_vm1, %v789_v47  ;;  %v457_v58 = vadd.f32 %v1461_v13, %v456_v54  ;;  %v617_v59 = vadd.f32 %v1461_v13, %v616_v56  ;;  %v703_v56 = vld [vmem:[%s1978_s3 + $0xe0] sm:$0xff] }
 0x114   :  { %v760_v60 = vadd.f32 %v696_v49, %v462_v52  ;;  %v792_v61 = vadd.f32 %v728_v51, %v622_v53  ;;  %v736_v52 = vld [vmem:[%s1978_s3 + $0x1e8] sm:$0xff] }
 0x115   :  { %v759_v62 = vadd.f32 %v695_v55, %v457_v58  ;;  %v791_v63 = vadd.f32 %v727_v57, %v617_v59  ;;  %v1063_v0 = vpop.f32.mrb[22].mxu0  ;;  %v1111_v2 = vpop.f32.mrb[22].mxu1  ;;  %v735_v58 = vld [vmem:[%s1978_s3 + $0x1e0] sm:$0xff] }
 0x116   :  { %825 = vst.msk [vmem:[%s1979_s4 + $0xa8] sm:$0xff] %vm803_vm1, %v760_v60  ;;  %857 = vst.msk [vmem:[%s1979_s4 + $0x1a8] sm:$0xff] %vm803_vm1, %v792_v61  ;;  %v472_v4 = vadd.f32 %v1063_v0, %v1461_v13  ;;  %v632_v5 = vadd.f32 %v1111_v2, %v1461_v13  ;;  %v466_v6 = vpop.f32.mrb[23].mxu0  ;;  %v626_v8 = vpop.f32.mrb[23].mxu1  ;;  %v706_v2 = vld [vmem:[%s1978_s3 + $0xf8] sm:$0xff] }
 0x117   :  { %824 = vst.msk [vmem:[%s1979_s4 + $0xa0] sm:$0xff] %vm803_vm1, %v759_v62  ;;  %856 = vst.msk [vmem:[%s1979_s4 + $0x1a0] sm:$0xff] %vm803_vm1, %v791_v63  ;;  %v467_v10 = vadd.f32 %v1461_v13, %v466_v6  ;;  %v627_v11 = vadd.f32 %v1461_v13, %v626_v8  ;;  %v705_v8 = vld [vmem:[%s1978_s3 + $0xf0] sm:$0xff] }
 0x118   :  { %v762_v12 = vadd.f32 %v698_v1, %v472_v4  ;;  %v794_v14 = vadd.f32 %v730_v3, %v632_v5  ;;  %v738_v4 = vld [vmem:[%s1978_s3 + $0x1f8] sm:$0xff] }
 0x119   :  { %v761_v15 = vadd.f32 %v697_v7, %v467_v10  ;;  %v793_v16 = vadd.f32 %v729_v9, %v627_v11  ;;  %v1066_v17 = vpop.f32.mrb[24].mxu0  ;;  %v1114_v19 = vpop.f32.mrb[24].mxu1  ;;  %v737_v10 = vld [vmem:[%s1978_s3 + $0x1f0] sm:$0xff] }
 0x11a   :  { %827 = vst.msk [vmem:[%s1979_s4 + $0xb8] sm:$0xff] %vm803_vm1, %v762_v12  ;;  %859 = vst.msk [vmem:[%s1979_s4 + $0x1b8] sm:$0xff] %vm803_vm1, %v794_v14  ;;  %v482_v21 = vadd.f32 %v1066_v17, %v1461_v13  ;;  %v642_v22 = vadd.f32 %v1114_v19, %v1461_v13  ;;  %v476_v23 = vpop.f32.mrb[25].mxu0  ;;  %v636_v25 = vpop.f32.mrb[25].mxu1 }
 0x11b   :  { %826 = vst.msk [vmem:[%s1979_s4 + $0xb0] sm:$0xff] %vm803_vm1, %v761_v15  ;;  %858 = vst.msk [vmem:[%s1979_s4 + $0x1b0] sm:$0xff] %vm803_vm1, %v793_v16  ;;  %v477_v27 = vadd.f32 %v1461_v13, %v476_v23  ;;  %v637_v28 = vadd.f32 %v1461_v13, %v636_v25 }
 0x11c   :  { %v764_v29 = vadd.f32 %v700_v18, %v482_v21  ;;  %v796_v30 = vadd.f32 %v732_v20, %v642_v22 }
 0x11d   :  { %v763_v31 = vadd.f32 %v699_v24, %v477_v27  ;;  %v795_v32 = vadd.f32 %v731_v26, %v637_v28  ;;  %v1069_v33 = vpop.f32.mrb[26].mxu0  ;;  %v1117_v35 = vpop.f32.mrb[26].mxu1 }
 0x11e   :  { %829 = vst.msk [vmem:[%s1979_s4 + $0xc8] sm:$0xff] %vm803_vm1, %v764_v29  ;;  %861 = vst.msk [vmem:[%s1979_s4 + $0x1c8] sm:$0xff] %vm803_vm1, %v796_v30  ;;  %v492_v37 = vadd.f32 %v1069_v33, %v1461_v13  ;;  %v652_v38 = vadd.f32 %v1117_v35, %v1461_v13  ;;  %v486_v39 = vpop.f32.mrb[27].mxu0  ;;  %v646_v41 = vpop.f32.mrb[27].mxu1 }
 0x11f   :  { %828 = vst.msk [vmem:[%s1979_s4 + $0xc0] sm:$0xff] %vm803_vm1, %v763_v31  ;;  %860 = vst.msk [vmem:[%s1979_s4 + $0x1c0] sm:$0xff] %vm803_vm1, %v795_v32  ;;  %v487_v43 = vadd.f32 %v1461_v13, %v486_v39  ;;  %v647_v44 = vadd.f32 %v1461_v13, %v646_v41 }
 0x120   :  { %v766_v45 = vadd.f32 %v702_v34, %v492_v37  ;;  %v798_v46 = vadd.f32 %v734_v36, %v652_v38 }
 0x121   :  { %v765_v47 = vadd.f32 %v701_v40, %v487_v43  ;;  %v797_v48 = vadd.f32 %v733_v42, %v647_v44  ;;  %v1072_v49 = vpop.f32.mrb[28].mxu0  ;;  %v1120_v51 = vpop.f32.mrb[28].mxu1 }
 0x122   :  { %831 = vst.msk [vmem:[%s1979_s4 + $0xd8] sm:$0xff] %vm803_vm1, %v766_v45  ;;  %863 = vst.msk [vmem:[%s1979_s4 + $0x1d8] sm:$0xff] %vm803_vm1, %v798_v46  ;;  %v502_v53 = vadd.f32 %v1072_v49, %v1461_v13  ;;  %v662_v54 = vadd.f32 %v1120_v51, %v1461_v13  ;;  %v496_v55 = vpop.f32.mrb[29].mxu0  ;;  %v656_v57 = vpop.f32.mrb[29].mxu1 }
 0x123   :  { %830 = vst.msk [vmem:[%s1979_s4 + $0xd0] sm:$0xff] %vm803_vm1, %v765_v47  ;;  %862 = vst.msk [vmem:[%s1979_s4 + $0x1d0] sm:$0xff] %vm803_vm1, %v797_v48  ;;  %v497_v59 = vadd.f32 %v1461_v13, %v496_v55  ;;  %v657_v60 = vadd.f32 %v1461_v13, %v656_v57 }
 0x124   :  { %v768_v61 = vadd.f32 %v704_v50, %v502_v53  ;;  %v800_v62 = vadd.f32 %v736_v52, %v662_v54 }
 0x125   :  { %v767_v63 = vadd.f32 %v703_v56, %v497_v59  ;;  %v799_v0 = vadd.f32 %v735_v58, %v657_v60  ;;  %v1075_v1 = vpop.f32.mrb[30].mxu0  ;;  %v1123_v3 = vpop.f32.mrb[30].mxu1 }
 0x126   :  { %833 = vst.msk [vmem:[%s1979_s4 + $0xe8] sm:$0xff] %vm803_vm1, %v768_v61  ;;  %865 = vst.msk [vmem:[%s1979_s4 + $0x1e8] sm:$0xff] %vm803_vm1, %v800_v62  ;;  %v512_v5 = vadd.f32 %v1075_v1, %v1461_v13  ;;  %v672_v6 = vadd.f32 %v1123_v3, %v1461_v13  ;;  %v506_v7 = vpop.f32.mrb[31].mxu0  ;;  %v666_v9 = vpop.f32.mrb[31].mxu1 }
 0x127   :  { %832 = vst.msk [vmem:[%s1979_s4 + $0xe0] sm:$0xff] %vm803_vm1, %v767_v63  ;;  %864 = vst.msk [vmem:[%s1979_s4 + $0x1e0] sm:$0xff] %vm803_vm1, %v799_v0  ;;  %v507_v11 = vadd.f32 %v1461_v13, %v506_v7  ;;  %v667_v12 = vadd.f32 %v1461_v13, %v666_v9 }
 0x128   :  { %v770_v14 = vadd.f32 %v706_v2, %v512_v5  ;;  %v802_v15 = vadd.f32 %v738_v4, %v672_v6 }
 0x129   :  { %v769_v16 = vadd.f32 %v705_v8, %v507_v11  ;;  %v801_v17 = vadd.f32 %v737_v10, %v667_v12 }
 0x12a   :  { %835 = vst.msk [vmem:[%s1979_s4 + $0xf8] sm:$0xff] %vm803_vm1, %v770_v14  ;;  %867 = vst.msk [vmem:[%s1979_s4 + $0x1f8] sm:$0xff] %vm803_vm1, %v802_v15 }
 0x12b   :  { %834 = vst.msk [vmem:[%s1979_s4 + $0xf0] sm:$0xff] %vm803_vm1, %v769_v16  ;;  %866 = vst.msk [vmem:[%s1979_s4 + $0x1f0] sm:$0xff] %vm803_vm1, %v801_v17 }

// kernel: _lambda_.9
= control target key start
LH: loop header
LB: loop body
LE: loop exit
PB: predicated region body
PF: predicated region fallthrough
CT: control target
= control target key end

     0   :  { %vm46_vm0 = vcmask 1043456   ;;  %v585_v40 = vmov 0   ;;  %s831_s0 = inlined_call_operand.vmem [shape: f32[2,4,4,256], index: 0, kind: input, shape index: {}]   ;;  %s832_s1 = inlined_call_operand.vmem [shape: f32[1,4,4,1], index: 1, kind: input, shape index: {}]   ;;  %s833_s2 = inlined_call_operand.vmem [shape: f32[1,4,4,1], index: 2, kind: input, shape index: {}]   ;;  %s834_s3 = inlined_call_operand.vmem [shape: f32[2,4,4,256], index: 3, kind: output, shape index: {}]  }
   0x1   :  { %v610_v0 = vld [vmem:[%s831_s0 + $0x10] sm:$0xff]  ;;  %v615_v1 = vld [vmem:[%s831_s0] sm:$0xff]  ;;  %v620_v2 = vld [vmem:[%s831_s0 + $0x18] sm:$0xff]  ;;  %528 = vset.pattern.permute.xlu1 %v585_v40  ;;  %527 = vset.pattern.permute.xlu0 %v585_v40 }
   0x2   :  { %v32_v3 = vcombine.high %v610_v0, %v610_v0  ;;  %v57_v4 = vsel %vm46_vm0, %v610_v0, 0.0  ;;  %v30_v5 = vcombine.high %v615_v1, %v615_v1  ;;  %v47_v6 = vsel %vm46_vm0, %v615_v1, 0.0  ;;  %v633_v7 = vld [vmem:[%s831_s0 + $0x8] sm:$0xff]  ;;  %v649_v12 = vld [vmem:[%s831_s0 + $0x20] sm:$0xff]  ;;  %v662_v21 = vld [vmem:[%s831_s0 + $0x30] sm:$0xff] }
   0x3   :  { %v638_v8 = vld [vmem:[%s831_s0 + $0x28] sm:$0xff]  ;;  %v33_v9 = vcombine.high %v620_v2, %v620_v2  ;;  %v62_v10 = vsel %vm46_vm0, %v620_v2, 0.0  ;;  %v31_v11 = vcombine.high %v633_v7, %v633_v7  ;;  %v52_v15 = vsel %vm46_vm0, %v633_v7, 0.0  ;;  %v667_v22 = vld [vmem:[%s831_s0 + $0x38] sm:$0xff] }
   0x4   :  { %v58_v13 = vsel %vm46_vm0, %v32_v3, 0.0  ;;  %v48_v14 = vsel %vm46_vm0, %v30_v5, 0.0  ;;  %v35_v16 = vcombine.high %v638_v8, %v638_v8  ;;  %v34_v23 = vcombine.high %v649_v12, %v649_v12 }
   0x5   :  { %v59_v17 = vadd.f32 %v58_v13, %v57_v4  ;;  %v49_v18 = vadd.f32 %v48_v14, %v47_v6  ;;  %v63_v19 = vsel %vm46_vm0, %v33_v9, 0.0  ;;  %v53_v20 = vsel %vm46_vm0, %v31_v11, 0.0 }
   0x6   :  { %v64_v24 = vadd.f32 %v63_v19, %v62_v10  ;;  %v54_v25 = vadd.f32 %v53_v20, %v52_v15  ;;  %v72_v26 = vsel %vm46_vm0, %v638_v8, 0.0  ;;  %v73_v27 = vsel %vm46_vm0, %v35_v16, 0.0 }
   0x7   :  { %60 = vadd.xlane.f32.xlu1 %v59_v17  ;;  %50 = vadd.xlane.f32.xlu0 %v49_v18  ;;  %v67_v28 = vsel %vm46_vm0, %v649_v12, 0.0  ;;  %v68_v29 = vsel %vm46_vm0, %v34_v23, 0.0  ;;  %v36_v30 = vcombine.high %v662_v21, %v662_v21  ;;  %v37_v31 = vcombine.high %v667_v22, %v667_v22 }
   0x8   :  { %v74_v32 = vadd.f32 %v73_v27, %v72_v26  ;;  %v69_v33 = vadd.f32 %v68_v29, %v67_v28  ;;  %v77_v34 = vsel %vm46_vm0, %v662_v21, 0.0  ;;  %v82_v36 = vsel %vm46_vm0, %v667_v22, 0.0 }
   0x9   :  { %v78_v35 = vsel %vm46_vm0, %v36_v30, 0.0  ;;  %v83_v37 = vsel %vm46_vm0, %v37_v31, 0.0 }
   0xa   :  { %v79_v38 = vadd.f32 %v78_v35, %v77_v34  ;;  %v84_v39 = vadd.f32 %v83_v37, %v82_v36 }
   0xb   :  { %65 = vadd.xlane.f32.xlu1 %v64_v24  ;;  %55 = vadd.xlane.f32.xlu0 %v54_v25 }
   0xf   :  { %75 = vadd.xlane.f32.xlu1 %v74_v32  ;;  %70 = vadd.xlane.f32.xlu0 %v69_v33 }
  0x13   :  { %80 = vadd.xlane.f32.xlu0 %v79_v38  ;;  %85 = vadd.xlane.f32.xlu1 %v84_v39 }
  0x94   :  { %v61_v41 = vpop.xlane.xlu1 %60  ;;  %v51_v42 = vpop.xlane.xlu0 %50 }
  0x95   :  { %v90_v43 = vmul.f32 0.00390625, %v61_v41  ;;  %v88_v44 = vmul.f32 0.00390625, %v51_v42 }
  0x97   :  { %v110_v45 = vsel %vm46_vm0, %v90_v43, 0.0  ;;  %v96_v46 = vsel %vm46_vm0, %v88_v44, 0.0 }
  0x98   :  { %v111_v47 = vrot.slane %v110_v45, 4  ;;  %v97_v48 = vrot.slane %v96_v46, 4  ;;  %v66_v49 = vpop.xlane.xlu1 %65  ;;  %v56_v50 = vpop.xlane.xlu0 %55 }
  0x99   :  { %v91_v51 = vmul.f32 0.00390625, %v66_v49  ;;  %v89_v52 = vmul.f32 0.00390625, %v56_v50 }
  0x9a   :  { %v112_v53 = vadd.f32 %v111_v47, %v110_v45  ;;  %v98_v54 = vadd.f32 %v97_v48, %v96_v46 }
  0x9b   :  { %v117_v55 = vsel %vm46_vm0, %v91_v51, 0.0  ;;  %v103_v56 = vsel %vm46_vm0, %v89_v52, 0.0 }
  0x9c   :  { %v113_v57 = vrot.slane %v112_v53, 2  ;;  %v99_v58 = vrot.slane %v98_v54, 2  ;;  %v118_v59 = vrot.slane %v117_v55, 4  ;;  %v104_v60 = vrot.slane %v103_v56, 4  ;;  %v76_v61 = vpop.xlane.xlu1 %75  ;;  %v71_v62 = vpop.xlane.xlu0 %70 }
  0x9d   :  { %v93_v63 = vmul.f32 0.00390625, %v76_v61  ;;  %v92_v3 = vmul.f32 0.00390625, %v71_v62 }
  0x9e   :  { %v114_v4 = vadd.f32 %v113_v57, %v112_v53  ;;  %v100_v5 = vadd.f32 %v99_v58, %v98_v54  ;;  %v119_v6 = vadd.f32 %v118_v59, %v117_v55  ;;  %v105_v9 = vadd.f32 %v104_v60, %v103_v56 }
  0x9f   :  { %v131_v10 = vsel %vm46_vm0, %v93_v63, 0.0  ;;  %v124_v11 = vsel %vm46_vm0, %v92_v3, 0.0 }
  0xa0   :  { %v115_v13 = vrot.slane %v114_v4, 1  ;;  %v101_v14 = vrot.slane %v100_v5, 1  ;;  %v120_v15 = vrot.slane %v119_v6, 2  ;;  %v106_v16 = vrot.slane %v105_v9, 2  ;;  %v81_v17 = vpop.xlane.xlu0 %80 }
  0xa1   :  { %v132_v18 = vrot.slane %v131_v10, 4  ;;  %v125_v19 = vrot.slane %v124_v11, 4  ;;  %v94_v20 = vmul.f32 0.00390625, %v81_v17 }
  0xa2   :  { %v116_v23 = vadd.f32 %v115_v13, %v114_v4  ;;  %v102_v24 = vadd.f32 %v101_v14, %v100_v5  ;;  %v121_v25 = vadd.f32 %v120_v15, %v119_v6  ;;  %v107_v26 = vadd.f32 %v106_v16, %v105_v9 }
  0xa3   :  { %v133_v27 = vadd.f32 %v132_v18, %v131_v10  ;;  %v126_v28 = vadd.f32 %v125_v19, %v124_v11  ;;  %v138_v29 = vsel %vm46_vm0, %v94_v20, 0.0 }
  0xa4   :  { %v155_v30 = vmul.f32 0.25, %v116_v23  ;;  %v153_v31 = vmul.f32 0.25, %v102_v24  ;;  %v122_v32 = vrot.slane %v121_v25, 1  ;;  %v108_v33 = vrot.slane %v107_v26, 1 }
  0xa5   :  { %v134_v34 = vrot.slane %v133_v27, 2  ;;  %v127_v35 = vrot.slane %v126_v28, 2  ;;  %v139_v36 = vrot.slane %v138_v29, 4 }
  0xa6   :  { %v123_v37 = vadd.f32 %v122_v32, %v121_v25  ;;  %v109_v38 = vadd.f32 %v108_v33, %v107_v26  ;;  %v695_v39 = vsub.f32 %v615_v1, %v153_v31  ;;  %v698_v40 = vsub.f32 %v610_v0, %v155_v30 }
  0xa7   :  { %v135_v41 = vadd.f32 %v134_v34, %v133_v27  ;;  %v128_v42 = vadd.f32 %v127_v35, %v126_v28  ;;  %v140_v43 = vadd.f32 %v139_v36, %v138_v29  ;;  %v338_v34 = vld [vmem:[%s832_s1 + $0x4] sm:$0xf]  ;;  %v86_v35 = vpop.xlane.xlu1 %85 }
  0xa8   :  { %v156_v44 = vmul.f32 0.25, %v123_v37  ;;  %v154_v45 = vmul.f32 0.25, %v109_v38  ;;  %v169_v46 = vmul.f32 %v695_v39, %v695_v39  ;;  %v171_v47 = vmul.f32 %v698_v40, %v698_v40  ;;  %v339_v37 = vld [vmem:[%s832_s1 + $0x8] sm:$0xf]  ;;  %v337_v38 = vld [vmem:[%s832_s1] sm:$0xf] }
  0xa9   :  { %v136_v48 = vrot.slane %v135_v41, 1  ;;  %v129_v49 = vrot.slane %v128_v42, 1  ;;  %v141_v50 = vrot.slane %v140_v43, 2  ;;  %v95_v36 = vmul.f32 0.00390625, %v86_v35 }
  0xaa   :  { %v185_v51 = vcombine.high %v169_v46, %v169_v46  ;;  %v187_v1 = vcombine.high %v171_v47, %v171_v47  ;;  %v705_v54 = vsub.f32 %v633_v7, %v154_v45  ;;  %v201_v55 = vsel %vm46_vm0, %v169_v46, 0.0  ;;  %v398_v46 = vld [vmem:[%s833_s2 + $0x4] sm:$0xf] }
  0xab   :  { %v137_v52 = vadd.f32 %v136_v48, %v135_v41  ;;  %v130_v53 = vadd.f32 %v129_v49, %v128_v42  ;;  %v142_v0 = vadd.f32 %v141_v50, %v140_v43  ;;  %v710_v57 = vsub.f32 %v620_v2, %v156_v44  ;;  %v340_v42 = vld [vmem:[%s832_s1 + $0xc] sm:$0xf]  ;;  %v397_v44 = vld [vmem:[%s833_s2] sm:$0xf] }
  0xac   :  { %v202_v56 = vsel %vm46_vm0, %v185_v51, 0.0  ;;  %v212_v62 = vsel %vm46_vm0, %v187_v1, 0.0  ;;  %v170_v63 = vmul.f32 %v705_v54, %v705_v54  ;;  %v211_v5 = vsel %vm46_vm0, %v171_v47, 0.0 }
  0xad   :  { %v158_v58 = vmul.f32 0.25, %v137_v52  ;;  %v157_v59 = vmul.f32 0.25, %v130_v53  ;;  %v143_v60 = vrot.slane %v142_v0, 1  ;;  %v203_v61 = vadd.f32 %v202_v56, %v201_v55 }
  0xae   :  { %v172_v7 = vmul.f32 %v710_v57, %v710_v57  ;;  %v186_v6 = vcombine.high %v170_v63, %v170_v63  ;;  %v213_v11 = vadd.f32 %v212_v62, %v211_v5  ;;  %v206_v15 = vsel %vm46_vm0, %v170_v63, 0.0 }
  0xaf   :  { %v144_v3 = vadd.f32 %v143_v60, %v142_v0  ;;  %204 = vadd.xlane.f32.xlu0 %v203_v61  ;;  %v718_v4 = vsub.f32 %v649_v12, %v157_v59  ;;  %v721_v2 = vsub.f32 %v638_v8, %v158_v58  ;;  %v145_v41 = vsel %vm46_vm0, %v95_v36, 0.0  ;;  %v399_v58 = vld [vmem:[%s833_s2 + $0x8] sm:$0xf] }
  0xb0   :  { %v188_v9 = vcombine.high %v172_v7, %v172_v7  ;;  %v207_v12 = vsel %vm46_vm0, %v186_v6, 0.0  ;;  %v216_v24 = vsel %vm46_vm0, %v172_v7, 0.0  ;;  %v146_v43 = vrot.slane %v145_v41, 4 }
  0xb1   :  { %v159_v10 = vmul.f32 0.25, %v144_v3  ;;  %v173_v13 = vmul.f32 %v718_v4, %v718_v4  ;;  %v174_v14 = vmul.f32 %v721_v2, %v721_v2  ;;  %v208_v16 = vadd.f32 %v207_v12, %v206_v15 }
  0xb2   :  { %v217_v18 = vsel %vm46_vm0, %v188_v9, 0.0  ;;  %v147_v45 = vadd.f32 %v146_v43, %v145_v41  ;;  %v360_v36 = vlaneseq }
  0xb3   :  { %214 = vadd.xlane.f32.xlu0 %v213_v11  ;;  %v189_v8 = vcombine.high %v173_v13, %v173_v13  ;;  %v221_v17 = vsel %vm46_vm0, %v173_v13, 0.0  ;;  %v190_v19 = vcombine.high %v174_v14, %v174_v14  ;;  %v733_v20 = vsub.f32 %v662_v21, %v159_v10  ;;  %209 = vadd.xlane.f32.xlu1 %v208_v16 }
  0xb4   :  { %v218_v27 = vadd.f32 %v217_v18, %v216_v24  ;;  %v226_v21 = vsel %vm46_vm0, %v174_v14, 0.0  ;;  %v148_v47 = vrot.slane %v147_v45, 2 }
  0xb5   :  { %v222_v23 = vsel %vm46_vm0, %v189_v8, 0.0  ;;  %v175_v26 = vmul.f32 %v733_v20, %v733_v20  ;;  %v227_v28 = vsel %vm46_vm0, %v190_v19, 0.0 }
  0xb6   :  { %v223_v25 = vadd.f32 %v222_v23, %v221_v17  ;;  %v228_v32 = vadd.f32 %v227_v28, %v226_v21  ;;  %v149_v48 = vadd.f32 %v148_v47, %v147_v45 }
  0xb7   :  { %v191_v29 = vcombine.high %v175_v26, %v175_v26  ;;  %v231_v30 = vsel %vm46_vm0, %v175_v26, 0.0  ;;  %219 = vadd.xlane.f32.xlu1 %v218_v27 }
  0xb8   :  { %224 = vadd.xlane.f32.xlu0 %v223_v25  ;;  %v150_v49 = vrot.slane %v149_v48, 1 }
  0xb9   :  { %v232_v31 = vsel %vm46_vm0, %v191_v29, 0.0 }
  0xba   :  { %v233_v33 = vadd.f32 %v232_v31, %v231_v30  ;;  %v151_v50 = vadd.f32 %v150_v49, %v149_v48  ;;  %v361_v48 = vshrl.u32 %v360_v36, 7 }
  0xbb   :  { %229 = vadd.xlane.f32.xlu1 %v228_v32 }
  0xbc   :  { %234 = vadd.xlane.f32.xlu0 %v233_v33  ;;  %v160_v51 = vmul.f32 0.25, %v151_v50 }
  0xbe   :  { %v763_v1 = vsub.f32 %v667_v22, %v160_v51  ;;  %v400_v22 = vld [vmem:[%s833_s2 + $0xc] sm:$0xf] }
  0xc0   :  { %v176_v52 = vmul.f32 %v763_v1, %v763_v1 }
  0xc2   :  { %v192_v53 = vcombine.high %v176_v52, %v176_v52  ;;  %v236_v0 = vsel %vm46_vm0, %v176_v52, 0.0 }
  0xc4   :  { %v237_v55 = vsel %vm46_vm0, %v192_v53, 0.0 }
  0xc5   :  { %v238_v56 = vadd.f32 %v237_v55, %v236_v0 }
  0xcc   :  { %347 = vperm.xlu1 %528, %v338_v34   ;;  %v586_v34 = vmov 839922192  }
  0xcd   :  { %v358_v35 = vunpack.c.l.s4 %v586_v34 }
  0xcf   :  { %v359_v47 = vunpack.c.0.s8 %v358_v35 }
  0xd0   :  { %351 = vperm.xlu1 %528, %v339_v37  }
  0xd2   :  { %343 = vperm.xlu0 %527, %v337_v38  }
  0xd4   :  { %355 = vperm.xlu1 %528, %v340_v42  }
  0xd8   :  { %403 = vperm.xlu1 %528, %v397_v44  }
  0xdc   :  { %407 = vperm.xlu1 %528, %v398_v46  }
 0x100   :  { %239 = vadd.xlane.f32.xlu1 %v238_v56  ;;  %v783_v56 = vsub.s32 %v359_v47, %v361_v48 }
 0x111   :  { %411 = vperm.xlu1 %528, %v399_v58  }
 0x115   :  { %415 = vperm.xlu1 %528, %v400_v22  }
 0x13c   :  { %v205_v59 = vpop.xlane.xlu0 %204 }
 0x13d   :  { %v241_v60 = vmul.f32 0.00390625, %v205_v59 }
 0x13f   :  { %v249_v61 = vsel %vm46_vm0, %v241_v60, 0.0 }
 0x140   :  { %v250_v62 = vrot.slane %v249_v61, 4  ;;  %v215_v63 = vpop.xlane.xlu0 %214  ;;  %v210_v3 = vpop.xlane.xlu1 %209 }
 0x141   :  { %v242_v5 = vmul.f32 0.00390625, %v210_v3 }
 0x142   :  { %v251_v7 = vadd.f32 %v250_v62, %v249_v61  ;;  %v243_v61 = vmul.f32 0.00390625, %v215_v63 }
 0x143   :  { %v256_v9 = vsel %vm46_vm0, %v242_v5, 0.0 }
 0x144   :  { %v252_v6 = vrot.slane %v251_v7, 2  ;;  %v257_v13 = vrot.slane %v256_v9, 4  ;;  %v220_v14 = vpop.xlane.xlu1 %219 }
 0x145   :  { %v225_v10 = vpop.xlane.xlu0 %224 }
 0x146   :  { %v253_v11 = vadd.f32 %v252_v6, %v251_v7  ;;  %v245_v15 = vmul.f32 0.00390625, %v225_v10  ;;  %v258_v16 = vadd.f32 %v257_v13, %v256_v9  ;;  %v263_v10 = vsel %vm46_vm0, %v243_v61, 0.0 }
 0x148   :  { %v254_v12 = vrot.slane %v253_v11, 1  ;;  %v277_v8 = vsel %vm46_vm0, %v245_v15, 0.0  ;;  %v259_v19 = vrot.slane %v258_v16, 2  ;;  %v230_v23 = vpop.xlane.xlu1 %229  ;;  %v244_v15 = vmul.f32 0.00390625, %v220_v14 }
 0x149   :  { %v278_v17 = vrot.slane %v277_v8, 4  ;;  %v246_v25 = vmul.f32 0.00390625, %v230_v23  ;;  %v235_v43 = vpop.xlane.xlu0 %234 }
 0x14a   :  { %v255_v18 = vadd.f32 %v254_v12, %v253_v11  ;;  %v260_v27 = vadd.f32 %v259_v19, %v258_v16  ;;  %v247_v3 = vmul.f32 0.00390625, %v235_v43 }
 0x14b   :  { %v279_v24 = vadd.f32 %v278_v17, %v277_v8  ;;  %v284_v29 = vsel %vm46_vm0, %v246_v25, 0.0 }
 0x14c   :  { %v305_v26 = vmul.f32 0.25, %v255_v18  ;;  %v261_v21 = vrot.slane %v260_v27, 1  ;;  %v348_v31 = vpop.permute.xlu1 %347  ;;  %v285_v33 = vrot.slane %v284_v29, 4  ;;  %v291_v12 = vsel %vm46_vm0, %v247_v3, 0.0 }
 0x14d   :  { %v280_v28 = vrot.slane %v279_v24, 2  ;;  %v370_v63 = vrot.slane %v348_v31, %v783_v56  ;;  %v292_v19 = vrot.slane %v291_v12, 4 }
 0x14e   :  { %v313_v30 = vadd.f32 1e-05, %v305_v26  ;;  %v262_v37 = vadd.f32 %v261_v21, %v260_v27  ;;  %v286_v41 = vadd.f32 %v285_v33, %v284_v29  ;;  %v270_v26 = vsel %vm46_vm0, %v244_v15, 0.0 }
 0x14f   :  { %v281_v32 = vadd.f32 %v280_v28, %v279_v24 }
 0x150   :  { %537 = vrsqrt.f32 %v313_v30  ;;  %v306_v42 = vmul.f32 0.25, %v262_v37  ;;  %v779_v44 = vpop.permute.xlu1 %351  ;;  %v287_v46 = vrot.slane %v286_v41, 2  ;;  %v271_v30 = vrot.slane %v270_v26, 4 }
 0x151   :  { %v282_v38 = vrot.slane %v281_v32, 1  ;;  %v344_v53 = vpop.permute.xlu0 %343 }
 0x152   :  { %v314_v49 = vadd.f32 1e-05, %v306_v42  ;;  %v288_v51 = vadd.f32 %v287_v46, %v286_v41  ;;  %v363_v22 = vrot.slane %v344_v53, %v783_v56  ;;  %v272_v37 = vadd.f32 %v271_v30, %v270_v26 }
 0x153   :  { %v283_v45 = vadd.f32 %v282_v38, %v281_v32 }
 0x154   :  { %539 = vrsqrt.f32 %v314_v49  ;;  %v781_v52 = vpop.permute.xlu1 %355  ;;  %v289_v55 = vrot.slane %v288_v51, 1  ;;  %v273_v46 = vrot.slane %v272_v37, 2 }
 0x155   :  { %v309_v50 = vmul.f32 0.25, %v283_v45 }
 0x156   :  { %v290_v58 = vadd.f32 %v289_v55, %v288_v51  ;;  %v274_v53 = vadd.f32 %v273_v46, %v272_v37 }
 0x157   :  { %v317_v0 = vadd.f32 1e-05, %v309_v50 }
 0x158   :  { %v404_v60 = vpop.permute.xlu1 %403  ;;  %v310_v62 = vmul.f32 0.25, %v290_v58 }
 0x159   :  { %541 = vrsqrt.f32 %v317_v0  ;;  %v423_v6 = vrot.slane %v404_v60, %v783_v56 }
 0x15a   :  { %v538_v59 = vpop.eup %537  ;;  %v318_v5 = vadd.f32 1e-05, %v310_v62 }
 0x15b   :  { %v329_v7 = vmul.f32 %v538_v59, %v695_v39  ;;  %v264_v39 = vrot.slane %v263_v10, 4 }
 0x15c   :  { %543 = vrsqrt.f32 %v318_v5  ;;  %v408_v16 = vpop.permute.xlu1 %407 }
 0x15d   :  { %v389_v9 = vmul.f32 %v363_v22, %v329_v7  ;;  %v430_v25 = vrot.slane %v408_v16, %v783_v56  ;;  %v265_v28 = vadd.f32 %v264_v39, %v263_v10 }
 0x15e   :  { %v540_v13 = vpop.eup %539 }
 0x15f   :  { %v449_v11 = vadd.f32 %v423_v6, %v389_v9  ;;  %v330_v8 = vmul.f32 %v540_v13, %v705_v54  ;;  %v293_v54 = vadd.f32 %v292_v19, %v291_v12  ;;  %v266_v34 = vrot.slane %v265_v28, 2 }
 0x161   :  { %v457_v17 = vsub.f32 0.0, %v449_v11  ;;  %v390_v23 = vmul.f32 %v370_v63, %v330_v8  ;;  %v294_v38 = vrot.slane %v293_v54, 2 }
 0x163   :  { %v542_v18 = vpop.eup %541  ;;  %v465_v24 = vmul.f32 1.442695, %v457_v17  ;;  %v450_v14 = vadd.f32 %v430_v25, %v390_v23  ;;  %v295_v47 = vadd.f32 %v294_v38, %v293_v54 }
 0x164   :  { %v333_v27 = vmul.f32 %v542_v18, %v718_v4  ;;  %v267_v4 = vadd.f32 %v266_v34, %v265_v28  ;;  %v377_v28 = vrot.slane %v779_v44, %v783_v56 }
 0x165   :  { %545 = vpow2.f32 %v465_v24  ;;  %v458_v21 = vsub.f32 0.0, %v450_v14  ;;  %v296_v0 = vrot.slane %v295_v47, 1 }
 0x166   :  { %v393_v29 = vmul.f32 %v363_v22, %v333_v27  ;;  %v544_v32 = vpop.eup %543  ;;  %v268_v50 = vrot.slane %v267_v4, 1  ;;  %v275_v22 = vrot.slane %v274_v53, 1 }
 0x167   :  { %v467_v33 = vmul.f32 1.442695, %v458_v21  ;;  %v334_v35 = vmul.f32 %v544_v32, %v721_v2  ;;  %v297_v59 = vadd.f32 %v296_v0, %v295_v47 }
 0x168   :  { %v453_v31 = vadd.f32 %v423_v6, %v393_v29  ;;  %v269_v55 = vadd.f32 %v268_v50, %v267_v4  ;;  %v276_v7 = vadd.f32 %v275_v22, %v274_v53 }
 0x169   :  { %547 = vpow2.f32 %v467_v33  ;;  %v394_v41 = vmul.f32 %v370_v63, %v334_v35  ;;  %v311_v3 = vmul.f32 0.25, %v297_v59 }
 0x16a   :  { %v461_v36 = vsub.f32 0.0, %v453_v31  ;;  %v307_v62 = vmul.f32 0.25, %v269_v55  ;;  %v308_v13 = vmul.f32 0.25, %v276_v7 }
 0x16b   :  { %v454_v43 = vadd.f32 %v430_v25, %v394_v41  ;;  %v319_v15 = vadd.f32 1e-05, %v311_v3 }
 0x16c   :  { %v473_v42 = vmul.f32 1.442695, %v461_v36  ;;  %v315_v10 = vadd.f32 1e-05, %v307_v62  ;;  %v316_v8 = vadd.f32 1e-05, %v308_v13 }
 0x16d   :  { %v462_v49 = vsub.f32 0.0, %v454_v43 }
 0x16e   :  { %549 = vpow2.f32 %v473_v42 }
 0x16f   :  { %v546_v45 = vpop.eup %545  ;;  %v475_v51 = vmul.f32 1.442695, %v462_v49 }
 0x170   :  { %v481_v48 = vadd.f32 1.0, %v546_v45 }
 0x172   :  { %551 = vrcp.f32 %v481_v48 }
 0x173   :  { %553 = vpow2.f32 %v475_v51  ;;  %v548_v2 = vpop.eup %547 }
 0x174   :  { %v482_v58 = vadd.f32 1.0, %v548_v2 }
 0x176   :  { %555 = vrcp.f32 %v482_v58 }
 0x178   :  { %v550_v60 = vpop.eup %549 }
 0x179   :  { %v485_v61 = vadd.f32 1.0, %v550_v60 }
 0x17b   :  { %557 = vrcp.f32 %v485_v61 }
 0x17c   :  { %v552_v5 = vpop.eup %551 }
 0x17d   :  { %v505_v6 = vmul.f32 %v552_v5, %v449_v11  ;;  %v554_v9 = vpop.eup %553 }
 0x17e   :  { %v486_v12 = vadd.f32 1.0, %v554_v9 }
 0x17f   :  { %513 = vst [vmem:[%s834_s3] sm:$0xff] %v505_v6 }
 0x180   :  { %559 = vrcp.f32 %v486_v12  ;;  %v556_v16 = vpop.eup %555 }
 0x181   :  { %561 = vrsqrt.f32 %v315_v10  ;;  %v506_v63 = vmul.f32 %v556_v16, %v450_v14 }
 0x182   :  { %563 = vrsqrt.f32 %v319_v15 }
 0x183   :  { %514 = vst [vmem:[%s834_s3 + $0x8] sm:$0xff] %v506_v63  ;;  %565 = vrsqrt.f32 %v316_v8 }
 0x185   :  { %v558_v17 = vpop.eup %557 }
 0x186   :  { %v509_v11 = vmul.f32 %v558_v17, %v453_v31 }
 0x188   :  { %517 = vst [vmem:[%s834_s3 + $0x20] sm:$0xff] %v509_v11 }
 0x18a   :  { %v560_v39 = vpop.eup %559 }
 0x18b   :  { %v562_v18 = vpop.eup %561  ;;  %v510_v19 = vmul.f32 %v560_v39, %v454_v43 }
 0x18c   :  { %v564_v23 = vpop.eup %563  ;;  %v331_v25 = vmul.f32 %v562_v18, %v698_v40  ;;  %v384_v40 = vrot.slane %v781_v52, %v783_v56 }
 0x18d   :  { %518 = vst [vmem:[%s834_s3 + $0x28] sm:$0xff] %v510_v19  ;;  %v240_v24 = vpop.xlane.xlu1 %239  ;;  %v335_v26 = vmul.f32 %v564_v23, %v733_v20  ;;  %v566_v14 = vpop.eup %565 }
 0x18e   :  { %v248_v27 = vmul.f32 0.00390625, %v240_v24  ;;  %v391_v21 = vmul.f32 %v377_v28, %v331_v25  ;;  %v332_v32 = vmul.f32 %v566_v14, %v710_v57 }
 0x18f   :  { %v395_v31 = vmul.f32 %v377_v28, %v335_v26 }
 0x190   :  { %v298_v29 = vsel %vm46_vm0, %v248_v27, 0.0  ;;  %v392_v38 = vmul.f32 %v384_v40, %v332_v32 }
 0x191   :  { %v299_v30 = vrot.slane %v298_v29, 4  ;;  %v412_v54 = vpop.permute.xlu1 %411 }
 0x192   :  { %v437_v33 = vrot.slane %v412_v54, %v783_v56 }
 0x193   :  { %v300_v34 = vadd.f32 %v299_v30, %v298_v29 }
 0x194   :  { %v451_v20 = vadd.f32 %v437_v33, %v391_v21  ;;  %v455_v35 = vadd.f32 %v437_v33, %v395_v31 }
 0x195   :  { %v301_v36 = vrot.slane %v300_v34, 2  ;;  %v416_v37 = vpop.permute.xlu1 %415 }
 0x196   :  { %v459_v44 = vsub.f32 0.0, %v451_v20  ;;  %v463_v41 = vsub.f32 0.0, %v455_v35  ;;  %v444_v42 = vrot.slane %v416_v37, %v783_v56 }
 0x197   :  { %v302_v4 = vadd.f32 %v301_v36, %v300_v34 }
 0x198   :  { %v469_v43 = vmul.f32 1.442695, %v459_v44  ;;  %v477_v45 = vmul.f32 1.442695, %v463_v41  ;;  %v452_v46 = vadd.f32 %v444_v42, %v392_v38 }
 0x199   :  { %v303_v57 = vrot.slane %v302_v4, 1 }
 0x19a   :  { %567 = vpow2.f32 %v469_v43  ;;  %v460_v47 = vsub.f32 0.0, %v452_v46 }
 0x19b   :  { %v304_v48 = vadd.f32 %v303_v57, %v302_v4  ;;  %569 = vpow2.f32 %v477_v45 }
 0x19c   :  { %v471_v49 = vmul.f32 1.442695, %v460_v47 }
 0x19d   :  { %v312_v52 = vmul.f32 0.25, %v304_v48 }
 0x19e   :  { %571 = vpow2.f32 %v471_v49 }
 0x19f   :  { %v320_v50 = vadd.f32 1e-05, %v312_v52 }
 0x1a1   :  { %573 = vrsqrt.f32 %v320_v50 }
 0x1a4   :  { %v568_v51 = vpop.eup %567 }
 0x1a5   :  { %v570_v53 = vpop.eup %569  ;;  %v483_v0 = vadd.f32 1.0, %v568_v51 }
 0x1a6   :  { %v487_v2 = vadd.f32 1.0, %v570_v53 }
 0x1a7   :  { %575 = vrcp.f32 %v483_v0 }
 0x1a8   :  { %v572_v56 = vpop.eup %571  ;;  %577 = vrcp.f32 %v487_v2 }
 0x1a9   :  { %v484_v55 = vadd.f32 1.0, %v572_v56 }
 0x1ab   :  { %v574_v58 = vpop.eup %573  ;;  %579 = vrcp.f32 %v484_v55 }
 0x1ac   :  { %v336_v22 = vmul.f32 %v574_v58, %v763_v1 }
 0x1ae   :  { %v396_v59 = vmul.f32 %v384_v40, %v336_v22 }
 0x1b0   :  { %v456_v60 = vadd.f32 %v444_v42, %v396_v59 }
 0x1b1   :  { %v576_v61 = vpop.eup %575 }
 0x1b2   :  { %v578_v62 = vpop.eup %577  ;;  %v507_v7 = vmul.f32 %v576_v61, %v451_v20  ;;  %v464_v3 = vsub.f32 0.0, %v456_v60 }
 0x1b3   :  { %v511_v5 = vmul.f32 %v578_v62, %v455_v35 }
 0x1b4   :  { %515 = vst [vmem:[%s834_s3 + $0x10] sm:$0xff] %v507_v7  ;;  %v479_v6 = vmul.f32 1.442695, %v464_v3 }
 0x1b5   :  { %v580_v9 = vpop.eup %579  ;;  %519 = vst [vmem:[%s834_s3 + $0x30] sm:$0xff] %v511_v5 }
 0x1b6   :  { %581 = vpow2.f32 %v479_v6  ;;  %v508_v10 = vmul.f32 %v580_v9, %v452_v46 }
 0x1b8   :  { %516 = vst [vmem:[%s834_s3 + $0x18] sm:$0xff] %v508_v10 }
 0x1c0   :  { %v582_v1 = vpop.eup %581 }
 0x1c1   :  { %v488_v13 = vadd.f32 1.0, %v582_v1 }
 0x1c3   :  { %583 = vrcp.f32 %v488_v13 }
 0x1cd   :  { %v584_v15 = vpop.eup %583 }
 0x1ce   :  { %v512_v12 = vmul.f32 %v584_v15, %v456_v60 }
 0x1d0   :  { %520 = vst [vmem:[%s834_s3 + $0x38] sm:$0xff] %v512_v12 }

// kernel: _lambda_.10
= control target key start
LH: loop header
LB: loop body
LE: loop exit
PB: predicated region body
PF: predicated region fallthrough
CT: control target
= control target key end

     0   :  { %vm86_vm0 = vcmask 64512   ;;  %vm664_vm1 = vcmask 130048   ;;  %s1567_s1 = inlined_call_operand.vmem [shape: f32[8,16], index: 1, kind: input, shape index: {}]   ;;  %s1568_s0 = inlined_call_operand.vmem [shape: f32[512,8], index: 0, kind: input, shape index: {}]   ;;  %s1569_s2 = inlined_call_operand.vmem [shape: f32[1,16], index: 2, kind: input, shape index: {}]   ;;  %s1570_s3 = inlined_call_operand.vmem [shape: f32[512,16], index: 3, kind: output, shape index: {}]  }
   0x1   :  { %v78_v0 = vld [vmem:[%s1567_s1] sm:$0xff]  ;;  %v15_v3 = vld [vmem:[%s1568_s0 + $0x8] sm:$0xff]  ;;  %v16_v5 = vld [vmem:[%s1568_s0 + $0x10] sm:$0xff] }
   0x2   :  { %v14_v1 = vld [vmem:[%s1568_s0] sm:$0xff]  ;;  %863 = vmatprep.subr.mxu0 %v78_v0  ;;  %961 = vmatprep.subr.mxu1 %v78_v0  ;;  %v47_v4 = vld [vmem:[%s1568_s0 + $0x108] sm:$0xff]  ;;  %v48_v6 = vld [vmem:[%s1568_s0 + $0x110] sm:$0xff] }
   0x3   :  { %v46_v2 = vld [vmem:[%s1568_s0 + $0x100] sm:$0xff]  ;;  %864 = vmatpush3.msra.mxu0 %v78_v0  ;;  %962 = vmatpush3.msra.mxu1 %v78_v0  ;;  %v17_v7 = vld [vmem:[%s1568_s0 + $0x18] sm:$0xff]  ;;  %v19_v11 = vld [vmem:[%s1568_s0 + $0x28] sm:$0xff] }
   0x4   :  { %865 = vmatprep.mubr.msk.f32.mxu0 %vm86_vm0, %v14_v1  ;;  %913 = vmatprep.mubr.msk.f32.mxu1 %vm86_vm0, %v46_v2  ;;  %v49_v8 = vld [vmem:[%s1568_s0 + $0x118] sm:$0xff]  ;;  %v18_v9 = vld [vmem:[%s1568_s0 + $0x20] sm:$0xff]  ;;  %v51_v12 = vld [vmem:[%s1568_s0 + $0x128] sm:$0xff] }
   0x5   :  { %866 = vmatmul.mubr.msk.f32.vlgmr.msra.gmra.mrb[0].mxu0 %vm86_vm0, %v15_v3  ;;  %914 = vmatmul.mubr.msk.f32.vlgmr.msra.gmra.mrb[0].mxu1 %vm86_vm0, %v47_v4  ;;  %v50_v10 = vld [vmem:[%s1568_s0 + $0x120] sm:$0xff]  ;;  %v20_v13 = vld [vmem:[%s1568_s0 + $0x30] sm:$0xff]  ;;  %v21_v15 = vld [vmem:[%s1568_s0 + $0x38] sm:$0xff] }
   0x6   :  { %868 = vmatprep.mubr.msk.f32.mxu0 %vm86_vm0, %v16_v5  ;;  %916 = vmatprep.mubr.msk.f32.mxu1 %vm86_vm0, %v48_v6  ;;  %v52_v14 = vld [vmem:[%s1568_s0 + $0x130] sm:$0xff]  ;;  %v53_v16 = vld [vmem:[%s1568_s0 + $0x138] sm:$0xff]  ;;  %v22_v17 = vld [vmem:[%s1568_s0 + $0x40] sm:$0xff] }
   0x7   :  { %v54_v18 = vld [vmem:[%s1568_s0 + $0x140] sm:$0xff]  ;;  %v23_v19 = vld [vmem:[%s1568_s0 + $0x48] sm:$0xff]  ;;  %v24_v21 = vld [vmem:[%s1568_s0 + $0x50] sm:$0xff] }
   0x8   :  { %v55_v20 = vld [vmem:[%s1568_s0 + $0x148] sm:$0xff]  ;;  %v56_v22 = vld [vmem:[%s1568_s0 + $0x150] sm:$0xff]  ;;  %v25_v23 = vld [vmem:[%s1568_s0 + $0x58] sm:$0xff] }
   0x9   :  { %869 = vmatmul.mubr.msk.f32.gmra.mrb[2].mxu0 %vm86_vm0, %v17_v7  ;;  %917 = vmatmul.mubr.msk.f32.gmra.mrb[2].mxu1 %vm86_vm0, %v49_v8  ;;  %v57_v24 = vld [vmem:[%s1568_s0 + $0x158] sm:$0xff]  ;;  %v26_v25 = vld [vmem:[%s1568_s0 + $0x60] sm:$0xff]  ;;  %v27_v27 = vld [vmem:[%s1568_s0 + $0x68] sm:$0xff] }
   0xa   :  { %871 = vmatprep.mubr.msk.f32.mxu0 %vm86_vm0, %v18_v9  ;;  %919 = vmatprep.mubr.msk.f32.mxu1 %vm86_vm0, %v50_v10  ;;  %v58_v26 = vld [vmem:[%s1568_s0 + $0x160] sm:$0xff]  ;;  %v59_v28 = vld [vmem:[%s1568_s0 + $0x168] sm:$0xff]  ;;  %v28_v29 = vld [vmem:[%s1568_s0 + $0x70] sm:$0xff] }
   0xb   :  { %v60_v30 = vld [vmem:[%s1568_s0 + $0x170] sm:$0xff]  ;;  %v29_v31 = vld [vmem:[%s1568_s0 + $0x78] sm:$0xff]  ;;  %v30_v33 = vld [vmem:[%s1568_s0 + $0x80] sm:$0xff] }
   0xc   :  { %v61_v32 = vld [vmem:[%s1568_s0 + $0x178] sm:$0xff]  ;;  %v62_v34 = vld [vmem:[%s1568_s0 + $0x180] sm:$0xff]  ;;  %v31_v35 = vld [vmem:[%s1568_s0 + $0x88] sm:$0xff] }
   0xd   :  { %872 = vmatmul.mubr.msk.f32.gmra.mrb[4].mxu0 %vm86_vm0, %v19_v11  ;;  %920 = vmatmul.mubr.msk.f32.gmra.mrb[4].mxu1 %vm86_vm0, %v51_v12  ;;  %v63_v36 = vld [vmem:[%s1568_s0 + $0x188] sm:$0xff]  ;;  %v32_v37 = vld [vmem:[%s1568_s0 + $0x90] sm:$0xff]  ;;  %v33_v39 = vld [vmem:[%s1568_s0 + $0x98] sm:$0xff] }
   0xe   :  { %874 = vmatprep.mubr.msk.f32.mxu0 %vm86_vm0, %v20_v13  ;;  %922 = vmatprep.mubr.msk.f32.mxu1 %vm86_vm0, %v52_v14  ;;  %v64_v38 = vld [vmem:[%s1568_s0 + $0x190] sm:$0xff]  ;;  %v65_v40 = vld [vmem:[%s1568_s0 + $0x198] sm:$0xff]  ;;  %v34_v41 = vld [vmem:[%s1568_s0 + $0xa0] sm:$0xff] }
   0xf   :  { %v66_v42 = vld [vmem:[%s1568_s0 + $0x1a0] sm:$0xff]  ;;  %v35_v43 = vld [vmem:[%s1568_s0 + $0xa8] sm:$0xff]  ;;  %v36_v45 = vld [vmem:[%s1568_s0 + $0xb0] sm:$0xff] }
  0x10   :  { %v67_v44 = vld [vmem:[%s1568_s0 + $0x1a8] sm:$0xff]  ;;  %v68_v46 = vld [vmem:[%s1568_s0 + $0x1b0] sm:$0xff]  ;;  %v37_v47 = vld [vmem:[%s1568_s0 + $0xb8] sm:$0xff] }
  0x11   :  { %875 = vmatmul.mubr.msk.f32.gmra.mrb[6].mxu0 %vm86_vm0, %v21_v15  ;;  %923 = vmatmul.mubr.msk.f32.gmra.mrb[6].mxu1 %vm86_vm0, %v53_v16  ;;  %v69_v48 = vld [vmem:[%s1568_s0 + $0x1b8] sm:$0xff]  ;;  %v38_v49 = vld [vmem:[%s1568_s0 + $0xc0] sm:$0xff]  ;;  %v39_v51 = vld [vmem:[%s1568_s0 + $0xc8] sm:$0xff] }
  0x12   :  { %877 = vmatprep.mubr.msk.f32.mxu0 %vm86_vm0, %v22_v17  ;;  %925 = vmatprep.mubr.msk.f32.mxu1 %vm86_vm0, %v54_v18  ;;  %v70_v50 = vld [vmem:[%s1568_s0 + $0x1c0] sm:$0xff]  ;;  %v71_v52 = vld [vmem:[%s1568_s0 + $0x1c8] sm:$0xff]  ;;  %v40_v53 = vld [vmem:[%s1568_s0 + $0xd0] sm:$0xff] }
  0x13   :  { %v72_v54 = vld [vmem:[%s1568_s0 + $0x1d0] sm:$0xff]  ;;  %v41_v55 = vld [vmem:[%s1568_s0 + $0xd8] sm:$0xff]  ;;  %v42_v57 = vld [vmem:[%s1568_s0 + $0xe0] sm:$0xff] }
  0x14   :  { %v73_v56 = vld [vmem:[%s1568_s0 + $0x1d8] sm:$0xff]  ;;  %v74_v58 = vld [vmem:[%s1568_s0 + $0x1e0] sm:$0xff]  ;;  %v43_v59 = vld [vmem:[%s1568_s0 + $0xe8] sm:$0xff] }
  0x15   :  { %878 = vmatmul.mubr.msk.f32.gmra.mrb[8].mxu0 %vm86_vm0, %v23_v19  ;;  %926 = vmatmul.mubr.msk.f32.gmra.mrb[8].mxu1 %vm86_vm0, %v55_v20  ;;  %v75_v60 = vld [vmem:[%s1568_s0 + $0x1e8] sm:$0xff]  ;;  %v44_v61 = vld [vmem:[%s1568_s0 + $0xf0] sm:$0xff]  ;;  %v45_v63 = vld [vmem:[%s1568_s0 + $0xf8] sm:$0xff] }
  0x16   :  { %880 = vmatprep.mubr.msk.f32.mxu0 %vm86_vm0, %v24_v21  ;;  %928 = vmatprep.mubr.msk.f32.mxu1 %vm86_vm0, %v56_v22  ;;  %v76_v62 = vld [vmem:[%s1568_s0 + $0x1f0] sm:$0xff]  ;;  %v77_v0 = vld [vmem:[%s1568_s0 + $0x1f8] sm:$0xff]  ;;  %v1245_v1 = vld [vmem:[%s1569_s2] ss:$0 sm:$0xff] }
  0x19   :  { %881 = vmatmul.mubr.msk.f32.gmra.mrb[10].mxu0 %vm86_vm0, %v25_v23  ;;  %929 = vmatmul.mubr.msk.f32.gmra.mrb[10].mxu1 %vm86_vm0, %v57_v24 }
  0x1a   :  { %883 = vmatprep.mubr.msk.f32.mxu0 %vm86_vm0, %v26_v25  ;;  %931 = vmatprep.mubr.msk.f32.mxu1 %vm86_vm0, %v58_v26 }
  0x1d   :  { %884 = vmatmul.mubr.msk.f32.gmra.mrb[12].mxu0 %vm86_vm0, %v27_v27  ;;  %932 = vmatmul.mubr.msk.f32.gmra.mrb[12].mxu1 %vm86_vm0, %v59_v28 }
  0x1e   :  { %886 = vmatprep.mubr.msk.f32.mxu0 %vm86_vm0, %v28_v29  ;;  %934 = vmatprep.mubr.msk.f32.mxu1 %vm86_vm0, %v60_v30 }
  0x21   :  { %887 = vmatmul.mubr.msk.f32.gmra.mrb[14].mxu0 %vm86_vm0, %v29_v31  ;;  %935 = vmatmul.mubr.msk.f32.gmra.mrb[14].mxu1 %vm86_vm0, %v61_v32 }
  0x22   :  { %889 = vmatprep.mubr.msk.f32.mxu0 %vm86_vm0, %v30_v33  ;;  %937 = vmatprep.mubr.msk.f32.mxu1 %vm86_vm0, %v62_v34 }
  0x25   :  { %890 = vmatmul.mubr.msk.f32.gmra.mrb[16].mxu0 %vm86_vm0, %v31_v35  ;;  %938 = vmatmul.mubr.msk.f32.gmra.mrb[16].mxu1 %vm86_vm0, %v63_v36 }
  0x26   :  { %892 = vmatprep.mubr.msk.f32.mxu0 %vm86_vm0, %v32_v37  ;;  %940 = vmatprep.mubr.msk.f32.mxu1 %vm86_vm0, %v64_v38 }
  0x29   :  { %893 = vmatmul.mubr.msk.f32.gmra.mrb[18].mxu0 %vm86_vm0, %v33_v39  ;;  %941 = vmatmul.mubr.msk.f32.gmra.mrb[18].mxu1 %vm86_vm0, %v65_v40 }
  0x2a   :  { %895 = vmatprep.mubr.msk.f32.mxu0 %vm86_vm0, %v34_v41  ;;  %943 = vmatprep.mubr.msk.f32.mxu1 %vm86_vm0, %v66_v42 }
  0x2d   :  { %896 = vmatmul.mubr.msk.f32.gmra.mrb[20].mxu0 %vm86_vm0, %v35_v43  ;;  %944 = vmatmul.mubr.msk.f32.gmra.mrb[20].mxu1 %vm86_vm0, %v67_v44 }
  0x2e   :  { %898 = vmatprep.mubr.msk.f32.mxu0 %vm86_vm0, %v36_v45  ;;  %946 = vmatprep.mubr.msk.f32.mxu1 %vm86_vm0, %v68_v46 }
  0x31   :  { %899 = vmatmul.mubr.msk.f32.gmra.mrb[22].mxu0 %vm86_vm0, %v37_v47  ;;  %947 = vmatmul.mubr.msk.f32.gmra.mrb[22].mxu1 %vm86_vm0, %v69_v48 }
  0x32   :  { %901 = vmatprep.mubr.msk.f32.mxu0 %vm86_vm0, %v38_v49  ;;  %949 = vmatprep.mubr.msk.f32.mxu1 %vm86_vm0, %v70_v50 }
  0x35   :  { %902 = vmatmul.mubr.msk.f32.gmra.mrb[24].mxu0 %vm86_vm0, %v39_v51  ;;  %950 = vmatmul.mubr.msk.f32.gmra.mrb[24].mxu1 %vm86_vm0, %v71_v52 }
  0x36   :  { %904 = vmatprep.mubr.msk.f32.mxu0 %vm86_vm0, %v40_v53  ;;  %952 = vmatprep.mubr.msk.f32.mxu1 %vm86_vm0, %v72_v54 }
  0x39   :  { %905 = vmatmul.mubr.msk.f32.gmra.mrb[26].mxu0 %vm86_vm0, %v41_v55  ;;  %953 = vmatmul.mubr.msk.f32.gmra.mrb[26].mxu1 %vm86_vm0, %v73_v56 }
  0x3a   :  { %907 = vmatprep.mubr.msk.f32.mxu0 %vm86_vm0, %v42_v57  ;;  %955 = vmatprep.mubr.msk.f32.mxu1 %vm86_vm0, %v74_v58 }
  0x3d   :  { %908 = vmatmul.mubr.msk.f32.gmra.mrb[28].mxu0 %vm86_vm0, %v43_v59  ;;  %956 = vmatmul.mubr.msk.f32.gmra.mrb[28].mxu1 %vm86_vm0, %v75_v60 }
  0x3e   :  { %910 = vmatprep.mubr.msk.f32.mxu0 %vm86_vm0, %v44_v61  ;;  %958 = vmatprep.mubr.msk.f32.mxu1 %vm86_vm0, %v76_v62 }
  0x41   :  { %911 = vmatmul.mubr.msk.f32.gmra.mrb[30].mxu0 %vm86_vm0, %v45_v63  ;;  %959 = vmatmul.mubr.msk.f32.gmra.mrb[30].mxu1 %vm86_vm0, %v77_v0 }
  0xd8   :  { %v867_v2 = vpop.f32.mrb[0].mxu0  ;;  %v915_v3 = vpop.f32.mrb[0].mxu1 }
  0xd9   :  { %v351_v4 = vadd.f32 %v867_v2, %v1245_v1  ;;  %v511_v5 = vadd.f32 %v915_v3, %v1245_v1  ;;  %v345_v6 = vpop.f32.mrb[1].mxu0  ;;  %v505_v7 = vpop.f32.mrb[1].mxu1 }
  0xda   :  { %v346_v8 = vadd.f32 %v1245_v1, %v345_v6  ;;  %v506_v9 = vadd.f32 %v1245_v1, %v505_v7 }
  0xdb   :  { %666 = vst.msk [vmem:[%s1570_s3 + $0x8] sm:$0xff] %vm664_vm1, %v351_v4  ;;  %698 = vst.msk [vmem:[%s1570_s3 + $0x108] sm:$0xff] %vm664_vm1, %v511_v5 }
  0xdc   :  { %665 = vst.msk [vmem:[%s1570_s3] sm:$0xff] %vm664_vm1, %v346_v8  ;;  %697 = vst.msk [vmem:[%s1570_s3 + $0x100] sm:$0xff] %vm664_vm1, %v506_v9  ;;  %v870_v10 = vpop.f32.mrb[2].mxu0  ;;  %v918_v11 = vpop.f32.mrb[2].mxu1 }
  0xdd   :  { %v361_v12 = vadd.f32 %v870_v10, %v1245_v1  ;;  %v521_v13 = vadd.f32 %v918_v11, %v1245_v1  ;;  %v355_v14 = vpop.f32.mrb[3].mxu0  ;;  %v515_v15 = vpop.f32.mrb[3].mxu1 }
  0xde   :  { %v356_v16 = vadd.f32 %v1245_v1, %v355_v14  ;;  %v516_v17 = vadd.f32 %v1245_v1, %v515_v15 }
  0xdf   :  { %668 = vst.msk [vmem:[%s1570_s3 + $0x18] sm:$0xff] %vm664_vm1, %v361_v12  ;;  %700 = vst.msk [vmem:[%s1570_s3 + $0x118] sm:$0xff] %vm664_vm1, %v521_v13 }
  0xe0   :  { %667 = vst.msk [vmem:[%s1570_s3 + $0x10] sm:$0xff] %vm664_vm1, %v356_v16  ;;  %699 = vst.msk [vmem:[%s1570_s3 + $0x110] sm:$0xff] %vm664_vm1, %v516_v17  ;;  %v873_v18 = vpop.f32.mrb[4].mxu0  ;;  %v921_v19 = vpop.f32.mrb[4].mxu1 }
  0xe1   :  { %v371_v20 = vadd.f32 %v873_v18, %v1245_v1  ;;  %v531_v21 = vadd.f32 %v921_v19, %v1245_v1  ;;  %v365_v22 = vpop.f32.mrb[5].mxu0  ;;  %v525_v23 = vpop.f32.mrb[5].mxu1 }
  0xe2   :  { %v366_v24 = vadd.f32 %v1245_v1, %v365_v22  ;;  %v526_v25 = vadd.f32 %v1245_v1, %v525_v23 }
  0xe3   :  { %670 = vst.msk [vmem:[%s1570_s3 + $0x28] sm:$0xff] %vm664_vm1, %v371_v20  ;;  %702 = vst.msk [vmem:[%s1570_s3 + $0x128] sm:$0xff] %vm664_vm1, %v531_v21 }
  0xe4   :  { %669 = vst.msk [vmem:[%s1570_s3 + $0x20] sm:$0xff] %vm664_vm1, %v366_v24  ;;  %701 = vst.msk [vmem:[%s1570_s3 + $0x120] sm:$0xff] %vm664_vm1, %v526_v25  ;;  %v876_v26 = vpop.f32.mrb[6].mxu0  ;;  %v924_v27 = vpop.f32.mrb[6].mxu1 }
  0xe5   :  { %v381_v28 = vadd.f32 %v876_v26, %v1245_v1  ;;  %v541_v29 = vadd.f32 %v924_v27, %v1245_v1  ;;  %v375_v30 = vpop.f32.mrb[7].mxu0  ;;  %v535_v31 = vpop.f32.mrb[7].mxu1 }
  0xe6   :  { %v376_v32 = vadd.f32 %v1245_v1, %v375_v30  ;;  %v536_v33 = vadd.f32 %v1245_v1, %v535_v31 }
  0xe7   :  { %672 = vst.msk [vmem:[%s1570_s3 + $0x38] sm:$0xff] %vm664_vm1, %v381_v28  ;;  %704 = vst.msk [vmem:[%s1570_s3 + $0x138] sm:$0xff] %vm664_vm1, %v541_v29 }
  0xe8   :  { %671 = vst.msk [vmem:[%s1570_s3 + $0x30] sm:$0xff] %vm664_vm1, %v376_v32  ;;  %703 = vst.msk [vmem:[%s1570_s3 + $0x130] sm:$0xff] %vm664_vm1, %v536_v33  ;;  %v879_v34 = vpop.f32.mrb[8].mxu0  ;;  %v927_v35 = vpop.f32.mrb[8].mxu1 }
  0xe9   :  { %v391_v36 = vadd.f32 %v879_v34, %v1245_v1  ;;  %v551_v37 = vadd.f32 %v927_v35, %v1245_v1  ;;  %v385_v38 = vpop.f32.mrb[9].mxu0  ;;  %v545_v39 = vpop.f32.mrb[9].mxu1 }
  0xea   :  { %v386_v40 = vadd.f32 %v1245_v1, %v385_v38  ;;  %v546_v41 = vadd.f32 %v1245_v1, %v545_v39 }
  0xeb   :  { %674 = vst.msk [vmem:[%s1570_s3 + $0x48] sm:$0xff] %vm664_vm1, %v391_v36  ;;  %706 = vst.msk [vmem:[%s1570_s3 + $0x148] sm:$0xff] %vm664_vm1, %v551_v37 }
  0xec   :  { %673 = vst.msk [vmem:[%s1570_s3 + $0x40] sm:$0xff] %vm664_vm1, %v386_v40  ;;  %705 = vst.msk [vmem:[%s1570_s3 + $0x140] sm:$0xff] %vm664_vm1, %v546_v41  ;;  %v882_v42 = vpop.f32.mrb[10].mxu0  ;;  %v930_v43 = vpop.f32.mrb[10].mxu1 }
  0xed   :  { %v401_v44 = vadd.f32 %v882_v42, %v1245_v1  ;;  %v561_v45 = vadd.f32 %v930_v43, %v1245_v1  ;;  %v395_v46 = vpop.f32.mrb[11].mxu0  ;;  %v555_v47 = vpop.f32.mrb[11].mxu1 }
  0xee   :  { %v396_v48 = vadd.f32 %v1245_v1, %v395_v46  ;;  %v556_v49 = vadd.f32 %v1245_v1, %v555_v47 }
  0xef   :  { %676 = vst.msk [vmem:[%s1570_s3 + $0x58] sm:$0xff] %vm664_vm1, %v401_v44  ;;  %708 = vst.msk [vmem:[%s1570_s3 + $0x158] sm:$0xff] %vm664_vm1, %v561_v45 }
  0xf0   :  { %675 = vst.msk [vmem:[%s1570_s3 + $0x50] sm:$0xff] %vm664_vm1, %v396_v48  ;;  %707 = vst.msk [vmem:[%s1570_s3 + $0x150] sm:$0xff] %vm664_vm1, %v556_v49  ;;  %v885_v50 = vpop.f32.mrb[12].mxu0  ;;  %v933_v51 = vpop.f32.mrb[12].mxu1 }
  0xf1   :  { %v411_v52 = vadd.f32 %v885_v50, %v1245_v1  ;;  %v571_v53 = vadd.f32 %v933_v51, %v1245_v1  ;;  %v405_v54 = vpop.f32.mrb[13].mxu0  ;;  %v565_v55 = vpop.f32.mrb[13].mxu1 }
  0xf2   :  { %v406_v56 = vadd.f32 %v1245_v1, %v405_v54  ;;  %v566_v57 = vadd.f32 %v1245_v1, %v565_v55 }
  0xf3   :  { %678 = vst.msk [vmem:[%s1570_s3 + $0x68] sm:$0xff] %vm664_vm1, %v411_v52  ;;  %710 = vst.msk [vmem:[%s1570_s3 + $0x168] sm:$0xff] %vm664_vm1, %v571_v53 }
  0xf4   :  { %677 = vst.msk [vmem:[%s1570_s3 + $0x60] sm:$0xff] %vm664_vm1, %v406_v56  ;;  %709 = vst.msk [vmem:[%s1570_s3 + $0x160] sm:$0xff] %vm664_vm1, %v566_v57  ;;  %v888_v58 = vpop.f32.mrb[14].mxu0  ;;  %v936_v59 = vpop.f32.mrb[14].mxu1 }
  0xf5   :  { %v421_v60 = vadd.f32 %v888_v58, %v1245_v1  ;;  %v581_v61 = vadd.f32 %v936_v59, %v1245_v1  ;;  %v415_v62 = vpop.f32.mrb[15].mxu0  ;;  %v575_v63 = vpop.f32.mrb[15].mxu1 }
  0xf6   :  { %v416_v0 = vadd.f32 %v1245_v1, %v415_v62  ;;  %v576_v2 = vadd.f32 %v1245_v1, %v575_v63 }
  0xf7   :  { %680 = vst.msk [vmem:[%s1570_s3 + $0x78] sm:$0xff] %vm664_vm1, %v421_v60  ;;  %712 = vst.msk [vmem:[%s1570_s3 + $0x178] sm:$0xff] %vm664_vm1, %v581_v61 }
  0xf8   :  { %679 = vst.msk [vmem:[%s1570_s3 + $0x70] sm:$0xff] %vm664_vm1, %v416_v0  ;;  %711 = vst.msk [vmem:[%s1570_s3 + $0x170] sm:$0xff] %vm664_vm1, %v576_v2  ;;  %v891_v3 = vpop.f32.mrb[16].mxu0  ;;  %v939_v4 = vpop.f32.mrb[16].mxu1 }
  0xf9   :  { %v431_v5 = vadd.f32 %v891_v3, %v1245_v1  ;;  %v591_v6 = vadd.f32 %v939_v4, %v1245_v1  ;;  %v425_v7 = vpop.f32.mrb[17].mxu0  ;;  %v585_v8 = vpop.f32.mrb[17].mxu1 }
  0xfa   :  { %v426_v9 = vadd.f32 %v1245_v1, %v425_v7  ;;  %v586_v10 = vadd.f32 %v1245_v1, %v585_v8 }
  0xfb   :  { %682 = vst.msk [vmem:[%s1570_s3 + $0x88] sm:$0xff] %vm664_vm1, %v431_v5  ;;  %714 = vst.msk [vmem:[%s1570_s3 + $0x188] sm:$0xff] %vm664_vm1, %v591_v6 }
  0xfc   :  { %681 = vst.msk [vmem:[%s1570_s3 + $0x80] sm:$0xff] %vm664_vm1, %v426_v9  ;;  %713 = vst.msk [vmem:[%s1570_s3 + $0x180] sm:$0xff] %vm664_vm1, %v586_v10  ;;  %v894_v11 = vpop.f32.mrb[18].mxu0  ;;  %v942_v12 = vpop.f32.mrb[18].mxu1 }
  0xfd   :  { %v441_v13 = vadd.f32 %v894_v11, %v1245_v1  ;;  %v601_v14 = vadd.f32 %v942_v12, %v1245_v1  ;;  %v435_v15 = vpop.f32.mrb[19].mxu0  ;;  %v595_v16 = vpop.f32.mrb[19].mxu1 }
  0xfe   :  { %v436_v17 = vadd.f32 %v1245_v1, %v435_v15  ;;  %v596_v18 = vadd.f32 %v1245_v1, %v595_v16 }
  0xff   :  { %684 = vst.msk [vmem:[%s1570_s3 + $0x98] sm:$0xff] %vm664_vm1, %v441_v13  ;;  %716 = vst.msk [vmem:[%s1570_s3 + $0x198] sm:$0xff] %vm664_vm1, %v601_v14 }
 0x100   :  { %683 = vst.msk [vmem:[%s1570_s3 + $0x90] sm:$0xff] %vm664_vm1, %v436_v17  ;;  %715 = vst.msk [vmem:[%s1570_s3 + $0x190] sm:$0xff] %vm664_vm1, %v596_v18  ;;  %v897_v19 = vpop.f32.mrb[20].mxu0  ;;  %v945_v20 = vpop.f32.mrb[20].mxu1 }
 0x101   :  { %v451_v21 = vadd.f32 %v897_v19, %v1245_v1  ;;  %v611_v22 = vadd.f32 %v945_v20, %v1245_v1  ;;  %v445_v23 = vpop.f32.mrb[21].mxu0  ;;  %v605_v24 = vpop.f32.mrb[21].mxu1 }
 0x102   :  { %v446_v25 = vadd.f32 %v1245_v1, %v445_v23  ;;  %v606_v26 = vadd.f32 %v1245_v1, %v605_v24 }
 0x103   :  { %686 = vst.msk [vmem:[%s1570_s3 + $0xa8] sm:$0xff] %vm664_vm1, %v451_v21  ;;  %718 = vst.msk [vmem:[%s1570_s3 + $0x1a8] sm:$0xff] %vm664_vm1, %v611_v22 }
 0x104   :  { %685 = vst.msk [vmem:[%s1570_s3 + $0xa0] sm:$0xff] %vm664_vm1, %v446_v25  ;;  %717 = vst.msk [vmem:[%s1570_s3 + $0x1a0] sm:$0xff] %vm664_vm1, %v606_v26  ;;  %v900_v27 = vpop.f32.mrb[22].mxu0  ;;  %v948_v28 = vpop.f32.mrb[22].mxu1 }
 0x105   :  { %v461_v29 = vadd.f32 %v900_v27, %v1245_v1  ;;  %v621_v30 = vadd.f32 %v948_v28, %v1245_v1  ;;  %v455_v31 = vpop.f32.mrb[23].mxu0  ;;  %v615_v32 = vpop.f32.mrb[23].mxu1 }
 0x106   :  { %v456_v33 = vadd.f32 %v1245_v1, %v455_v31  ;;  %v616_v34 = vadd.f32 %v1245_v1, %v615_v32 }
 0x107   :  { %688 = vst.msk [vmem:[%s1570_s3 + $0xb8] sm:$0xff] %vm664_vm1, %v461_v29  ;;  %720 = vst.msk [vmem:[%s1570_s3 + $0x1b8] sm:$0xff] %vm664_vm1, %v621_v30 }
 0x108   :  { %687 = vst.msk [vmem:[%s1570_s3 + $0xb0] sm:$0xff] %vm664_vm1, %v456_v33  ;;  %719 = vst.msk [vmem:[%s1570_s3 + $0x1b0] sm:$0xff] %vm664_vm1, %v616_v34  ;;  %v903_v35 = vpop.f32.mrb[24].mxu0  ;;  %v951_v36 = vpop.f32.mrb[24].mxu1 }
 0x109   :  { %v471_v37 = vadd.f32 %v903_v35, %v1245_v1  ;;  %v631_v38 = vadd.f32 %v951_v36, %v1245_v1  ;;  %v465_v39 = vpop.f32.mrb[25].mxu0  ;;  %v625_v40 = vpop.f32.mrb[25].mxu1 }
 0x10a   :  { %v466_v41 = vadd.f32 %v1245_v1, %v465_v39  ;;  %v626_v42 = vadd.f32 %v1245_v1, %v625_v40 }
 0x10b   :  { %690 = vst.msk [vmem:[%s1570_s3 + $0xc8] sm:$0xff] %vm664_vm1, %v471_v37  ;;  %722 = vst.msk [vmem:[%s1570_s3 + $0x1c8] sm:$0xff] %vm664_vm1, %v631_v38 }
 0x10c   :  { %689 = vst.msk [vmem:[%s1570_s3 + $0xc0] sm:$0xff] %vm664_vm1, %v466_v41  ;;  %721 = vst.msk [vmem:[%s1570_s3 + $0x1c0] sm:$0xff] %vm664_vm1, %v626_v42  ;;  %v906_v43 = vpop.f32.mrb[26].mxu0  ;;  %v954_v44 = vpop.f32.mrb[26].mxu1 }
 0x10d   :  { %v481_v45 = vadd.f32 %v906_v43, %v1245_v1  ;;  %v641_v46 = vadd.f32 %v954_v44, %v1245_v1  ;;  %v475_v47 = vpop.f32.mrb[27].mxu0  ;;  %v635_v48 = vpop.f32.mrb[27].mxu1 }
 0x10e   :  { %v476_v49 = vadd.f32 %v1245_v1, %v475_v47  ;;  %v636_v50 = vadd.f32 %v1245_v1, %v635_v48 }
 0x10f   :  { %692 = vst.msk [vmem:[%s1570_s3 + $0xd8] sm:$0xff] %vm664_vm1, %v481_v45  ;;  %724 = vst.msk [vmem:[%s1570_s3 + $0x1d8] sm:$0xff] %vm664_vm1, %v641_v46 }
 0x110   :  { %691 = vst.msk [vmem:[%s1570_s3 + $0xd0] sm:$0xff] %vm664_vm1, %v476_v49  ;;  %723 = vst.msk [vmem:[%s1570_s3 + $0x1d0] sm:$0xff] %vm664_vm1, %v636_v50  ;;  %v909_v51 = vpop.f32.mrb[28].mxu0  ;;  %v957_v52 = vpop.f32.mrb[28].mxu1 }
 0x111   :  { %v491_v53 = vadd.f32 %v909_v51, %v1245_v1  ;;  %v651_v54 = vadd.f32 %v957_v52, %v1245_v1  ;;  %v485_v55 = vpop.f32.mrb[29].mxu0  ;;  %v645_v56 = vpop.f32.mrb[29].mxu1 }
 0x112   :  { %v486_v57 = vadd.f32 %v1245_v1, %v485_v55  ;;  %v646_v58 = vadd.f32 %v1245_v1, %v645_v56 }
 0x113   :  { %694 = vst.msk [vmem:[%s1570_s3 + $0xe8] sm:$0xff] %vm664_vm1, %v491_v53  ;;  %726 = vst.msk [vmem:[%s1570_s3 + $0x1e8] sm:$0xff] %vm664_vm1, %v651_v54 }
 0x114   :  { %693 = vst.msk [vmem:[%s1570_s3 + $0xe0] sm:$0xff] %vm664_vm1, %v486_v57  ;;  %725 = vst.msk [vmem:[%s1570_s3 + $0x1e0] sm:$0xff] %vm664_vm1, %v646_v58  ;;  %v912_v59 = vpop.f32.mrb[30].mxu0  ;;  %v960_v60 = vpop.f32.mrb[30].mxu1 }
 0x115   :  { %v501_v61 = vadd.f32 %v912_v59, %v1245_v1  ;;  %v661_v62 = vadd.f32 %v960_v60, %v1245_v1  ;;  %v495_v63 = vpop.f32.mrb[31].mxu0  ;;  %v655_v0 = vpop.f32.mrb[31].mxu1 }
 0x116   :  { %v496_v2 = vadd.f32 %v1245_v1, %v495_v63  ;;  %v656_v3 = vadd.f32 %v1245_v1, %v655_v0 }
 0x117   :  { %696 = vst.msk [vmem:[%s1570_s3 + $0xf8] sm:$0xff] %vm664_vm1, %v501_v61  ;;  %728 = vst.msk [vmem:[%s1570_s3 + $0x1f8] sm:$0xff] %vm664_vm1, %v661_v62 }
 0x118   :  { %695 = vst.msk [vmem:[%s1570_s3 + $0xf0] sm:$0xff] %vm664_vm1, %v496_v2  ;;  %727 = vst.msk [vmem:[%s1570_s3 + $0x1f0] sm:$0xff] %vm664_vm1, %v656_v3 }

// kernel: _lambda_.11
= control target key start
LH: loop header
LB: loop body
LE: loop exit
PB: predicated region body
PF: predicated region fallthrough
CT: control target
= control target key end

     0   :  { %v1055_v0 = vmov 0.0|0.0   ;;  %vm170_vm0 = vcmask 130048   ;;  %s2118_s1 = inlined_call_operand.vmem [shape: f32[144,16], index: 1, kind: input, shape index: {}]   ;;  %s2119_s0 = inlined_call_operand.vmem [shape: f32[512,144], index: 0, kind: input, shape index: {}]   ;;  %s2120_s2 = inlined_call_operand.vmem [shape: f32[1,16], index: 2, kind: input, shape index: {}]   ;;  %s2121_s3 = inlined_call_operand.vmem [shape: f32[512,16], index: 3, kind: input, shape index: {}]   ;;  %s2122_s4 = inlined_call_operand.vmem [shape: f32[512,16], index: 4, kind: output, shape index: {}]  }
   0x1   :  { %1009 = vmatprep.subr.bf16.mxu0 %v1055_v0  ;;  %1036 = vmatprep.subr.bf16.mxu1 %v1055_v0  ;;  %v145_v1 = vld [vmem:[%s2118_s1] sm:$0xff]  ;;  %v146_v2 = vld [vmem:[%s2118_s1 + $0x8] sm:$0xff]  ;;  %v147_v3 = vld [vmem:[%s2118_s1 + $0x10] sm:$0xff] }
   0x2   :  { %v1010_v4 = vpack.c.bf16 %v146_v2, %v145_v1  ;;  %v148_v5 = vld [vmem:[%s2118_s1 + $0x18] sm:$0xff]  ;;  %v149_v7 = vld [vmem:[%s2118_s1 + $0x20] sm:$0xff]  ;;  %v150_v8 = vld [vmem:[%s2118_s1 + $0x28] sm:$0xff] }
   0x3   :  { %v1013_v6 = vpack.c.bf16 %v148_v5, %v147_v3  ;;  %v18_v9 = vld [vmem:[%s2119_s0 + $0x8] sm:$0xff]  ;;  %v1016_v11 = vpack.c.bf16 %v150_v8, %v149_v7  ;;  %v151_v12 = vld [vmem:[%s2118_s1 + $0x30] sm:$0xff]  ;;  %v152_v13 = vld [vmem:[%s2118_s1 + $0x38] sm:$0xff] }
   0x4   :  { %1011 = vmatpush1.bf16.msra.mxu0 %v1010_v4  ;;  %1045 = vmatpush1.bf16.msra.mxu1 %v1010_v4  ;;  %v82_v10 = vld [vmem:[%s2119_s0 + $0x208] sm:$0xff]  ;;  %v1019_v14 = vpack.c.bf16 %v152_v13, %v151_v12  ;;  %v153_v15 = vld [vmem:[%s2118_s1 + $0x40] sm:$0xff]  ;;  %v155_v18 = vld [vmem:[%s2118_s1 + $0x50] sm:$0xff] }
   0x5   :  { %1012 = vmatprep.subr.bf16.mxu0 %v1055_v0  ;;  %1037 = vmatprep.subr.bf16.mxu1 %v1055_v0  ;;  %v154_v16 = vld [vmem:[%s2118_s1 + $0x48] sm:$0xff]  ;;  %v156_v19 = vld [vmem:[%s2118_s1 + $0x58] sm:$0xff]  ;;  %v157_v21 = vld [vmem:[%s2118_s1 + $0x60] sm:$0xff] }
   0x6   :  { %945 = vmatprep.mubr.msk.f32.mxu0 %vm170_vm0, %v18_v9  ;;  %977 = vmatprep.mubr.msk.f32.mxu1 %vm170_vm0, %v82_v10  ;;  %v1022_v17 = vpack.c.bf16 %v154_v16, %v153_v15  ;;  %v1025_v20 = vpack.c.bf16 %v156_v19, %v155_v18  ;;  %v158_v22 = vld [vmem:[%s2118_s1 + $0x68] sm:$0xff]  ;;  %v159_v24 = vld [vmem:[%s2118_s1 + $0x70] sm:$0xff]  ;;  %v160_v25 = vld [vmem:[%s2118_s1 + $0x78] sm:$0xff] }
   0x7   :  { %v1028_v23 = vpack.c.bf16 %v158_v22, %v157_v21  ;;  %v1031_v26 = vpack.c.bf16 %v160_v25, %v159_v24  ;;  %v161_v27 = vld [vmem:[%s2118_s1 + $0x80] sm:$0xff]  ;;  %v162_v28 = vld [vmem:[%s2118_s1 + $0x88] sm:$0xff]  ;;  %v20_v32 = vld [vmem:[%s2119_s0 + $0x18] sm:$0xff] }
   0x8   :  { %1014 = vmatpush1.bf16.msra.mxu0 %v1013_v6  ;;  %1046 = vmatpush1.bf16.msra.mxu1 %v1013_v6  ;;  %v1034_v29 = vpack.c.bf16 %v162_v28, %v161_v27  ;;  %v17_v30 = vld [vmem:[%s2119_s0] sm:$0xff]  ;;  %v84_v33 = vld [vmem:[%s2119_s0 + $0x218] sm:$0xff]  ;;  %v19_v34 = vld [vmem:[%s2119_s0 + $0x10] sm:$0xff] }
   0x9   :  { %1015 = vmatprep.subr.bf16.mxu0 %v1055_v0  ;;  %1038 = vmatprep.subr.bf16.mxu1 %v1055_v0  ;;  %v81_v31 = vld [vmem:[%s2119_s0 + $0x200] sm:$0xff]  ;;  %v83_v35 = vld [vmem:[%s2119_s0 + $0x210] sm:$0xff]  ;;  %v22_v36 = vld [vmem:[%s2119_s0 + $0x28] sm:$0xff] }
   0xa   :  { %v86_v37 = vld [vmem:[%s2119_s0 + $0x228] sm:$0xff]  ;;  %v21_v38 = vld [vmem:[%s2119_s0 + $0x20] sm:$0xff]  ;;  %v24_v40 = vld [vmem:[%s2119_s0 + $0x38] sm:$0xff] }
   0xb   :  { %v85_v39 = vld [vmem:[%s2119_s0 + $0x220] sm:$0xff]  ;;  %v88_v41 = vld [vmem:[%s2119_s0 + $0x238] sm:$0xff]  ;;  %v23_v42 = vld [vmem:[%s2119_s0 + $0x30] sm:$0xff] }
   0xc   :  { %1017 = vmatpush1.bf16.msra.mxu0 %v1016_v11  ;;  %1047 = vmatpush1.bf16.msra.mxu1 %v1016_v11  ;;  %v87_v43 = vld [vmem:[%s2119_s0 + $0x230] sm:$0xff]  ;;  %v26_v44 = vld [vmem:[%s2119_s0 + $0x48] sm:$0xff]  ;;  %v25_v46 = vld [vmem:[%s2119_s0 + $0x40] sm:$0xff] }
   0xd   :  { %1018 = vmatprep.subr.bf16.mxu0 %v1055_v0  ;;  %1039 = vmatprep.subr.bf16.mxu1 %v1055_v0  ;;  %v90_v45 = vld [vmem:[%s2119_s0 + $0x248] sm:$0xff]  ;;  %v89_v47 = vld [vmem:[%s2119_s0 + $0x240] sm:$0xff]  ;;  %v28_v48 = vld [vmem:[%s2119_s0 + $0x58] sm:$0xff] }
   0xe   :  { %v92_v49 = vld [vmem:[%s2119_s0 + $0x258] sm:$0xff]  ;;  %v27_v50 = vld [vmem:[%s2119_s0 + $0x50] sm:$0xff]  ;;  %v30_v52 = vld [vmem:[%s2119_s0 + $0x68] sm:$0xff] }
   0xf   :  { %v91_v51 = vld [vmem:[%s2119_s0 + $0x250] sm:$0xff]  ;;  %v94_v53 = vld [vmem:[%s2119_s0 + $0x268] sm:$0xff]  ;;  %v29_v54 = vld [vmem:[%s2119_s0 + $0x60] sm:$0xff] }
  0x10   :  { %1020 = vmatpush1.bf16.msra.mxu0 %v1019_v14  ;;  %1048 = vmatpush1.bf16.msra.mxu1 %v1019_v14  ;;  %v93_v55 = vld [vmem:[%s2119_s0 + $0x260] sm:$0xff]  ;;  %v32_v56 = vld [vmem:[%s2119_s0 + $0x78] sm:$0xff]  ;;  %v31_v58 = vld [vmem:[%s2119_s0 + $0x70] sm:$0xff] }
  0x11   :  { %1021 = vmatprep.subr.bf16.mxu0 %v1055_v0  ;;  %1040 = vmatprep.subr.bf16.mxu1 %v1055_v0  ;;  %v96_v57 = vld [vmem:[%s2119_s0 + $0x278] sm:$0xff]  ;;  %v95_v59 = vld [vmem:[%s2119_s0 + $0x270] sm:$0xff]  ;;  %v34_v60 = vld [vmem:[%s2119_s0 + $0x88] sm:$0xff] }
  0x12   :  { %v98_v61 = vld [vmem:[%s2119_s0 + $0x288] sm:$0xff]  ;;  %v33_v62 = vld [vmem:[%s2119_s0 + $0x80] sm:$0xff]  ;;  %v100_v1 = vld [vmem:[%s2119_s0 + $0x298] sm:$0xff] }
  0x13   :  { %v97_v63 = vld [vmem:[%s2119_s0 + $0x280] sm:$0xff]  ;;  %v35_v2 = vld [vmem:[%s2119_s0 + $0x90] sm:$0xff]  ;;  %v38_v4 = vld [vmem:[%s2119_s0 + $0xa8] sm:$0xff] }
  0x14   :  { %1023 = vmatpush1.bf16.msra.mxu0 %v1022_v17  ;;  %1049 = vmatpush1.bf16.msra.mxu1 %v1022_v17  ;;  %v99_v3 = vld [vmem:[%s2119_s0 + $0x290] sm:$0xff]  ;;  %v102_v5 = vld [vmem:[%s2119_s0 + $0x2a8] sm:$0xff]  ;;  %v37_v6 = vld [vmem:[%s2119_s0 + $0xa0] sm:$0xff] }
  0x15   :  { %1024 = vmatprep.subr.bf16.mxu0 %v1055_v0  ;;  %1041 = vmatprep.subr.bf16.mxu1 %v1055_v0  ;;  %v101_v7 = vld [vmem:[%s2119_s0 + $0x2a0] sm:$0xff]  ;;  %v40_v8 = vld [vmem:[%s2119_s0 + $0xb8] sm:$0xff]  ;;  %v39_v10 = vld [vmem:[%s2119_s0 + $0xb0] sm:$0xff] }
  0x16   :  { %v104_v9 = vld [vmem:[%s2119_s0 + $0x2b8] sm:$0xff]  ;;  %v103_v11 = vld [vmem:[%s2119_s0 + $0x2b0] sm:$0xff]  ;;  %v42_v12 = vld [vmem:[%s2119_s0 + $0xc8] sm:$0xff] }
  0x17   :  { %v106_v13 = vld [vmem:[%s2119_s0 + $0x2c8] sm:$0xff]  ;;  %v41_v14 = vld [vmem:[%s2119_s0 + $0xc0] sm:$0xff]  ;;  %v44_v16 = vld [vmem:[%s2119_s0 + $0xd8] sm:$0xff] }
  0x18   :  { %1026 = vmatpush1.bf16.msra.mxu0 %v1025_v20  ;;  %1050 = vmatpush1.bf16.msra.mxu1 %v1025_v20  ;;  %v105_v15 = vld [vmem:[%s2119_s0 + $0x2c0] sm:$0xff]  ;;  %v108_v17 = vld [vmem:[%s2119_s0 + $0x2d8] sm:$0xff]  ;;  %v43_v18 = vld [vmem:[%s2119_s0 + $0xd0] sm:$0xff] }
  0x19   :  { %1027 = vmatprep.subr.bf16.mxu0 %v1055_v0  ;;  %1042 = vmatprep.subr.bf16.mxu1 %v1055_v0  ;;  %v107_v19 = vld [vmem:[%s2119_s0 + $0x2d0] sm:$0xff]  ;;  %v46_v20 = vld [vmem:[%s2119_s0 + $0xe8] sm:$0xff]  ;;  %v45_v22 = vld [vmem:[%s2119_s0 + $0xe0] sm:$0xff] }
  0x1a   :  { %v110_v21 = vld [vmem:[%s2119_s0 + $0x2e8] sm:$0xff]  ;;  %v48_v24 = vld [vmem:[%s2119_s0 + $0xf8] sm:$0xff]  ;;  %v111_v27 = vld [vmem:[%s2119_s0 + $0x2f0] sm:$0xff] }
  0x1b   :  { %v112_v25 = vld [vmem:[%s2119_s0 + $0x2f8] sm:$0xff]  ;;  %v50_v28 = vld [vmem:[%s2119_s0 + $0x108] sm:$0xff] }
  0x1c   :  { %1029 = vmatpush1.bf16.msra.mxu0 %v1028_v23  ;;  %1051 = vmatpush1.bf16.msra.mxu1 %v1028_v23  ;;  %v109_v23 = vld [vmem:[%s2119_s0 + $0x2e0] sm:$0xff] }
  0x1d   :  { %1030 = vmatprep.subr.bf16.mxu0 %v1055_v0  ;;  %1043 = vmatprep.subr.bf16.mxu1 %v1055_v0 }
  0x20   :  { %1032 = vmatpush1.bf16.msra.mxu0 %v1031_v26  ;;  %1052 = vmatpush1.bf16.msra.mxu1 %v1031_v26  ;;  %v47_v26 = vld [vmem:[%s2119_s0 + $0xf0] sm:$0xff] }
  0x21   :  { %1033 = vmatprep.subr.bf16.mxu0 %v1055_v0  ;;  %1044 = vmatprep.subr.bf16.mxu1 %v1055_v0  ;;  %v36_v0 = vld [vmem:[%s2119_s0 + $0x98] sm:$0xff] }
  0x24   :  { %1035 = vmatpush1.bf16.msra.mxu0 %v1034_v29  ;;  %1053 = vmatpush1.bf16.msra.mxu1 %v1034_v29  ;;  %v114_v29 = vld [vmem:[%s2119_s0 + $0x308] sm:$0xff] }
  0x27   :  { %428 = vmatmul.mubr.f32.vlgmr.msra.gmra.mrb[0].mxu0 %v17_v30  ;;  %588 = vmatmul.mubr.f32.vlgmr.msra.gmra.mrb[0].mxu1 %v81_v31  ;;  %v49_v30 = vld [vmem:[%s2119_s0 + $0x100] sm:$0xff] }
  0x28   :  { %946 = vmatprep.mubr.msk.f32.mxu0 %vm170_vm0, %v20_v32  ;;  %978 = vmatprep.mubr.msk.f32.mxu1 %vm170_vm0, %v84_v33  ;;  %v113_v31 = vld [vmem:[%s2119_s0 + $0x300] sm:$0xff]  ;;  %v52_v32 = vld [vmem:[%s2119_s0 + $0x118] sm:$0xff] }
  0x29   :  { %v116_v33 = vld [vmem:[%s2119_s0 + $0x318] sm:$0xff] }
  0x2b   :  { %433 = vmatmul.mubr.f32.gmra.mrb[2].mxu0 %v19_v34  ;;  %593 = vmatmul.mubr.f32.gmra.mrb[2].mxu1 %v83_v35  ;;  %v51_v34 = vld [vmem:[%s2119_s0 + $0x110] sm:$0xff] }
  0x2c   :  { %947 = vmatprep.mubr.msk.f32.mxu0 %vm170_vm0, %v22_v36  ;;  %979 = vmatprep.mubr.msk.f32.mxu1 %vm170_vm0, %v86_v37  ;;  %v115_v35 = vld [vmem:[%s2119_s0 + $0x310] sm:$0xff]  ;;  %v54_v36 = vld [vmem:[%s2119_s0 + $0x128] sm:$0xff] }
  0x2d   :  { %v118_v37 = vld [vmem:[%s2119_s0 + $0x328] sm:$0xff] }
  0x2f   :  { %438 = vmatmul.mubr.f32.gmra.mrb[4].mxu0 %v21_v38  ;;  %598 = vmatmul.mubr.f32.gmra.mrb[4].mxu1 %v85_v39  ;;  %v53_v38 = vld [vmem:[%s2119_s0 + $0x120] sm:$0xff] }
  0x30   :  { %948 = vmatprep.mubr.msk.f32.mxu0 %vm170_vm0, %v24_v40  ;;  %980 = vmatprep.mubr.msk.f32.mxu1 %vm170_vm0, %v88_v41  ;;  %v117_v39 = vld [vmem:[%s2119_s0 + $0x320] sm:$0xff]  ;;  %v56_v40 = vld [vmem:[%s2119_s0 + $0x138] sm:$0xff] }
  0x31   :  { %v120_v41 = vld [vmem:[%s2119_s0 + $0x338] sm:$0xff] }
  0x33   :  { %443 = vmatmul.mubr.f32.gmra.mrb[6].mxu0 %v23_v42  ;;  %603 = vmatmul.mubr.f32.gmra.mrb[6].mxu1 %v87_v43  ;;  %v55_v42 = vld [vmem:[%s2119_s0 + $0x130] sm:$0xff] }
  0x34   :  { %949 = vmatprep.mubr.msk.f32.mxu0 %vm170_vm0, %v26_v44  ;;  %981 = vmatprep.mubr.msk.f32.mxu1 %vm170_vm0, %v90_v45  ;;  %v119_v43 = vld [vmem:[%s2119_s0 + $0x330] sm:$0xff]  ;;  %v58_v44 = vld [vmem:[%s2119_s0 + $0x148] sm:$0xff] }
  0x35   :  { %v122_v45 = vld [vmem:[%s2119_s0 + $0x348] sm:$0xff] }
  0x37   :  { %448 = vmatmul.mubr.f32.gmra.mrb[8].mxu0 %v25_v46  ;;  %608 = vmatmul.mubr.f32.gmra.mrb[8].mxu1 %v89_v47  ;;  %v57_v46 = vld [vmem:[%s2119_s0 + $0x140] sm:$0xff] }
  0x38   :  { %950 = vmatprep.mubr.msk.f32.mxu0 %vm170_vm0, %v28_v48  ;;  %982 = vmatprep.mubr.msk.f32.mxu1 %vm170_vm0, %v92_v49  ;;  %v121_v47 = vld [vmem:[%s2119_s0 + $0x340] sm:$0xff]  ;;  %v60_v48 = vld [vmem:[%s2119_s0 + $0x158] sm:$0xff] }
  0x39   :  { %v124_v49 = vld [vmem:[%s2119_s0 + $0x358] sm:$0xff] }
  0x3b   :  { %453 = vmatmul.mubr.f32.gmra.mrb[10].mxu0 %v27_v50  ;;  %613 = vmatmul.mubr.f32.gmra.mrb[10].mxu1 %v91_v51  ;;  %v59_v50 = vld [vmem:[%s2119_s0 + $0x150] sm:$0xff] }
  0x3c   :  { %951 = vmatprep.mubr.msk.f32.mxu0 %vm170_vm0, %v30_v52  ;;  %983 = vmatprep.mubr.msk.f32.mxu1 %vm170_vm0, %v94_v53  ;;  %v123_v51 = vld [vmem:[%s2119_s0 + $0x350] sm:$0xff]  ;;  %v62_v52 = vld [vmem:[%s2119_s0 + $0x168] sm:$0xff] }
  0x3d   :  { %v126_v53 = vld [vmem:[%s2119_s0 + $0x368] sm:$0xff] }
  0x3f   :  { %458 = vmatmul.mubr.f32.gmra.mrb[12].mxu0 %v29_v54  ;;  %618 = vmatmul.mubr.f32.gmra.mrb[12].mxu1 %v93_v55  ;;  %v61_v54 = vld [vmem:[%s2119_s0 + $0x160] sm:$0xff] }
  0x40   :  { %952 = vmatprep.mubr.msk.f32.mxu0 %vm170_vm0, %v32_v56  ;;  %984 = vmatprep.mubr.msk.f32.mxu1 %vm170_vm0, %v96_v57  ;;  %v125_v55 = vld [vmem:[%s2119_s0 + $0x360] sm:$0xff]  ;;  %v64_v56 = vld [vmem:[%s2119_s0 + $0x178] sm:$0xff] }
  0x41   :  { %v128_v57 = vld [vmem:[%s2119_s0 + $0x378] sm:$0xff] }
  0x43   :  { %463 = vmatmul.mubr.f32.gmra.mrb[14].mxu0 %v31_v58  ;;  %623 = vmatmul.mubr.f32.gmra.mrb[14].mxu1 %v95_v59  ;;  %v63_v58 = vld [vmem:[%s2119_s0 + $0x170] sm:$0xff] }
  0x44   :  { %953 = vmatprep.mubr.msk.f32.mxu0 %vm170_vm0, %v34_v60  ;;  %985 = vmatprep.mubr.msk.f32.mxu1 %vm170_vm0, %v98_v61  ;;  %v127_v59 = vld [vmem:[%s2119_s0 + $0x370] sm:$0xff]  ;;  %v66_v60 = vld [vmem:[%s2119_s0 + $0x188] sm:$0xff] }
  0x45   :  { %v130_v61 = vld [vmem:[%s2119_s0 + $0x388] sm:$0xff] }
  0x47   :  { %468 = vmatmul.mubr.f32.gmra.mrb[16].mxu0 %v33_v62  ;;  %628 = vmatmul.mubr.f32.gmra.mrb[16].mxu1 %v97_v63  ;;  %v65_v62 = vld [vmem:[%s2119_s0 + $0x180] sm:$0xff] }
  0x48   :  { %954 = vmatprep.mubr.msk.f32.mxu0 %vm170_vm0, %v36_v0  ;;  %986 = vmatprep.mubr.msk.f32.mxu1 %vm170_vm0, %v100_v1  ;;  %v129_v63 = vld [vmem:[%s2119_s0 + $0x380] sm:$0xff]  ;;  %v68_v0 = vld [vmem:[%s2119_s0 + $0x198] sm:$0xff] }
  0x49   :  { %v132_v1 = vld [vmem:[%s2119_s0 + $0x398] sm:$0xff] }
  0x4b   :  { %473 = vmatmul.mubr.f32.gmra.mrb[18].mxu0 %v35_v2  ;;  %633 = vmatmul.mubr.f32.gmra.mrb[18].mxu1 %v99_v3  ;;  %v67_v2 = vld [vmem:[%s2119_s0 + $0x190] sm:$0xff] }
  0x4c   :  { %955 = vmatprep.mubr.msk.f32.mxu0 %vm170_vm0, %v38_v4  ;;  %987 = vmatprep.mubr.msk.f32.mxu1 %vm170_vm0, %v102_v5  ;;  %v131_v3 = vld [vmem:[%s2119_s0 + $0x390] sm:$0xff]  ;;  %v70_v4 = vld [vmem:[%s2119_s0 + $0x1a8] sm:$0xff] }
  0x4d   :  { %v134_v5 = vld [vmem:[%s2119_s0 + $0x3a8] sm:$0xff] }
  0x4f   :  { %478 = vmatmul.mubr.f32.gmra.mrb[20].mxu0 %v37_v6  ;;  %638 = vmatmul.mubr.f32.gmra.mrb[20].mxu1 %v101_v7  ;;  %v69_v6 = vld [vmem:[%s2119_s0 + $0x1a0] sm:$0xff] }
  0x50   :  { %956 = vmatprep.mubr.msk.f32.mxu0 %vm170_vm0, %v40_v8  ;;  %988 = vmatprep.mubr.msk.f32.mxu1 %vm170_vm0, %v104_v9  ;;  %v133_v7 = vld [vmem:[%s2119_s0 + $0x3a0] sm:$0xff]  ;;  %v72_v8 = vld [vmem:[%s2119_s0 + $0x1b8] sm:$0xff] }
  0x51   :  { %v136_v9 = vld [vmem:[%s2119_s0 + $0x3b8] sm:$0xff] }
  0x53   :  { %483 = vmatmul.mubr.f32.gmra.mrb[22].mxu0 %v39_v10  ;;  %643 = vmatmul.mubr.f32.gmra.mrb[22].mxu1 %v103_v11  ;;  %v71_v10 = vld [vmem:[%s2119_s0 + $0x1b0] sm:$0xff] }
  0x54   :  { %957 = vmatprep.mubr.msk.f32.mxu0 %vm170_vm0, %v42_v12  ;;  %989 = vmatprep.mubr.msk.f32.mxu1 %vm170_vm0, %v106_v13  ;;  %v135_v11 = vld [vmem:[%s2119_s0 + $0x3b0] sm:$0xff]  ;;  %v74_v12 = vld [vmem:[%s2119_s0 + $0x1c8] sm:$0xff] }
  0x55   :  { %v138_v13 = vld [vmem:[%s2119_s0 + $0x3c8] sm:$0xff] }
  0x57   :  { %488 = vmatmul.mubr.f32.gmra.mrb[24].mxu0 %v41_v14  ;;  %648 = vmatmul.mubr.f32.gmra.mrb[24].mxu1 %v105_v15  ;;  %v73_v14 = vld [vmem:[%s2119_s0 + $0x1c0] sm:$0xff] }
  0x58   :  { %958 = vmatprep.mubr.msk.f32.mxu0 %vm170_vm0, %v44_v16  ;;  %990 = vmatprep.mubr.msk.f32.mxu1 %vm170_vm0, %v108_v17  ;;  %v137_v15 = vld [vmem:[%s2119_s0 + $0x3c0] sm:$0xff]  ;;  %v76_v16 = vld [vmem:[%s2119_s0 + $0x1d8] sm:$0xff] }
  0x59   :  { %v140_v17 = vld [vmem:[%s2119_s0 + $0x3d8] sm:$0xff] }
  0x5b   :  { %493 = vmatmul.mubr.f32.gmra.mrb[26].mxu0 %v43_v18  ;;  %653 = vmatmul.mubr.f32.gmra.mrb[26].mxu1 %v107_v19  ;;  %v75_v18 = vld [vmem:[%s2119_s0 + $0x1d0] sm:$0xff] }
  0x5c   :  { %959 = vmatprep.mubr.msk.f32.mxu0 %vm170_vm0, %v46_v20  ;;  %991 = vmatprep.mubr.msk.f32.mxu1 %vm170_vm0, %v110_v21  ;;  %v139_v19 = vld [vmem:[%s2119_s0 + $0x3d0] sm:$0xff]  ;;  %v78_v20 = vld [vmem:[%s2119_s0 + $0x1e8] sm:$0xff] }
  0x5d   :  { %v142_v21 = vld [vmem:[%s2119_s0 + $0x3e8] sm:$0xff] }
  0x5f   :  { %498 = vmatmul.mubr.f32.gmra.mrb[28].mxu0 %v45_v22  ;;  %658 = vmatmul.mubr.f32.gmra.mrb[28].mxu1 %v109_v23  ;;  %v77_v22 = vld [vmem:[%s2119_s0 + $0x1e0] sm:$0xff] }
  0x60   :  { %960 = vmatprep.mubr.msk.f32.mxu0 %vm170_vm0, %v48_v24  ;;  %992 = vmatprep.mubr.msk.f32.mxu1 %vm170_vm0, %v112_v25  ;;  %v141_v23 = vld [vmem:[%s2119_s0 + $0x3e0] sm:$0xff]  ;;  %v80_v24 = vld [vmem:[%s2119_s0 + $0x1f8] sm:$0xff] }
  0x61   :  { %v144_v25 = vld [vmem:[%s2119_s0 + $0x3f8] sm:$0xff] }
  0x63   :  { %503 = vmatmul.mubr.f32.gmra.mrb[30].mxu0 %v47_v26  ;;  %663 = vmatmul.mubr.f32.gmra.mrb[30].mxu1 %v111_v27  ;;  %v79_v26 = vld [vmem:[%s2119_s0 + $0x1f0] sm:$0xff] }
  0x64   :  { %961 = vmatprep.mubr.msk.f32.mxu0 %vm170_vm0, %v50_v28  ;;  %993 = vmatprep.mubr.msk.f32.mxu1 %vm170_vm0, %v114_v29  ;;  %v143_v27 = vld [vmem:[%s2119_s0 + $0x3f0] sm:$0xff]  ;;  %v1604_v28 = vld [vmem:[%s2120_s2] ss:$0 sm:$0xff] }
  0x67   :  { %508 = vmatmul.mubr.f32.gmra.mrb[32].mxu0 %v49_v30  ;;  %668 = vmatmul.mubr.f32.gmra.mrb[32].mxu1 %v113_v31  ;;  %v748_v30 = vld [vmem:[%s2121_s3] sm:$0xff] }
  0x68   :  { %962 = vmatprep.mubr.msk.f32.mxu0 %vm170_vm0, %v52_v32  ;;  %994 = vmatprep.mubr.msk.f32.mxu1 %vm170_vm0, %v116_v33  ;;  %v780_v32 = vld [vmem:[%s2121_s3 + $0x100] sm:$0xff] }
  0x6b   :  { %513 = vmatmul.mubr.f32.gmra.mrb[34].mxu0 %v51_v34  ;;  %673 = vmatmul.mubr.f32.gmra.mrb[34].mxu1 %v115_v35 }
  0x6c   :  { %963 = vmatprep.mubr.msk.f32.mxu0 %vm170_vm0, %v54_v36  ;;  %995 = vmatprep.mubr.msk.f32.mxu1 %vm170_vm0, %v118_v37 }
  0x6f   :  { %518 = vmatmul.mubr.f32.gmra.mrb[36].mxu0 %v53_v38  ;;  %678 = vmatmul.mubr.f32.gmra.mrb[36].mxu1 %v117_v39 }
  0x70   :  { %964 = vmatprep.mubr.msk.f32.mxu0 %vm170_vm0, %v56_v40  ;;  %996 = vmatprep.mubr.msk.f32.mxu1 %vm170_vm0, %v120_v41  ;;  %v749_v40 = vld [vmem:[%s2121_s3 + $0x8] sm:$0xff] }
  0x73   :  { %523 = vmatmul.mubr.f32.gmra.mrb[38].mxu0 %v55_v42  ;;  %683 = vmatmul.mubr.f32.gmra.mrb[38].mxu1 %v119_v43  ;;  %v781_v42 = vld [vmem:[%s2121_s3 + $0x108] sm:$0xff] }
  0x74   :  { %965 = vmatprep.mubr.msk.f32.mxu0 %vm170_vm0, %v58_v44  ;;  %997 = vmatprep.mubr.msk.f32.mxu1 %vm170_vm0, %v122_v45 }
  0x77   :  { %528 = vmatmul.mubr.f32.gmra.mrb[40].mxu0 %v57_v46  ;;  %688 = vmatmul.mubr.f32.gmra.mrb[40].mxu1 %v121_v47 }
  0x78   :  { %966 = vmatprep.mubr.msk.f32.mxu0 %vm170_vm0, %v60_v48  ;;  %998 = vmatprep.mubr.msk.f32.mxu1 %vm170_vm0, %v124_v49 }
  0x7b   :  { %533 = vmatmul.mubr.f32.gmra.mrb[42].mxu0 %v59_v50  ;;  %693 = vmatmul.mubr.f32.gmra.mrb[42].mxu1 %v123_v51  ;;  %v750_v50 = vld [vmem:[%s2121_s3 + $0x10] sm:$0xff] }
  0x7c   :  { %967 = vmatprep.mubr.msk.f32.mxu0 %vm170_vm0, %v62_v52  ;;  %999 = vmatprep.mubr.msk.f32.mxu1 %vm170_vm0, %v126_v53  ;;  %v782_v52 = vld [vmem:[%s2121_s3 + $0x110] sm:$0xff] }
  0x7f   :  { %538 = vmatmul.mubr.f32.gmra.mrb[44].mxu0 %v61_v54  ;;  %698 = vmatmul.mubr.f32.gmra.mrb[44].mxu1 %v125_v55 }
  0x80   :  { %968 = vmatprep.mubr.msk.f32.mxu0 %vm170_vm0, %v64_v56  ;;  %1000 = vmatprep.mubr.msk.f32.mxu1 %vm170_vm0, %v128_v57 }
  0x83   :  { %543 = vmatmul.mubr.f32.gmra.mrb[46].mxu0 %v63_v58  ;;  %703 = vmatmul.mubr.f32.gmra.mrb[46].mxu1 %v127_v59 }
  0x84   :  { %969 = vmatprep.mubr.msk.f32.mxu0 %vm170_vm0, %v66_v60  ;;  %1001 = vmatprep.mubr.msk.f32.mxu1 %vm170_vm0, %v130_v61  ;;  %v751_v60 = vld [vmem:[%s2121_s3 + $0x18] sm:$0xff] }
  0x87   :  { %548 = vmatmul.mubr.f32.gmra.mrb[48].mxu0 %v65_v62  ;;  %708 = vmatmul.mubr.f32.gmra.mrb[48].mxu1 %v129_v63  ;;  %v783_v62 = vld [vmem:[%s2121_s3 + $0x118] sm:$0xff] }
  0x88   :  { %970 = vmatprep.mubr.msk.f32.mxu0 %vm170_vm0, %v68_v0  ;;  %1002 = vmatprep.mubr.msk.f32.mxu1 %vm170_vm0, %v132_v1 }
  0x8b   :  { %553 = vmatmul.mubr.f32.gmra.mrb[50].mxu0 %v67_v2  ;;  %713 = vmatmul.mubr.f32.gmra.mrb[50].mxu1 %v131_v3 }
  0x8c   :  { %971 = vmatprep.mubr.msk.f32.mxu0 %vm170_vm0, %v70_v4  ;;  %1003 = vmatprep.mubr.msk.f32.mxu1 %vm170_vm0, %v134_v5 }
  0x8f   :  { %558 = vmatmul.mubr.f32.gmra.mrb[52].mxu0 %v69_v6  ;;  %718 = vmatmul.mubr.f32.gmra.mrb[52].mxu1 %v133_v7  ;;  %v752_v6 = vld [vmem:[%s2121_s3 + $0x20] sm:$0xff] }
  0x90   :  { %972 = vmatprep.mubr.msk.f32.mxu0 %vm170_vm0, %v72_v8  ;;  %1004 = vmatprep.mubr.msk.f32.mxu1 %vm170_vm0, %v136_v9  ;;  %v784_v8 = vld [vmem:[%s2121_s3 + $0x120] sm:$0xff] }
  0x93   :  { %563 = vmatmul.mubr.f32.gmra.mrb[54].mxu0 %v71_v10  ;;  %723 = vmatmul.mubr.f32.gmra.mrb[54].mxu1 %v135_v11 }
  0x94   :  { %973 = vmatprep.mubr.msk.f32.mxu0 %vm170_vm0, %v74_v12  ;;  %1005 = vmatprep.mubr.msk.f32.mxu1 %vm170_vm0, %v138_v13 }
  0x97   :  { %568 = vmatmul.mubr.f32.gmra.mrb[56].mxu0 %v73_v14  ;;  %728 = vmatmul.mubr.f32.gmra.mrb[56].mxu1 %v137_v15 }
  0x98   :  { %974 = vmatprep.mubr.msk.f32.mxu0 %vm170_vm0, %v76_v16  ;;  %1006 = vmatprep.mubr.msk.f32.mxu1 %vm170_vm0, %v140_v17  ;;  %v753_v16 = vld [vmem:[%s2121_s3 + $0x28] sm:$0xff] }
  0x9b   :  { %573 = vmatmul.mubr.f32.gmra.mrb[58].mxu0 %v75_v18  ;;  %733 = vmatmul.mubr.f32.gmra.mrb[58].mxu1 %v139_v19  ;;  %v785_v18 = vld [vmem:[%s2121_s3 + $0x128] sm:$0xff] }
  0x9c   :  { %975 = vmatprep.mubr.msk.f32.mxu0 %vm170_vm0, %v78_v20  ;;  %1007 = vmatprep.mubr.msk.f32.mxu1 %vm170_vm0, %v142_v21 }
  0x9f   :  { %578 = vmatmul.mubr.f32.gmra.mrb[60].mxu0 %v77_v22  ;;  %738 = vmatmul.mubr.f32.gmra.mrb[60].mxu1 %v141_v23 }
  0xa0   :  { %976 = vmatprep.mubr.msk.f32.mxu0 %vm170_vm0, %v80_v24  ;;  %1008 = vmatprep.mubr.msk.f32.mxu1 %vm170_vm0, %v144_v25 }
  0xa3   :  { %583 = vmatmul.mubr.f32.gmra.mrb[62].mxu0 %v79_v26  ;;  %743 = vmatmul.mubr.f32.gmra.mrb[62].mxu1 %v143_v27  ;;  %v754_v26 = vld [vmem:[%s2121_s3 + $0x30] sm:$0xff] }
  0xfa   :  { %v429_v29 = vpop.f32.mrb[0].mxu0  ;;  %v589_v31 = vpop.f32.mrb[0].mxu1 }
  0xfb   :  { %v430_v33 = vadd.f32 %v1604_v28, %v429_v29  ;;  %v590_v34 = vadd.f32 %v1604_v28, %v589_v31  ;;  %v431_v35 = vpop.f32.mrb[1].mxu0  ;;  %v591_v36 = vpop.f32.mrb[1].mxu1  ;;  %v786_v29 = vld [vmem:[%s2121_s3 + $0x130] sm:$0xff] }
  0xfd   :  { %v812_v37 = vadd.f32 %v748_v30, %v430_v33  ;;  %v844_v38 = vadd.f32 %v780_v32, %v590_v34 }
  0xfe   :  { %v434_v39 = vpop.f32.mrb[2].mxu0  ;;  %v594_v41 = vpop.f32.mrb[2].mxu1 }
  0xff   :  { %876 = vst.msk [vmem:[%s2122_s4] sm:$0xff] %vm170_vm0, %v812_v37  ;;  %908 = vst.msk [vmem:[%s2122_s4 + $0x100] sm:$0xff] %vm170_vm0, %v844_v38  ;;  %v435_v43 = vadd.f32 %v1604_v28, %v434_v39  ;;  %v595_v44 = vadd.f32 %v1604_v28, %v594_v41  ;;  %v436_v45 = vpop.f32.mrb[3].mxu0  ;;  %v596_v46 = vpop.f32.mrb[3].mxu1  ;;  %v755_v37 = vld [vmem:[%s2121_s3 + $0x38] sm:$0xff] }
 0x100   :  { %v787_v39 = vld [vmem:[%s2121_s3 + $0x138] sm:$0xff] }
 0x101   :  { %v813_v47 = vadd.f32 %v749_v40, %v435_v43  ;;  %v845_v48 = vadd.f32 %v781_v42, %v595_v44 }
 0x102   :  { %v439_v49 = vpop.f32.mrb[4].mxu0  ;;  %v599_v51 = vpop.f32.mrb[4].mxu1 }
 0x103   :  { %877 = vst.msk [vmem:[%s2122_s4 + $0x8] sm:$0xff] %vm170_vm0, %v813_v47  ;;  %909 = vst.msk [vmem:[%s2122_s4 + $0x108] sm:$0xff] %vm170_vm0, %v845_v48  ;;  %v440_v53 = vadd.f32 %v1604_v28, %v439_v49  ;;  %v600_v54 = vadd.f32 %v1604_v28, %v599_v51  ;;  %v441_v55 = vpop.f32.mrb[5].mxu0  ;;  %v601_v56 = vpop.f32.mrb[5].mxu1  ;;  %v756_v47 = vld [vmem:[%s2121_s3 + $0x40] sm:$0xff] }
 0x104   :  { %v788_v49 = vld [vmem:[%s2121_s3 + $0x140] sm:$0xff] }
 0x105   :  { %v814_v57 = vadd.f32 %v750_v50, %v440_v53  ;;  %v846_v58 = vadd.f32 %v782_v52, %v600_v54 }
 0x106   :  { %v444_v59 = vpop.f32.mrb[6].mxu0  ;;  %v604_v61 = vpop.f32.mrb[6].mxu1 }
 0x107   :  { %878 = vst.msk [vmem:[%s2122_s4 + $0x10] sm:$0xff] %vm170_vm0, %v814_v57  ;;  %910 = vst.msk [vmem:[%s2122_s4 + $0x110] sm:$0xff] %vm170_vm0, %v846_v58  ;;  %v445_v63 = vadd.f32 %v1604_v28, %v444_v59  ;;  %v605_v0 = vadd.f32 %v1604_v28, %v604_v61  ;;  %v446_v1 = vpop.f32.mrb[7].mxu0  ;;  %v606_v2 = vpop.f32.mrb[7].mxu1  ;;  %v757_v57 = vld [vmem:[%s2121_s3 + $0x48] sm:$0xff] }
 0x108   :  { %v789_v59 = vld [vmem:[%s2121_s3 + $0x148] sm:$0xff] }
 0x109   :  { %v815_v3 = vadd.f32 %v751_v60, %v445_v63  ;;  %v847_v4 = vadd.f32 %v783_v62, %v605_v0 }
 0x10a   :  { %v449_v5 = vpop.f32.mrb[8].mxu0  ;;  %v609_v7 = vpop.f32.mrb[8].mxu1 }
 0x10b   :  { %879 = vst.msk [vmem:[%s2122_s4 + $0x18] sm:$0xff] %vm170_vm0, %v815_v3  ;;  %911 = vst.msk [vmem:[%s2122_s4 + $0x118] sm:$0xff] %vm170_vm0, %v847_v4  ;;  %v450_v9 = vadd.f32 %v1604_v28, %v449_v5  ;;  %v610_v10 = vadd.f32 %v1604_v28, %v609_v7  ;;  %v451_v11 = vpop.f32.mrb[9].mxu0  ;;  %v611_v12 = vpop.f32.mrb[9].mxu1  ;;  %v758_v3 = vld [vmem:[%s2121_s3 + $0x50] sm:$0xff] }
 0x10c   :  { %v790_v5 = vld [vmem:[%s2121_s3 + $0x150] sm:$0xff] }
 0x10d   :  { %v816_v13 = vadd.f32 %v752_v6, %v450_v9  ;;  %v848_v14 = vadd.f32 %v784_v8, %v610_v10 }
 0x10e   :  { %v454_v15 = vpop.f32.mrb[10].mxu0  ;;  %v614_v17 = vpop.f32.mrb[10].mxu1 }
 0x10f   :  { %880 = vst.msk [vmem:[%s2122_s4 + $0x20] sm:$0xff] %vm170_vm0, %v816_v13  ;;  %912 = vst.msk [vmem:[%s2122_s4 + $0x120] sm:$0xff] %vm170_vm0, %v848_v14  ;;  %v455_v19 = vadd.f32 %v1604_v28, %v454_v15  ;;  %v615_v20 = vadd.f32 %v1604_v28, %v614_v17  ;;  %v456_v21 = vpop.f32.mrb[11].mxu0  ;;  %v616_v22 = vpop.f32.mrb[11].mxu1  ;;  %v759_v13 = vld [vmem:[%s2121_s3 + $0x58] sm:$0xff] }
 0x110   :  { %v791_v15 = vld [vmem:[%s2121_s3 + $0x158] sm:$0xff] }
 0x111   :  { %v817_v23 = vadd.f32 %v753_v16, %v455_v19  ;;  %v849_v24 = vadd.f32 %v785_v18, %v615_v20 }
 0x112   :  { %v459_v25 = vpop.f32.mrb[12].mxu0  ;;  %v619_v27 = vpop.f32.mrb[12].mxu1 }
 0x113   :  { %881 = vst.msk [vmem:[%s2122_s4 + $0x28] sm:$0xff] %vm170_vm0, %v817_v23  ;;  %913 = vst.msk [vmem:[%s2122_s4 + $0x128] sm:$0xff] %vm170_vm0, %v849_v24  ;;  %v460_v30 = vadd.f32 %v1604_v28, %v459_v25  ;;  %v620_v31 = vadd.f32 %v1604_v28, %v619_v27  ;;  %v461_v32 = vpop.f32.mrb[13].mxu0  ;;  %v621_v33 = vpop.f32.mrb[13].mxu1  ;;  %v760_v23 = vld [vmem:[%s2121_s3 + $0x60] sm:$0xff] }
 0x114   :  { %v792_v25 = vld [vmem:[%s2121_s3 + $0x160] sm:$0xff] }
 0x115   :  { %v818_v34 = vadd.f32 %v754_v26, %v460_v30  ;;  %v850_v35 = vadd.f32 %v786_v29, %v620_v31 }
 0x116   :  { %v464_v36 = vpop.f32.mrb[14].mxu0  ;;  %v624_v38 = vpop.f32.mrb[14].mxu1 }
 0x117   :  { %882 = vst.msk [vmem:[%s2122_s4 + $0x30] sm:$0xff] %vm170_vm0, %v818_v34  ;;  %914 = vst.msk [vmem:[%s2122_s4 + $0x130] sm:$0xff] %vm170_vm0, %v850_v35  ;;  %v465_v40 = vadd.f32 %v1604_v28, %v464_v36  ;;  %v625_v41 = vadd.f32 %v1604_v28, %v624_v38  ;;  %v466_v42 = vpop.f32.mrb[15].mxu0  ;;  %v626_v43 = vpop.f32.mrb[15].mxu1  ;;  %v761_v34 = vld [vmem:[%s2121_s3 + $0x68] sm:$0xff] }
 0x118   :  { %v793_v36 = vld [vmem:[%s2121_s3 + $0x168] sm:$0xff] }
 0x119   :  { %v819_v44 = vadd.f32 %v755_v37, %v465_v40  ;;  %v851_v45 = vadd.f32 %v787_v39, %v625_v41 }
 0x11a   :  { %v469_v46 = vpop.f32.mrb[16].mxu0  ;;  %v629_v48 = vpop.f32.mrb[16].mxu1 }
 0x11b   :  { %883 = vst.msk [vmem:[%s2122_s4 + $0x38] sm:$0xff] %vm170_vm0, %v819_v44  ;;  %915 = vst.msk [vmem:[%s2122_s4 + $0x138] sm:$0xff] %vm170_vm0, %v851_v45  ;;  %v470_v50 = vadd.f32 %v1604_v28, %v469_v46  ;;  %v630_v51 = vadd.f32 %v1604_v28, %v629_v48  ;;  %v471_v52 = vpop.f32.mrb[17].mxu0  ;;  %v631_v53 = vpop.f32.mrb[17].mxu1  ;;  %v762_v44 = vld [vmem:[%s2121_s3 + $0x70] sm:$0xff] }
 0x11c   :  { %v794_v46 = vld [vmem:[%s2121_s3 + $0x170] sm:$0xff] }
 0x11d   :  { %v820_v54 = vadd.f32 %v756_v47, %v470_v50  ;;  %v852_v55 = vadd.f32 %v788_v49, %v630_v51 }
 0x11e   :  { %v474_v56 = vpop.f32.mrb[18].mxu0  ;;  %v634_v58 = vpop.f32.mrb[18].mxu1 }
 0x11f   :  { %884 = vst.msk [vmem:[%s2122_s4 + $0x40] sm:$0xff] %vm170_vm0, %v820_v54  ;;  %916 = vst.msk [vmem:[%s2122_s4 + $0x140] sm:$0xff] %vm170_vm0, %v852_v55  ;;  %v475_v60 = vadd.f32 %v1604_v28, %v474_v56  ;;  %v635_v61 = vadd.f32 %v1604_v28, %v634_v58  ;;  %v476_v62 = vpop.f32.mrb[19].mxu0  ;;  %v636_v63 = vpop.f32.mrb[19].mxu1  ;;  %v763_v54 = vld [vmem:[%s2121_s3 + $0x78] sm:$0xff] }
 0x120   :  { %v795_v56 = vld [vmem:[%s2121_s3 + $0x178] sm:$0xff] }
 0x121   :  { %v821_v0 = vadd.f32 %v757_v57, %v475_v60  ;;  %v853_v1 = vadd.f32 %v789_v59, %v635_v61 }
 0x122   :  { %v479_v2 = vpop.f32.mrb[20].mxu0  ;;  %v639_v4 = vpop.f32.mrb[20].mxu1 }
 0x123   :  { %885 = vst.msk [vmem:[%s2122_s4 + $0x48] sm:$0xff] %vm170_vm0, %v821_v0  ;;  %917 = vst.msk [vmem:[%s2122_s4 + $0x148] sm:$0xff] %vm170_vm0, %v853_v1  ;;  %v480_v6 = vadd.f32 %v1604_v28, %v479_v2  ;;  %v640_v7 = vadd.f32 %v1604_v28, %v639_v4  ;;  %v481_v8 = vpop.f32.mrb[21].mxu0  ;;  %v641_v9 = vpop.f32.mrb[21].mxu1  ;;  %v764_v0 = vld [vmem:[%s2121_s3 + $0x80] sm:$0xff] }
 0x124   :  { %v796_v2 = vld [vmem:[%s2121_s3 + $0x180] sm:$0xff] }
 0x125   :  { %v822_v10 = vadd.f32 %v758_v3, %v480_v6  ;;  %v854_v11 = vadd.f32 %v790_v5, %v640_v7 }
 0x126   :  { %v484_v12 = vpop.f32.mrb[22].mxu0  ;;  %v644_v14 = vpop.f32.mrb[22].mxu1 }
 0x127   :  { %886 = vst.msk [vmem:[%s2122_s4 + $0x50] sm:$0xff] %vm170_vm0, %v822_v10  ;;  %918 = vst.msk [vmem:[%s2122_s4 + $0x150] sm:$0xff] %vm170_vm0, %v854_v11  ;;  %v485_v16 = vadd.f32 %v1604_v28, %v484_v12  ;;  %v645_v17 = vadd.f32 %v1604_v28, %v644_v14  ;;  %v486_v18 = vpop.f32.mrb[23].mxu0  ;;  %v646_v19 = vpop.f32.mrb[23].mxu1  ;;  %v765_v10 = vld [vmem:[%s2121_s3 + $0x88] sm:$0xff] }
 0x128   :  { %v797_v12 = vld [vmem:[%s2121_s3 + $0x188] sm:$0xff] }
 0x129   :  { %v823_v20 = vadd.f32 %v759_v13, %v485_v16  ;;  %v855_v21 = vadd.f32 %v791_v15, %v645_v17 }
 0x12a   :  { %v489_v22 = vpop.f32.mrb[24].mxu0  ;;  %v649_v24 = vpop.f32.mrb[24].mxu1 }
 0x12b   :  { %887 = vst.msk [vmem:[%s2122_s4 + $0x58] sm:$0xff] %vm170_vm0, %v823_v20  ;;  %919 = vst.msk [vmem:[%s2122_s4 + $0x158] sm:$0xff] %vm170_vm0, %v855_v21  ;;  %v490_v26 = vadd.f32 %v1604_v28, %v489_v22  ;;  %v650_v27 = vadd.f32 %v1604_v28, %v649_v24  ;;  %v491_v29 = vpop.f32.mrb[25].mxu0  ;;  %v651_v30 = vpop.f32.mrb[25].mxu1  ;;  %v766_v20 = vld [vmem:[%s2121_s3 + $0x90] sm:$0xff] }
 0x12c   :  { %v798_v22 = vld [vmem:[%s2121_s3 + $0x190] sm:$0xff] }
 0x12d   :  { %v824_v31 = vadd.f32 %v760_v23, %v490_v26  ;;  %v856_v32 = vadd.f32 %v792_v25, %v650_v27 }
 0x12e   :  { %v494_v33 = vpop.f32.mrb[26].mxu0  ;;  %v654_v35 = vpop.f32.mrb[26].mxu1 }
 0x12f   :  { %888 = vst.msk [vmem:[%s2122_s4 + $0x60] sm:$0xff] %vm170_vm0, %v824_v31  ;;  %920 = vst.msk [vmem:[%s2122_s4 + $0x160] sm:$0xff] %vm170_vm0, %v856_v32  ;;  %v495_v37 = vadd.f32 %v1604_v28, %v494_v33  ;;  %v655_v38 = vadd.f32 %v1604_v28, %v654_v35  ;;  %v496_v39 = vpop.f32.mrb[27].mxu0  ;;  %v656_v40 = vpop.f32.mrb[27].mxu1  ;;  %v767_v31 = vld [vmem:[%s2121_s3 + $0x98] sm:$0xff] }
 0x130   :  { %v799_v33 = vld [vmem:[%s2121_s3 + $0x198] sm:$0xff] }
 0x131   :  { %v825_v41 = vadd.f32 %v761_v34, %v495_v37  ;;  %v857_v42 = vadd.f32 %v793_v36, %v655_v38 }
 0x132   :  { %v499_v43 = vpop.f32.mrb[28].mxu0  ;;  %v659_v45 = vpop.f32.mrb[28].mxu1 }
 0x133   :  { %889 = vst.msk [vmem:[%s2122_s4 + $0x68] sm:$0xff] %vm170_vm0, %v825_v41  ;;  %921 = vst.msk [vmem:[%s2122_s4 + $0x168] sm:$0xff] %vm170_vm0, %v857_v42  ;;  %v500_v47 = vadd.f32 %v1604_v28, %v499_v43  ;;  %v660_v48 = vadd.f32 %v1604_v28, %v659_v45  ;;  %v501_v49 = vpop.f32.mrb[29].mxu0  ;;  %v661_v50 = vpop.f32.mrb[29].mxu1  ;;  %v768_v41 = vld [vmem:[%s2121_s3 + $0xa0] sm:$0xff] }
 0x134   :  { %v800_v43 = vld [vmem:[%s2121_s3 + $0x1a0] sm:$0xff] }
 0x135   :  { %v826_v51 = vadd.f32 %v762_v44, %v500_v47  ;;  %v858_v52 = vadd.f32 %v794_v46, %v660_v48 }
 0x136   :  { %v504_v53 = vpop.f32.mrb[30].mxu0  ;;  %v664_v55 = vpop.f32.mrb[30].mxu1 }
 0x137   :  { %890 = vst.msk [vmem:[%s2122_s4 + $0x70] sm:$0xff] %vm170_vm0, %v826_v51  ;;  %922 = vst.msk [vmem:[%s2122_s4 + $0x170] sm:$0xff] %vm170_vm0, %v858_v52  ;;  %v505_v57 = vadd.f32 %v1604_v28, %v504_v53  ;;  %v665_v58 = vadd.f32 %v1604_v28, %v664_v55  ;;  %v506_v59 = vpop.f32.mrb[31].mxu0  ;;  %v666_v60 = vpop.f32.mrb[31].mxu1  ;;  %v769_v51 = vld [vmem:[%s2121_s3 + $0xa8] sm:$0xff] }
 0x138   :  { %v801_v53 = vld [vmem:[%s2121_s3 + $0x1a8] sm:$0xff] }
 0x139   :  { %v827_v61 = vadd.f32 %v763_v54, %v505_v57  ;;  %v859_v62 = vadd.f32 %v795_v56, %v665_v58 }
 0x13a   :  { %v509_v63 = vpop.f32.mrb[32].mxu0  ;;  %v669_v1 = vpop.f32.mrb[32].mxu1 }
 0x13b   :  { %891 = vst.msk [vmem:[%s2122_s4 + $0x78] sm:$0xff] %vm170_vm0, %v827_v61  ;;  %923 = vst.msk [vmem:[%s2122_s4 + $0x178] sm:$0xff] %vm170_vm0, %v859_v62  ;;  %v510_v3 = vadd.f32 %v1604_v28, %v509_v63  ;;  %v670_v4 = vadd.f32 %v1604_v28, %v669_v1  ;;  %v511_v5 = vpop.f32.mrb[33].mxu0  ;;  %v671_v6 = vpop.f32.mrb[33].mxu1  ;;  %v770_v61 = vld [vmem:[%s2121_s3 + $0xb0] sm:$0xff] }
 0x13c   :  { %v802_v63 = vld [vmem:[%s2121_s3 + $0x1b0] sm:$0xff] }
 0x13d   :  { %v828_v7 = vadd.f32 %v764_v0, %v510_v3  ;;  %v860_v8 = vadd.f32 %v796_v2, %v670_v4 }
 0x13e   :  { %v514_v9 = vpop.f32.mrb[34].mxu0  ;;  %v674_v11 = vpop.f32.mrb[34].mxu1 }
 0x13f   :  { %892 = vst.msk [vmem:[%s2122_s4 + $0x80] sm:$0xff] %vm170_vm0, %v828_v7  ;;  %924 = vst.msk [vmem:[%s2122_s4 + $0x180] sm:$0xff] %vm170_vm0, %v860_v8  ;;  %v515_v13 = vadd.f32 %v1604_v28, %v514_v9  ;;  %v675_v14 = vadd.f32 %v1604_v28, %v674_v11  ;;  %v516_v15 = vpop.f32.mrb[35].mxu0  ;;  %v676_v16 = vpop.f32.mrb[35].mxu1  ;;  %v771_v7 = vld [vmem:[%s2121_s3 + $0xb8] sm:$0xff] }
 0x140   :  { %v803_v9 = vld [vmem:[%s2121_s3 + $0x1b8] sm:$0xff] }
 0x141   :  { %v829_v17 = vadd.f32 %v765_v10, %v515_v13  ;;  %v861_v18 = vadd.f32 %v797_v12, %v675_v14 }
 0x142   :  { %v519_v19 = vpop.f32.mrb[36].mxu0  ;;  %v679_v21 = vpop.f32.mrb[36].mxu1 }
 0x143   :  { %893 = vst.msk [vmem:[%s2122_s4 + $0x88] sm:$0xff] %vm170_vm0, %v829_v17  ;;  %925 = vst.msk [vmem:[%s2122_s4 + $0x188] sm:$0xff] %vm170_vm0, %v861_v18  ;;  %v520_v23 = vadd.f32 %v1604_v28, %v519_v19  ;;  %v680_v24 = vadd.f32 %v1604_v28, %v679_v21  ;;  %v521_v25 = vpop.f32.mrb[37].mxu0  ;;  %v681_v26 = vpop.f32.mrb[37].mxu1  ;;  %v772_v17 = vld [vmem:[%s2121_s3 + $0xc0] sm:$0xff] }
 0x144   :  { %v804_v19 = vld [vmem:[%s2121_s3 + $0x1c0] sm:$0xff] }
 0x145   :  { %v830_v27 = vadd.f32 %v766_v20, %v520_v23  ;;  %v862_v29 = vadd.f32 %v798_v22, %v680_v24 }
 0x146   :  { %v524_v30 = vpop.f32.mrb[38].mxu0  ;;  %v684_v32 = vpop.f32.mrb[38].mxu1 }
 0x147   :  { %894 = vst.msk [vmem:[%s2122_s4 + $0x90] sm:$0xff] %vm170_vm0, %v830_v27  ;;  %926 = vst.msk [vmem:[%s2122_s4 + $0x190] sm:$0xff] %vm170_vm0, %v862_v29  ;;  %v525_v34 = vadd.f32 %v1604_v28, %v524_v30  ;;  %v685_v35 = vadd.f32 %v1604_v28, %v684_v32  ;;  %v526_v36 = vpop.f32.mrb[39].mxu0  ;;  %v686_v37 = vpop.f32.mrb[39].mxu1  ;;  %v773_v27 = vld [vmem:[%s2121_s3 + $0xc8] sm:$0xff] }
 0x148   :  { %v805_v30 = vld [vmem:[%s2121_s3 + $0x1c8] sm:$0xff] }
 0x149   :  { %v831_v38 = vadd.f32 %v767_v31, %v525_v34  ;;  %v863_v39 = vadd.f32 %v799_v33, %v685_v35 }
 0x14a   :  { %v529_v40 = vpop.f32.mrb[40].mxu0  ;;  %v689_v42 = vpop.f32.mrb[40].mxu1 }
 0x14b   :  { %895 = vst.msk [vmem:[%s2122_s4 + $0x98] sm:$0xff] %vm170_vm0, %v831_v38  ;;  %927 = vst.msk [vmem:[%s2122_s4 + $0x198] sm:$0xff] %vm170_vm0, %v863_v39  ;;  %v530_v44 = vadd.f32 %v1604_v28, %v529_v40  ;;  %v690_v45 = vadd.f32 %v1604_v28, %v689_v42  ;;  %v531_v46 = vpop.f32.mrb[41].mxu0  ;;  %v691_v47 = vpop.f32.mrb[41].mxu1  ;;  %v774_v38 = vld [vmem:[%s2121_s3 + $0xd0] sm:$0xff] }
 0x14c   :  { %v806_v40 = vld [vmem:[%s2121_s3 + $0x1d0] sm:$0xff] }
 0x14d   :  { %v832_v48 = vadd.f32 %v768_v41, %v530_v44  ;;  %v864_v49 = vadd.f32 %v800_v43, %v690_v45 }
 0x14e   :  { %v534_v50 = vpop.f32.mrb[42].mxu0  ;;  %v694_v52 = vpop.f32.mrb[42].mxu1 }
 0x14f   :  { %896 = vst.msk [vmem:[%s2122_s4 + $0xa0] sm:$0xff] %vm170_vm0, %v832_v48  ;;  %928 = vst.msk [vmem:[%s2122_s4 + $0x1a0] sm:$0xff] %vm170_vm0, %v864_v49  ;;  %v535_v54 = vadd.f32 %v1604_v28, %v534_v50  ;;  %v695_v55 = vadd.f32 %v1604_v28, %v694_v52  ;;  %v536_v56 = vpop.f32.mrb[43].mxu0  ;;  %v696_v57 = vpop.f32.mrb[43].mxu1  ;;  %v775_v48 = vld [vmem:[%s2121_s3 + $0xd8] sm:$0xff] }
 0x150   :  { %v807_v50 = vld [vmem:[%s2121_s3 + $0x1d8] sm:$0xff] }
 0x151   :  { %v833_v58 = vadd.f32 %v769_v51, %v535_v54  ;;  %v865_v59 = vadd.f32 %v801_v53, %v695_v55 }
 0x152   :  { %v539_v60 = vpop.f32.mrb[44].mxu0  ;;  %v699_v62 = vpop.f32.mrb[44].mxu1 }
 0x153   :  { %897 = vst.msk [vmem:[%s2122_s4 + $0xa8] sm:$0xff] %vm170_vm0, %v833_v58  ;;  %929 = vst.msk [vmem:[%s2122_s4 + $0x1a8] sm:$0xff] %vm170_vm0, %v865_v59  ;;  %v540_v0 = vadd.f32 %v1604_v28, %v539_v60  ;;  %v700_v1 = vadd.f32 %v1604_v28, %v699_v62  ;;  %v541_v2 = vpop.f32.mrb[45].mxu0  ;;  %v701_v3 = vpop.f32.mrb[45].mxu1  ;;  %v776_v58 = vld [vmem:[%s2121_s3 + $0xe0] sm:$0xff] }
 0x154   :  { %v808_v60 = vld [vmem:[%s2121_s3 + $0x1e0] sm:$0xff] }
 0x155   :  { %v834_v4 = vadd.f32 %v770_v61, %v540_v0  ;;  %v866_v5 = vadd.f32 %v802_v63, %v700_v1 }
 0x156   :  { %v544_v6 = vpop.f32.mrb[46].mxu0  ;;  %v704_v8 = vpop.f32.mrb[46].mxu1 }
 0x157   :  { %898 = vst.msk [vmem:[%s2122_s4 + $0xb0] sm:$0xff] %vm170_vm0, %v834_v4  ;;  %930 = vst.msk [vmem:[%s2122_s4 + $0x1b0] sm:$0xff] %vm170_vm0, %v866_v5  ;;  %v545_v10 = vadd.f32 %v1604_v28, %v544_v6  ;;  %v705_v11 = vadd.f32 %v1604_v28, %v704_v8  ;;  %v546_v12 = vpop.f32.mrb[47].mxu0  ;;  %v706_v13 = vpop.f32.mrb[47].mxu1  ;;  %v777_v4 = vld [vmem:[%s2121_s3 + $0xe8] sm:$0xff] }
 0x158   :  { %v809_v6 = vld [vmem:[%s2121_s3 + $0x1e8] sm:$0xff] }
 0x159   :  { %v835_v14 = vadd.f32 %v771_v7, %v545_v10  ;;  %v867_v15 = vadd.f32 %v803_v9, %v705_v11 }
 0x15a   :  { %v549_v16 = vpop.f32.mrb[48].mxu0  ;;  %v709_v18 = vpop.f32.mrb[48].mxu1 }
 0x15b   :  { %899 = vst.msk [vmem:[%s2122_s4 + $0xb8] sm:$0xff] %vm170_vm0, %v835_v14  ;;  %931 = vst.msk [vmem:[%s2122_s4 + $0x1b8] sm:$0xff] %vm170_vm0, %v867_v15  ;;  %v550_v20 = vadd.f32 %v1604_v28, %v549_v16  ;;  %v710_v21 = vadd.f32 %v1604_v28, %v709_v18  ;;  %v551_v22 = vpop.f32.mrb[49].mxu0  ;;  %v711_v23 = vpop.f32.mrb[49].mxu1  ;;  %v778_v14 = vld [vmem:[%s2121_s3 + $0xf0] sm:$0xff] }
 0x15c   :  { %v810_v16 = vld [vmem:[%s2121_s3 + $0x1f0] sm:$0xff] }
 0x15d   :  { %v836_v24 = vadd.f32 %v772_v17, %v550_v20  ;;  %v868_v25 = vadd.f32 %v804_v19, %v710_v21 }
 0x15e   :  { %v554_v26 = vpop.f32.mrb[50].mxu0  ;;  %v714_v29 = vpop.f32.mrb[50].mxu1 }
 0x15f   :  { %900 = vst.msk [vmem:[%s2122_s4 + $0xc0] sm:$0xff] %vm170_vm0, %v836_v24  ;;  %932 = vst.msk [vmem:[%s2122_s4 + $0x1c0] sm:$0xff] %vm170_vm0, %v868_v25  ;;  %v555_v31 = vadd.f32 %v1604_v28, %v554_v26  ;;  %v715_v32 = vadd.f32 %v1604_v28, %v714_v29  ;;  %v556_v33 = vpop.f32.mrb[51].mxu0  ;;  %v716_v34 = vpop.f32.mrb[51].mxu1  ;;  %v779_v24 = vld [vmem:[%s2121_s3 + $0xf8] sm:$0xff] }
 0x160   :  { %v811_v26 = vld [vmem:[%s2121_s3 + $0x1f8] sm:$0xff] }
 0x161   :  { %v837_v35 = vadd.f32 %v773_v27, %v555_v31  ;;  %v869_v36 = vadd.f32 %v805_v30, %v715_v32 }
 0x162   :  { %v559_v37 = vpop.f32.mrb[52].mxu0  ;;  %v719_v39 = vpop.f32.mrb[52].mxu1 }
 0x163   :  { %901 = vst.msk [vmem:[%s2122_s4 + $0xc8] sm:$0xff] %vm170_vm0, %v837_v35  ;;  %933 = vst.msk [vmem:[%s2122_s4 + $0x1c8] sm:$0xff] %vm170_vm0, %v869_v36  ;;  %v560_v41 = vadd.f32 %v1604_v28, %v559_v37  ;;  %v720_v42 = vadd.f32 %v1604_v28, %v719_v39  ;;  %v561_v43 = vpop.f32.mrb[53].mxu0  ;;  %v721_v44 = vpop.f32.mrb[53].mxu1 }
 0x165   :  { %v838_v45 = vadd.f32 %v774_v38, %v560_v41  ;;  %v870_v46 = vadd.f32 %v806_v40, %v720_v42 }
 0x166   :  { %v564_v47 = vpop.f32.mrb[54].mxu0  ;;  %v724_v49 = vpop.f32.mrb[54].mxu1 }
 0x167   :  { %902 = vst.msk [vmem:[%s2122_s4 + $0xd0] sm:$0xff] %vm170_vm0, %v838_v45  ;;  %934 = vst.msk [vmem:[%s2122_s4 + $0x1d0] sm:$0xff] %vm170_vm0, %v870_v46  ;;  %v565_v51 = vadd.f32 %v1604_v28, %v564_v47  ;;  %v725_v52 = vadd.f32 %v1604_v28, %v724_v49  ;;  %v566_v53 = vpop.f32.mrb[55].mxu0  ;;  %v726_v54 = vpop.f32.mrb[55].mxu1 }
 0x169   :  { %v839_v55 = vadd.f32 %v775_v48, %v565_v51  ;;  %v871_v56 = vadd.f32 %v807_v50, %v725_v52 }
 0x16a   :  { %v569_v57 = vpop.f32.mrb[56].mxu0  ;;  %v729_v59 = vpop.f32.mrb[56].mxu1 }
 0x16b   :  { %903 = vst.msk [vmem:[%s2122_s4 + $0xd8] sm:$0xff] %vm170_vm0, %v839_v55  ;;  %935 = vst.msk [vmem:[%s2122_s4 + $0x1d8] sm:$0xff] %vm170_vm0, %v871_v56  ;;  %v570_v61 = vadd.f32 %v1604_v28, %v569_v57  ;;  %v730_v62 = vadd.f32 %v1604_v28, %v729_v59  ;;  %v571_v63 = vpop.f32.mrb[57].mxu0  ;;  %v731_v0 = vpop.f32.mrb[57].mxu1 }
 0x16d   :  { %v840_v1 = vadd.f32 %v776_v58, %v570_v61  ;;  %v872_v2 = vadd.f32 %v808_v60, %v730_v62 }
 0x16e   :  { %v574_v3 = vpop.f32.mrb[58].mxu0  ;;  %v734_v5 = vpop.f32.mrb[58].mxu1 }
 0x16f   :  { %904 = vst.msk [vmem:[%s2122_s4 + $0xe0] sm:$0xff] %vm170_vm0, %v840_v1  ;;  %936 = vst.msk [vmem:[%s2122_s4 + $0x1e0] sm:$0xff] %vm170_vm0, %v872_v2  ;;  %v575_v7 = vadd.f32 %v1604_v28, %v574_v3  ;;  %v735_v8 = vadd.f32 %v1604_v28, %v734_v5  ;;  %v576_v9 = vpop.f32.mrb[59].mxu0  ;;  %v736_v10 = vpop.f32.mrb[59].mxu1 }
 0x171   :  { %v841_v11 = vadd.f32 %v777_v4, %v575_v7  ;;  %v873_v12 = vadd.f32 %v809_v6, %v735_v8 }
 0x172   :  { %v579_v13 = vpop.f32.mrb[60].mxu0  ;;  %v739_v15 = vpop.f32.mrb[60].mxu1 }
 0x173   :  { %905 = vst.msk [vmem:[%s2122_s4 + $0xe8] sm:$0xff] %vm170_vm0, %v841_v11  ;;  %937 = vst.msk [vmem:[%s2122_s4 + $0x1e8] sm:$0xff] %vm170_vm0, %v873_v12  ;;  %v580_v17 = vadd.f32 %v1604_v28, %v579_v13  ;;  %v740_v18 = vadd.f32 %v1604_v28, %v739_v15  ;;  %v581_v19 = vpop.f32.mrb[61].mxu0  ;;  %v741_v20 = vpop.f32.mrb[61].mxu1 }
 0x175   :  { %v842_v21 = vadd.f32 %v778_v14, %v580_v17  ;;  %v874_v22 = vadd.f32 %v810_v16, %v740_v18 }
 0x176   :  { %v584_v23 = vpop.f32.mrb[62].mxu0  ;;  %v744_v25 = vpop.f32.mrb[62].mxu1 }
 0x177   :  { %906 = vst.msk [vmem:[%s2122_s4 + $0xf0] sm:$0xff] %vm170_vm0, %v842_v21  ;;  %938 = vst.msk [vmem:[%s2122_s4 + $0x1f0] sm:$0xff] %vm170_vm0, %v874_v22  ;;  %v585_v27 = vadd.f32 %v1604_v28, %v584_v23  ;;  %v745_v29 = vadd.f32 %v1604_v28, %v744_v25  ;;  %v586_v30 = vpop.f32.mrb[63].mxu0  ;;  %v746_v31 = vpop.f32.mrb[63].mxu1 }
 0x179   :  { %v843_v32 = vadd.f32 %v779_v24, %v585_v27  ;;  %v875_v33 = vadd.f32 %v811_v26, %v745_v29 }
 0x17b   :  { %907 = vst.msk [vmem:[%s2122_s4 + $0xf8] sm:$0xff] %vm170_vm0, %v843_v32  ;;  %939 = vst.msk [vmem:[%s2122_s4 + $0x1f8] sm:$0xff] %vm170_vm0, %v875_v33 }

</bundles_post_ra>
